<compile_context>
chip_gen: v7x
topology: tpu7x:2x2x1
jax: 0.10.0
libtpu: 0.0.40
codegen_flags: <defaults>
</compile_context>

<pallas_src>
import jax
import jax.numpy as jnp
from jax.experimental import pallas as pl
from jax.experimental.pallas import tpu as pltpu

MSG_EPS = 1e-7   # GENConv eps added to relu'd messages
LN_EPS = 1e-5    # LayerNorm eps
GN_EPS = 1e-5    # GraphNorm eps


# ----------------------------- fused kernel -----------------------------

def _make_kernel(treedef, n_params):
    """Build the fused forward kernel; params arrive as flattened refs."""

    def kernel(*refs):
        x_ref, srcoh_ref, dstoht_ref, mask_ref = refs[:4]
        p = jax.tree_util.tree_unflatten(treedef, refs[4:4 + n_params])
        out_ref = refs[4 + n_params]

        src_oh = srcoh_ref[...]       # [E, N] bf16 one-hot (source gather)
        dst_oh_t = dstoht_ref[...]    # [N, E] bf16 one-hot^T (dest scatter-sum)

        def dot32(a, w):
            # bf16 MXU matmul with f32 accumulation.
            return jnp.dot(a.astype(jnp.bfloat16), w.astype(jnp.bfloat16),
                           preferred_element_type=jnp.float32)

        def layer_norm(v, g, b):              # node-wise (feature dim)
            mu = jnp.mean(v, axis=-1, keepdims=True)
            var = jnp.mean((v - mu) ** 2, axis=-1, keepdims=True)
            return (v - mu) * jax.lax.rsqrt(var + LN_EPS) * g + b

        def graph_norm(v, g, b, alpha):       # PyG GraphNorm, single graph
            mu = jnp.mean(v, axis=0, keepdims=True)
            cen = v - alpha * mu
            var = jnp.mean(cen * cen, axis=0, keepdims=True)
            return g * cen * jax.lax.rsqrt(var + GN_EPS) + b

        def genconv(h, lp):
            # GENConv(aggr='softmax', num_layers=2, norm='layer')
            if "lin_src_w" in lp:             # only when in_channels != out
                h_src = dot32(h, lp["lin_src_w"][...]) + lp["lin_src_b"][...]
                h_dst = dot32(h, lp["lin_dst_w"][...]) + lp["lin_dst_b"][...]
            else:
                h_src, h_dst = h, h
            # message: relu(x_src[src[e]]) + eps  (gather as one-hot matmul)
            msg = jnp.maximum(dot32(src_oh, h_src), 0.0) + MSG_EPS     # [E, F]
            t = lp["t"][0, 0]                                          # SMEM
            logits = msg * t
            # Global per-feature max shift: constant within every destination
            # segment, so the softmax value equals PyG's per-segment shift.
            ex = jnp.exp(logits - jnp.max(logits, axis=0, keepdims=True))
            # Node-level numerator / denominator (no per-edge scatter-back).
            num = dot32(dst_oh_t, ex * msg)                            # [N, F]
            den = dot32(dst_oh_t, ex) + 1e-16                          # [N, F]
            agg = num * pl.reciprocal(den, approx=True)
            out = agg + h_dst                                          # root residual
            # GENConv MLP: Linear -> LayerNorm -> ReLU -> Linear
            hh = dot32(out, lp["mlp_w1"][...]) + lp["mlp_b1"][...]
            hh = jnp.maximum(
                layer_norm(hh, lp["mlp_ln_g"][...], lp["mlp_ln_b"][...]), 0.0)
            return dot32(hh, lp["mlp_w2"][...]) + lp["mlp_b2"][...]

        h = x_ref[...]
        # --- GNN layers: x = relu(GraphNorm(conv(x, edge_index))) ---
        for lp in p["convs"]:
            h = genconv(h, lp)
            h = graph_norm(h, lp["gn_g"][...], lp["gn_b"][...],
                           lp["gn_alpha"][...])
            h = jnp.maximum(h, 0.0)

        # --- apply_mlp_layers (no dropout) ---
        for lp in p["head_mlp"]:
            h = dot32(h, lp["w"][...]) + lp["b"][...]
            h = jnp.maximum(layer_norm(h, lp["ln_g"][...], lp["ln_b"][...]), 0.0)

        # --- fused regression + classification heads; masked scatter == mask mul
        heads = dot32(h, p["head_w"][...]) + p["head_b"][...]          # [N, 2]
        out_ref[...] = heads * mask_ref[...]

    return kernel


def modular_gnn_forward(params, x, src_oh, dst_oh_t, mask_f):
    flat, treedef = jax.tree_util.tree_flatten(params)
    data = (x, src_oh, dst_oh_t, mask_f)

    def spec(a):
        ms = (pltpu.MemorySpace.SMEM if a.shape == (1, 1)
              else pltpu.MemorySpace.VMEM)
        return pl.BlockSpec(memory_space=ms)

    out = pl.pallas_call(
        _make_kernel(treedef, len(flat)),
        out_shape=jax.ShapeDtypeStruct((x.shape[0], 2), jnp.float32),
        in_specs=[spec(a) for a in (*data, *flat)],
        out_specs=pl.BlockSpec(memory_space=pltpu.MemorySpace.VMEM),
    )(*data, *flat)

    regression_out = out[:, 0]   # out_channels == 1
    logits = out[:, 1]
    return regression_out, logits


# ----------------------------- parameters -----------------------------

def init_params(key, in_size, emb, out_channels, gnn_layers, shared_mlp_layers):
    keys = iter(jax.random.split(key, 128))

    def rnd(shape, scale=0.2, dtype=jnp.float32):
        return (scale * jax.random.normal(next(keys), shape,
                                          jnp.float32)).astype(dtype)

    convs = []
    for layer in range(gnn_layers):
        cin = in_size if layer == 0 else emb
        lp = {}
        if cin != emb:                                  # GENConv lin_src/dst
            lp["lin_src_w"] = rnd((cin, emb), dtype=jnp.bfloat16)
            lp["lin_src_b"] = rnd((1, emb), 0.05)
            lp["lin_dst_w"] = rnd((cin, emb), dtype=jnp.bfloat16)
            lp["lin_dst_b"] = rnd((1, emb), 0.05)
        lp["t"] = jnp.ones((1, 1), jnp.float32)         # learn_t init value
        hid = 2 * emb                                   # expansion = 2
        lp["mlp_w1"] = rnd((emb, hid), dtype=jnp.bfloat16)
        lp["mlp_b1"] = rnd((1, hid), 0.05)
        lp["mlp_ln_g"] = jnp.ones((1, hid), jnp.float32)
        lp["mlp_ln_b"] = jnp.zeros((1, hid), jnp.float32)
        lp["mlp_w2"] = rnd((hid, emb), dtype=jnp.bfloat16)
        lp["mlp_b2"] = rnd((1, emb), 0.05)
        lp["gn_g"] = jnp.ones((1, emb), jnp.float32)    # GraphNorm weight
        lp["gn_b"] = jnp.zeros((1, emb), jnp.float32)   # GraphNorm bias
        lp["gn_alpha"] = jnp.ones((1, emb), jnp.float32)  # GraphNorm mean_scale
        convs.append(lp)

    head_mlp = []
    for _ in range(shared_mlp_layers):                  # Linear(emb, emb) each
        head_mlp.append({
            "w": rnd((emb, emb), dtype=jnp.bfloat16),
            "b": rnd((1, emb), 0.05),
            "ln_g": jnp.ones((1, emb), jnp.float32),
            "ln_b": jnp.zeros((1, emb), jnp.float32),
        })

    # regression head (out_channels cols) + classification head (1 col), fused
    head_w = jnp.concatenate([rnd((emb, out_channels)), rnd((emb, 1))],
                             axis=1).astype(jnp.bfloat16)
    head_b = jnp.concatenate([rnd((1, out_channels), 0.05), rnd((1, 1), 0.05)],
                             axis=1)

    return {"convs": convs, "head_mlp": head_mlp,
            "head_w": head_w, "head_b": head_b}


# ----------------------------- main -----------------------------

if __name__ == "__main__":
    N_NODES, N_EDGES = 64, 256
    IN_SIZE, EMB, OUT_CH = 16, 32, 1
    GNN_LAYERS, SHARED_MLP_LAYERS = 3, 2

    key = jax.random.PRNGKey(0)
    k_x, k_e, k_m, k_p = jax.random.split(key, 4)

    x = jax.random.normal(k_x, (N_NODES, IN_SIZE), jnp.float32)
    edge_index = jax.random.randint(k_e, (2, N_EDGES), 0, N_NODES, jnp.int32)
    mask = jax.random.bernoulli(k_m, 0.3, (N_NODES,))

    params = init_params(k_p, IN_SIZE, EMB, OUT_CH,
                         GNN_LAYERS, SHARED_MLP_LAYERS)

    # Glue: edge_index -> dense one-hot gather / scatter operators (bf16 is
    # exact for one-hots).  PyG flow='source_to_target': row 0 = source j
    # (message gather), row 1 = destination i (aggregation index).
    src_oh = jax.nn.one_hot(edge_index[0], N_NODES, dtype=jnp.bfloat16)      # [E,N]
    dst_oh_t = jax.nn.one_hot(edge_index[1], N_NODES, dtype=jnp.bfloat16).T  # [N,E]
    mask_f = mask.astype(jnp.float32)[:, None]                               # [N,1]

    fwd = jax.jit(modular_gnn_forward)
    regression_out, logits = fwd(params, x, src_oh, dst_oh_t, mask_f)
    jax.block_until_ready((regression_out, logits))

    assert regression_out.shape == (N_NODES,)
    assert logits.shape == (N_NODES,)
    assert bool(jnp.all(jnp.isfinite(regression_out)))
    assert bool(jnp.all(jnp.isfinite(logits)))
    print("KERNEL_OK")
</pallas_src>

<mosaic_0001>
module attributes {stable_mosaic.version = 11 : i64} {
  func.func @kernel(%arg0: memref<64x16xf32, #tpu.memory_space<vmem>>, %arg1: memref<256x64xbf16, #tpu.memory_space<vmem>>, %arg2: memref<64x256xbf16, #tpu.memory_space<vmem>>, %arg3: memref<64x1xf32, #tpu.memory_space<vmem>>, %arg4: memref<1x32xf32, #tpu.memory_space<vmem>>, %arg5: memref<1x32xf32, #tpu.memory_space<vmem>>, %arg6: memref<1x32xf32, #tpu.memory_space<vmem>>, %arg7: memref<1x32xf32, #tpu.memory_space<vmem>>, %arg8: memref<16x32xbf16, #tpu.memory_space<vmem>>, %arg9: memref<1x32xf32, #tpu.memory_space<vmem>>, %arg10: memref<16x32xbf16, #tpu.memory_space<vmem>>, %arg11: memref<1x64xf32, #tpu.memory_space<vmem>>, %arg12: memref<1x32xf32, #tpu.memory_space<vmem>>, %arg13: memref<1x64xf32, #tpu.memory_space<vmem>>, %arg14: memref<1x64xf32, #tpu.memory_space<vmem>>, %arg15: memref<32x64xbf16, #tpu.memory_space<vmem>>, %arg16: memref<64x32xbf16, #tpu.memory_space<vmem>>, %arg17: memref<1x1xf32, #tpu.memory_space<smem>>, %arg18: memref<1x32xf32, #tpu.memory_space<vmem>>, %arg19: memref<1x32xf32, #tpu.memory_space<vmem>>, %arg20: memref<1x32xf32, #tpu.memory_space<vmem>>, %arg21: memref<1x64xf32, #tpu.memory_space<vmem>>, %arg22: memref<1x32xf32, #tpu.memory_space<vmem>>, %arg23: memref<1x64xf32, #tpu.memory_space<vmem>>, %arg24: memref<1x64xf32, #tpu.memory_space<vmem>>, %arg25: memref<32x64xbf16, #tpu.memory_space<vmem>>, %arg26: memref<64x32xbf16, #tpu.memory_space<vmem>>, %arg27: memref<1x1xf32, #tpu.memory_space<smem>>, %arg28: memref<1x32xf32, #tpu.memory_space<vmem>>, %arg29: memref<1x32xf32, #tpu.memory_space<vmem>>, %arg30: memref<1x32xf32, #tpu.memory_space<vmem>>, %arg31: memref<1x64xf32, #tpu.memory_space<vmem>>, %arg32: memref<1x32xf32, #tpu.memory_space<vmem>>, %arg33: memref<1x64xf32, #tpu.memory_space<vmem>>, %arg34: memref<1x64xf32, #tpu.memory_space<vmem>>, %arg35: memref<32x64xbf16, #tpu.memory_space<vmem>>, %arg36: memref<64x32xbf16, #tpu.memory_space<vmem>>, %arg37: memref<1x1xf32, #tpu.memory_space<smem>>, %arg38: memref<1x2xf32, #tpu.memory_space<vmem>>, %arg39: memref<1x32xf32, #tpu.memory_space<vmem>>, %arg40: memref<1x32xf32, #tpu.memory_space<vmem>>, %arg41: memref<1x32xf32, #tpu.memory_space<vmem>>, %arg42: memref<32x32xbf16, #tpu.memory_space<vmem>>, %arg43: memref<1x32xf32, #tpu.memory_space<vmem>>, %arg44: memref<1x32xf32, #tpu.memory_space<vmem>>, %arg45: memref<1x32xf32, #tpu.memory_space<vmem>>, %arg46: memref<32x32xbf16, #tpu.memory_space<vmem>>, %arg47: memref<32x2xbf16, #tpu.memory_space<vmem>>, %arg48: memref<64x2xf32, #tpu.memory_space<vmem>>) attributes {dimension_semantics = [], scalar_prefetch = 0 : i64, scratch_operands = 0 : i64, tpu.core_type = #tpu.core_type<tc>} {
    %c0 = arith.constant 0 : index
    %c0_0 = arith.constant 0 : index
    %0 = vector.load %arg1[%c0, %c0_0] : memref<256x64xbf16, #tpu.memory_space<vmem>>, vector<256x64xbf16>
    %c0_1 = arith.constant 0 : index
    %c0_2 = arith.constant 0 : index
    %1 = vector.load %arg2[%c0_1, %c0_2] : memref<64x256xbf16, #tpu.memory_space<vmem>>, vector<64x256xbf16>
    %c0_3 = arith.constant 0 : index
    %c0_4 = arith.constant 0 : index
    %2 = vector.load %arg0[%c0_3, %c0_4] : memref<64x16xf32, #tpu.memory_space<vmem>>, vector<64x16xf32>
    %c0_5 = arith.constant 0 : index
    %c0_6 = arith.constant 0 : index
    %3 = vector.load %arg10[%c0_5, %c0_6] : memref<16x32xbf16, #tpu.memory_space<vmem>>, vector<16x32xbf16>
    %4 = arith.truncf %2 : vector<64x16xf32> to vector<64x16xbf16>
    %cst = arith.constant dense<0.000000e+00> : vector<64x32xf32>
    %5 = tpu.matmul %4, %3, %cst {dimension_numbers = #tpu.dot_dimension_numbers<[1], [0], [0], [1], [0, 0, 1, 1], [], []>} : vector<64x16xbf16>, vector<16x32xbf16>, vector<64x32xf32> -> vector<64x32xf32>
    %c0_7 = arith.constant 0 : index
    %c0_8 = arith.constant 0 : index
    %6 = vector.load %arg9[%c0_7, %c0_8] : memref<1x32xf32, #tpu.memory_space<vmem>>, vector<1x32xf32>
    %7 = vector.broadcast %6 : vector<1x32xf32> to vector<64x32xf32>
    %8 = arith.addf %5, %7 : vector<64x32xf32>
    %c0_9 = arith.constant 0 : index
    %c0_10 = arith.constant 0 : index
    %9 = vector.load %arg8[%c0_9, %c0_10] : memref<16x32xbf16, #tpu.memory_space<vmem>>, vector<16x32xbf16>
    %10 = arith.truncf %2 : vector<64x16xf32> to vector<64x16xbf16>
    %cst_11 = arith.constant dense<0.000000e+00> : vector<64x32xf32>
    %11 = tpu.matmul %10, %9, %cst_11 {dimension_numbers = #tpu.dot_dimension_numbers<[1], [0], [0], [1], [0, 0, 1, 1], [], []>} : vector<64x16xbf16>, vector<16x32xbf16>, vector<64x32xf32> -> vector<64x32xf32>
    %c0_12 = arith.constant 0 : index
    %c0_13 = arith.constant 0 : index
    %12 = vector.load %arg7[%c0_12, %c0_13] : memref<1x32xf32, #tpu.memory_space<vmem>>, vector<1x32xf32>
    %13 = vector.broadcast %12 : vector<1x32xf32> to vector<64x32xf32>
    %14 = arith.addf %11, %13 : vector<64x32xf32>
    %15 = arith.truncf %8 : vector<64x32xf32> to vector<64x32xbf16>
    %cst_14 = arith.constant dense<0.000000e+00> : vector<256x32xf32>
    %16 = tpu.matmul %0, %15, %cst_14 {dimension_numbers = #tpu.dot_dimension_numbers<[1], [0], [0], [1], [0, 0, 1, 1], [], []>} : vector<256x64xbf16>, vector<64x32xbf16>, vector<256x32xf32> -> vector<256x32xf32>
    %cst_15 = arith.constant 0.000000e+00 : f32
    %17 = vector.broadcast %cst_15 : f32 to vector<256x32xf32>
    %18 = arith.maximumf %16, %17 : vector<256x32xf32>
    %cst_16 = arith.constant 1.000000e-07 : f32
    %19 = vector.broadcast %cst_16 : f32 to vector<256x32xf32>
    %20 = arith.addf %18, %19 : vector<256x32xf32>
    %c0_17 = arith.constant 0 : index
    %c0_18 = arith.constant 0 : index
    %21 = memref.load %arg17[%c0_17, %c0_18] : memref<1x1xf32, #tpu.memory_space<smem>>
    %22 = vector.broadcast %21 : f32 to vector<256x32xf32>
    %23 = arith.mulf %20, %22 : vector<256x32xf32>
    %cst_19 = arith.constant dense<0xFF800000> : vector<32xf32>
    %24 = vector.multi_reduction <maximumf>, %23, %cst_19 [0] : vector<256x32xf32> to vector<32xf32>
    %25 = vector.shape_cast %24 : vector<32xf32> to vector<1x32xf32>
    %26 = vector.broadcast %25 : vector<1x32xf32> to vector<256x32xf32>
    %27 = arith.subf %23, %26 : vector<256x32xf32>
    %28 = math.exp %27 : vector<256x32xf32>
    %29 = arith.mulf %28, %20 : vector<256x32xf32>
    %30 = arith.truncf %29 : vector<256x32xf32> to vector<256x32xbf16>
    %cst_20 = arith.constant dense<0.000000e+00> : vector<64x32xf32>
    %31 = tpu.matmul %1, %30, %cst_20 {dimension_numbers = #tpu.dot_dimension_numbers<[1], [0], [0], [1], [0, 0, 1, 1], [], []>} : vector<64x256xbf16>, vector<256x32xbf16>, vector<64x32xf32> -> vector<64x32xf32>
    %32 = arith.truncf %28 : vector<256x32xf32> to vector<256x32xbf16>
    %cst_21 = arith.constant dense<0.000000e+00> : vector<64x32xf32>
    %33 = tpu.matmul %1, %32, %cst_21 {dimension_numbers = #tpu.dot_dimension_numbers<[1], [0], [0], [1], [0, 0, 1, 1], [], []>} : vector<64x256xbf16>, vector<256x32xbf16>, vector<64x32xf32> -> vector<64x32xf32>
    %cst_22 = arith.constant 1.000000e-16 : f32
    %34 = vector.broadcast %cst_22 : f32 to vector<64x32xf32>
    %35 = arith.addf %33, %34 : vector<64x32xf32>
    %36 = tpu.reciprocal %35 {approx = true} : vector<64x32xf32> -> vector<64x32xf32>
    %37 = arith.mulf %31, %36 : vector<64x32xf32>
    %38 = arith.addf %37, %14 : vector<64x32xf32>
    %c0_23 = arith.constant 0 : index
    %c0_24 = arith.constant 0 : index
    %39 = vector.load %arg15[%c0_23, %c0_24] : memref<32x64xbf16, #tpu.memory_space<vmem>>, vector<32x64xbf16>
    %40 = arith.truncf %38 : vector<64x32xf32> to vector<64x32xbf16>
    %cst_25 = arith.constant dense<0.000000e+00> : vector<64x64xf32>
    %41 = tpu.matmul %40, %39, %cst_25 {dimension_numbers = #tpu.dot_dimension_numbers<[1], [0], [0], [1], [0, 0, 1, 1], [], []>} : vector<64x32xbf16>, vector<32x64xbf16>, vector<64x64xf32> -> vector<64x64xf32>
    %c0_26 = arith.constant 0 : index
    %c0_27 = arith.constant 0 : index
    %42 = vector.load %arg11[%c0_26, %c0_27] : memref<1x64xf32, #tpu.memory_space<vmem>>, vector<1x64xf32>
    %43 = vector.broadcast %42 : vector<1x64xf32> to vector<64x64xf32>
    %44 = arith.addf %41, %43 : vector<64x64xf32>
    %c0_28 = arith.constant 0 : index
    %c0_29 = arith.constant 0 : index
    %45 = vector.load %arg14[%c0_28, %c0_29] : memref<1x64xf32, #tpu.memory_space<vmem>>, vector<1x64xf32>
    %c0_30 = arith.constant 0 : index
    %c0_31 = arith.constant 0 : index
    %46 = vector.load %arg13[%c0_30, %c0_31] : memref<1x64xf32, #tpu.memory_space<vmem>>, vector<1x64xf32>
    %cst_32 = arith.constant dense<0.000000e+00> : vector<64xf32>
    %47 = vector.multi_reduction <add>, %44, %cst_32 [1] : vector<64x64xf32> to vector<64xf32>
    %48 = vector.shape_cast %47 : vector<64xf32> to vector<64x1xf32>
    %cst_33 = arith.constant 6.400000e+01 : f32
    %49 = vector.broadcast %cst_33 : f32 to vector<64x1xf32>
    %50 = arith.divf %48, %49 : vector<64x1xf32>
    %51 = vector.broadcast %50 : vector<64x1xf32> to vector<64x64xf32>
    %52 = arith.subf %44, %51 : vector<64x64xf32>
    %53 = arith.mulf %52, %52 : vector<64x64xf32>
    %cst_34 = arith.constant dense<0.000000e+00> : vector<64xf32>
    %54 = vector.multi_reduction <add>, %53, %cst_34 [1] : vector<64x64xf32> to vector<64xf32>
    %55 = vector.shape_cast %54 : vector<64xf32> to vector<64x1xf32>
    %cst_35 = arith.constant 6.400000e+01 : f32
    %56 = vector.broadcast %cst_35 : f32 to vector<64x1xf32>
    %57 = arith.divf %55, %56 : vector<64x1xf32>
    %58 = vector.broadcast %50 : vector<64x1xf32> to vector<64x64xf32>
    %59 = arith.subf %44, %58 : vector<64x64xf32>
    %cst_36 = arith.constant 9.99999974E-6 : f32
    %60 = vector.broadcast %cst_36 : f32 to vector<64x1xf32>
    %61 = arith.addf %57, %60 : vector<64x1xf32>
    %62 = math.rsqrt %61 : vector<64x1xf32>
    %63 = vector.broadcast %62 : vector<64x1xf32> to vector<64x64xf32>
    %64 = arith.mulf %59, %63 : vector<64x64xf32>
    %65 = vector.broadcast %45 : vector<1x64xf32> to vector<64x64xf32>
    %66 = arith.mulf %64, %65 : vector<64x64xf32>
    %67 = vector.broadcast %46 : vector<1x64xf32> to vector<64x64xf32>
    %68 = arith.addf %66, %67 : vector<64x64xf32>
    %cst_37 = arith.constant 0.000000e+00 : f32
    %69 = vector.broadcast %cst_37 : f32 to vector<64x64xf32>
    %70 = arith.maximumf %68, %69 : vector<64x64xf32>
    %c0_38 = arith.constant 0 : index
    %c0_39 = arith.constant 0 : index
    %71 = vector.load %arg16[%c0_38, %c0_39] : memref<64x32xbf16, #tpu.memory_space<vmem>>, vector<64x32xbf16>
    %72 = arith.truncf %70 : vector<64x64xf32> to vector<64x64xbf16>
    %cst_40 = arith.constant dense<0.000000e+00> : vector<64x32xf32>
    %73 = tpu.matmul %72, %71, %cst_40 {dimension_numbers = #tpu.dot_dimension_numbers<[1], [0], [0], [1], [0, 0, 1, 1], [], []>} : vector<64x64xbf16>, vector<64x32xbf16>, vector<64x32xf32> -> vector<64x32xf32>
    %c0_41 = arith.constant 0 : index
    %c0_42 = arith.constant 0 : index
    %74 = vector.load %arg12[%c0_41, %c0_42] : memref<1x32xf32, #tpu.memory_space<vmem>>, vector<1x32xf32>
    %75 = vector.broadcast %74 : vector<1x32xf32> to vector<64x32xf32>
    %76 = arith.addf %73, %75 : vector<64x32xf32>
    %c0_43 = arith.constant 0 : index
    %c0_44 = arith.constant 0 : index
    %77 = vector.load %arg6[%c0_43, %c0_44] : memref<1x32xf32, #tpu.memory_space<vmem>>, vector<1x32xf32>
    %c0_45 = arith.constant 0 : index
    %c0_46 = arith.constant 0 : index
    %78 = vector.load %arg5[%c0_45, %c0_46] : memref<1x32xf32, #tpu.memory_space<vmem>>, vector<1x32xf32>
    %c0_47 = arith.constant 0 : index
    %c0_48 = arith.constant 0 : index
    %79 = vector.load %arg4[%c0_47, %c0_48] : memref<1x32xf32, #tpu.memory_space<vmem>>, vector<1x32xf32>
    %cst_49 = arith.constant dense<0.000000e+00> : vector<32xf32>
    %80 = vector.multi_reduction <add>, %76, %cst_49 [0] : vector<64x32xf32> to vector<32xf32>
    %81 = vector.shape_cast %80 : vector<32xf32> to vector<1x32xf32>
    %cst_50 = arith.constant 6.400000e+01 : f32
    %82 = vector.broadcast %cst_50 : f32 to vector<1x32xf32>
    %83 = arith.divf %81, %82 : vector<1x32xf32>
    %84 = arith.mulf %79, %83 : vector<1x32xf32>
    %85 = vector.broadcast %84 : vector<1x32xf32> to vector<64x32xf32>
    %86 = arith.subf %76, %85 : vector<64x32xf32>
    %87 = arith.mulf %86, %86 : vector<64x32xf32>
    %cst_51 = arith.constant dense<0.000000e+00> : vector<32xf32>
    %88 = vector.multi_reduction <add>, %87, %cst_51 [0] : vector<64x32xf32> to vector<32xf32>
    %89 = vector.shape_cast %88 : vector<32xf32> to vector<1x32xf32>
    %cst_52 = arith.constant 6.400000e+01 : f32
    %90 = vector.broadcast %cst_52 : f32 to vector<1x32xf32>
    %91 = arith.divf %89, %90 : vector<1x32xf32>
    %92 = vector.broadcast %77 : vector<1x32xf32> to vector<64x32xf32>
    %93 = arith.mulf %92, %86 : vector<64x32xf32>
    %cst_53 = arith.constant 9.99999974E-6 : f32
    %94 = vector.broadcast %cst_53 : f32 to vector<1x32xf32>
    %95 = arith.addf %91, %94 : vector<1x32xf32>
    %96 = math.rsqrt %95 : vector<1x32xf32>
    %97 = vector.broadcast %96 : vector<1x32xf32> to vector<64x32xf32>
    %98 = arith.mulf %93, %97 : vector<64x32xf32>
    %99 = vector.broadcast %78 : vector<1x32xf32> to vector<64x32xf32>
    %100 = arith.addf %98, %99 : vector<64x32xf32>
    %cst_54 = arith.constant 0.000000e+00 : f32
    %101 = vector.broadcast %cst_54 : f32 to vector<64x32xf32>
    %102 = arith.maximumf %100, %101 : vector<64x32xf32>
    %103 = arith.truncf %102 : vector<64x32xf32> to vector<64x32xbf16>
    %cst_55 = arith.constant dense<0.000000e+00> : vector<256x32xf32>
    %104 = tpu.matmul %0, %103, %cst_55 {dimension_numbers = #tpu.dot_dimension_numbers<[1], [0], [0], [1], [0, 0, 1, 1], [], []>} : vector<256x64xbf16>, vector<64x32xbf16>, vector<256x32xf32> -> vector<256x32xf32>
    %cst_56 = arith.constant 0.000000e+00 : f32
    %105 = vector.broadcast %cst_56 : f32 to vector<256x32xf32>
    %106 = arith.maximumf %104, %105 : vector<256x32xf32>
    %cst_57 = arith.constant 1.000000e-07 : f32
    %107 = vector.broadcast %cst_57 : f32 to vector<256x32xf32>
    %108 = arith.addf %106, %107 : vector<256x32xf32>
    %c0_58 = arith.constant 0 : index
    %c0_59 = arith.constant 0 : index
    %109 = memref.load %arg27[%c0_58, %c0_59] : memref<1x1xf32, #tpu.memory_space<smem>>
    %110 = vector.broadcast %109 : f32 to vector<256x32xf32>
    %111 = arith.mulf %108, %110 : vector<256x32xf32>
    %cst_60 = arith.constant dense<0xFF800000> : vector<32xf32>
    %112 = vector.multi_reduction <maximumf>, %111, %cst_60 [0] : vector<256x32xf32> to vector<32xf32>
    %113 = vector.shape_cast %112 : vector<32xf32> to vector<1x32xf32>
    %114 = vector.broadcast %113 : vector<1x32xf32> to vector<256x32xf32>
    %115 = arith.subf %111, %114 : vector<256x32xf32>
    %116 = math.exp %115 : vector<256x32xf32>
    %117 = arith.mulf %116, %108 : vector<256x32xf32>
    %118 = arith.truncf %117 : vector<256x32xf32> to vector<256x32xbf16>
    %cst_61 = arith.constant dense<0.000000e+00> : vector<64x32xf32>
    %119 = tpu.matmul %1, %118, %cst_61 {dimension_numbers = #tpu.dot_dimension_numbers<[1], [0], [0], [1], [0, 0, 1, 1], [], []>} : vector<64x256xbf16>, vector<256x32xbf16>, vector<64x32xf32> -> vector<64x32xf32>
    %120 = arith.truncf %116 : vector<256x32xf32> to vector<256x32xbf16>
    %cst_62 = arith.constant dense<0.000000e+00> : vector<64x32xf32>
    %121 = tpu.matmul %1, %120, %cst_62 {dimension_numbers = #tpu.dot_dimension_numbers<[1], [0], [0], [1], [0, 0, 1, 1], [], []>} : vector<64x256xbf16>, vector<256x32xbf16>, vector<64x32xf32> -> vector<64x32xf32>
    %cst_63 = arith.constant 1.000000e-16 : f32
    %122 = vector.broadcast %cst_63 : f32 to vector<64x32xf32>
    %123 = arith.addf %121, %122 : vector<64x32xf32>
    %124 = tpu.reciprocal %123 {approx = true} : vector<64x32xf32> -> vector<64x32xf32>
    %125 = arith.mulf %119, %124 : vector<64x32xf32>
    %126 = arith.addf %125, %102 : vector<64x32xf32>
    %c0_64 = arith.constant 0 : index
    %c0_65 = arith.constant 0 : index
    %127 = vector.load %arg25[%c0_64, %c0_65] : memref<32x64xbf16, #tpu.memory_space<vmem>>, vector<32x64xbf16>
    %128 = arith.truncf %126 : vector<64x32xf32> to vector<64x32xbf16>
    %cst_66 = arith.constant dense<0.000000e+00> : vector<64x64xf32>
    %129 = tpu.matmul %128, %127, %cst_66 {dimension_numbers = #tpu.dot_dimension_numbers<[1], [0], [0], [1], [0, 0, 1, 1], [], []>} : vector<64x32xbf16>, vector<32x64xbf16>, vector<64x64xf32> -> vector<64x64xf32>
    %c0_67 = arith.constant 0 : index
    %c0_68 = arith.constant 0 : index
    %130 = vector.load %arg21[%c0_67, %c0_68] : memref<1x64xf32, #tpu.memory_space<vmem>>, vector<1x64xf32>
    %131 = vector.broadcast %130 : vector<1x64xf32> to vector<64x64xf32>
    %132 = arith.addf %129, %131 : vector<64x64xf32>
    %c0_69 = arith.constant 0 : index
    %c0_70 = arith.constant 0 : index
    %133 = vector.load %arg24[%c0_69, %c0_70] : memref<1x64xf32, #tpu.memory_space<vmem>>, vector<1x64xf32>
    %c0_71 = arith.constant 0 : index
    %c0_72 = arith.constant 0 : index
    %134 = vector.load %arg23[%c0_71, %c0_72] : memref<1x64xf32, #tpu.memory_space<vmem>>, vector<1x64xf32>
    %cst_73 = arith.constant dense<0.000000e+00> : vector<64xf32>
    %135 = vector.multi_reduction <add>, %132, %cst_73 [1] : vector<64x64xf32> to vector<64xf32>
    %136 = vector.shape_cast %135 : vector<64xf32> to vector<64x1xf32>
    %cst_74 = arith.constant 6.400000e+01 : f32
    %137 = vector.broadcast %cst_74 : f32 to vector<64x1xf32>
    %138 = arith.divf %136, %137 : vector<64x1xf32>
    %139 = vector.broadcast %138 : vector<64x1xf32> to vector<64x64xf32>
    %140 = arith.subf %132, %139 : vector<64x64xf32>
    %141 = arith.mulf %140, %140 : vector<64x64xf32>
    %cst_75 = arith.constant dense<0.000000e+00> : vector<64xf32>
    %142 = vector.multi_reduction <add>, %141, %cst_75 [1] : vector<64x64xf32> to vector<64xf32>
    %143 = vector.shape_cast %142 : vector<64xf32> to vector<64x1xf32>
    %cst_76 = arith.constant 6.400000e+01 : f32
    %144 = vector.broadcast %cst_76 : f32 to vector<64x1xf32>
    %145 = arith.divf %143, %144 : vector<64x1xf32>
    %146 = vector.broadcast %138 : vector<64x1xf32> to vector<64x64xf32>
    %147 = arith.subf %132, %146 : vector<64x64xf32>
    %cst_77 = arith.constant 9.99999974E-6 : f32
    %148 = vector.broadcast %cst_77 : f32 to vector<64x1xf32>
    %149 = arith.addf %145, %148 : vector<64x1xf32>
    %150 = math.rsqrt %149 : vector<64x1xf32>
    %151 = vector.broadcast %150 : vector<64x1xf32> to vector<64x64xf32>
    %152 = arith.mulf %147, %151 : vector<64x64xf32>
    %153 = vector.broadcast %133 : vector<1x64xf32> to vector<64x64xf32>
    %154 = arith.mulf %152, %153 : vector<64x64xf32>
    %155 = vector.broadcast %134 : vector<1x64xf32> to vector<64x64xf32>
    %156 = arith.addf %154, %155 : vector<64x64xf32>
    %cst_78 = arith.constant 0.000000e+00 : f32
    %157 = vector.broadcast %cst_78 : f32 to vector<64x64xf32>
    %158 = arith.maximumf %156, %157 : vector<64x64xf32>
    %c0_79 = arith.constant 0 : index
    %c0_80 = arith.constant 0 : index
    %159 = vector.load %arg26[%c0_79, %c0_80] : memref<64x32xbf16, #tpu.memory_space<vmem>>, vector<64x32xbf16>
    %160 = arith.truncf %158 : vector<64x64xf32> to vector<64x64xbf16>
    %cst_81 = arith.constant dense<0.000000e+00> : vector<64x32xf32>
    %161 = tpu.matmul %160, %159, %cst_81 {dimension_numbers = #tpu.dot_dimension_numbers<[1], [0], [0], [1], [0, 0, 1, 1], [], []>} : vector<64x64xbf16>, vector<64x32xbf16>, vector<64x32xf32> -> vector<64x32xf32>
    %c0_82 = arith.constant 0 : index
    %c0_83 = arith.constant 0 : index
    %162 = vector.load %arg22[%c0_82, %c0_83] : memref<1x32xf32, #tpu.memory_space<vmem>>, vector<1x32xf32>
    %163 = vector.broadcast %162 : vector<1x32xf32> to vector<64x32xf32>
    %164 = arith.addf %161, %163 : vector<64x32xf32>
    %c0_84 = arith.constant 0 : index
    %c0_85 = arith.constant 0 : index
    %165 = vector.load %arg20[%c0_84, %c0_85] : memref<1x32xf32, #tpu.memory_space<vmem>>, vector<1x32xf32>
    %c0_86 = arith.constant 0 : index
    %c0_87 = arith.constant 0 : index
    %166 = vector.load %arg19[%c0_86, %c0_87] : memref<1x32xf32, #tpu.memory_space<vmem>>, vector<1x32xf32>
    %c0_88 = arith.constant 0 : index
    %c0_89 = arith.constant 0 : index
    %167 = vector.load %arg18[%c0_88, %c0_89] : memref<1x32xf32, #tpu.memory_space<vmem>>, vector<1x32xf32>
    %cst_90 = arith.constant dense<0.000000e+00> : vector<32xf32>
    %168 = vector.multi_reduction <add>, %164, %cst_90 [0] : vector<64x32xf32> to vector<32xf32>
    %169 = vector.shape_cast %168 : vector<32xf32> to vector<1x32xf32>
    %cst_91 = arith.constant 6.400000e+01 : f32
    %170 = vector.broadcast %cst_91 : f32 to vector<1x32xf32>
    %171 = arith.divf %169, %170 : vector<1x32xf32>
    %172 = arith.mulf %167, %171 : vector<1x32xf32>
    %173 = vector.broadcast %172 : vector<1x32xf32> to vector<64x32xf32>
    %174 = arith.subf %164, %173 : vector<64x32xf32>
    %175 = arith.mulf %174, %174 : vector<64x32xf32>
    %cst_92 = arith.constant dense<0.000000e+00> : vector<32xf32>
    %176 = vector.multi_reduction <add>, %175, %cst_92 [0] : vector<64x32xf32> to vector<32xf32>
    %177 = vector.shape_cast %176 : vector<32xf32> to vector<1x32xf32>
    %cst_93 = arith.constant 6.400000e+01 : f32
    %178 = vector.broadcast %cst_93 : f32 to vector<1x32xf32>
    %179 = arith.divf %177, %178 : vector<1x32xf32>
    %180 = vector.broadcast %165 : vector<1x32xf32> to vector<64x32xf32>
    %181 = arith.mulf %180, %174 : vector<64x32xf32>
    %cst_94 = arith.constant 9.99999974E-6 : f32
    %182 = vector.broadcast %cst_94 : f32 to vector<1x32xf32>
    %183 = arith.addf %179, %182 : vector<1x32xf32>
    %184 = math.rsqrt %183 : vector<1x32xf32>
    %185 = vector.broadcast %184 : vector<1x32xf32> to vector<64x32xf32>
    %186 = arith.mulf %181, %185 : vector<64x32xf32>
    %187 = vector.broadcast %166 : vector<1x32xf32> to vector<64x32xf32>
    %188 = arith.addf %186, %187 : vector<64x32xf32>
    %cst_95 = arith.constant 0.000000e+00 : f32
    %189 = vector.broadcast %cst_95 : f32 to vector<64x32xf32>
    %190 = arith.maximumf %188, %189 : vector<64x32xf32>
    %191 = arith.truncf %190 : vector<64x32xf32> to vector<64x32xbf16>
    %cst_96 = arith.constant dense<0.000000e+00> : vector<256x32xf32>
    %192 = tpu.matmul %0, %191, %cst_96 {dimension_numbers = #tpu.dot_dimension_numbers<[1], [0], [0], [1], [0, 0, 1, 1], [], []>} : vector<256x64xbf16>, vector<64x32xbf16>, vector<256x32xf32> -> vector<256x32xf32>
    %cst_97 = arith.constant 0.000000e+00 : f32
    %193 = vector.broadcast %cst_97 : f32 to vector<256x32xf32>
    %194 = arith.maximumf %192, %193 : vector<256x32xf32>
    %cst_98 = arith.constant 1.000000e-07 : f32
    %195 = vector.broadcast %cst_98 : f32 to vector<256x32xf32>
    %196 = arith.addf %194, %195 : vector<256x32xf32>
    %c0_99 = arith.constant 0 : index
    %c0_100 = arith.constant 0 : index
    %197 = memref.load %arg37[%c0_99, %c0_100] : memref<1x1xf32, #tpu.memory_space<smem>>
    %198 = vector.broadcast %197 : f32 to vector<256x32xf32>
    %199 = arith.mulf %196, %198 : vector<256x32xf32>
    %cst_101 = arith.constant dense<0xFF800000> : vector<32xf32>
    %200 = vector.multi_reduction <maximumf>, %199, %cst_101 [0] : vector<256x32xf32> to vector<32xf32>
    %201 = vector.shape_cast %200 : vector<32xf32> to vector<1x32xf32>
    %202 = vector.broadcast %201 : vector<1x32xf32> to vector<256x32xf32>
    %203 = arith.subf %199, %202 : vector<256x32xf32>
    %204 = math.exp %203 : vector<256x32xf32>
    %205 = arith.mulf %204, %196 : vector<256x32xf32>
    %206 = arith.truncf %205 : vector<256x32xf32> to vector<256x32xbf16>
    %cst_102 = arith.constant dense<0.000000e+00> : vector<64x32xf32>
    %207 = tpu.matmul %1, %206, %cst_102 {dimension_numbers = #tpu.dot_dimension_numbers<[1], [0], [0], [1], [0, 0, 1, 1], [], []>} : vector<64x256xbf16>, vector<256x32xbf16>, vector<64x32xf32> -> vector<64x32xf32>
    %208 = arith.truncf %204 : vector<256x32xf32> to vector<256x32xbf16>
    %cst_103 = arith.constant dense<0.000000e+00> : vector<64x32xf32>
    %209 = tpu.matmul %1, %208, %cst_103 {dimension_numbers = #tpu.dot_dimension_numbers<[1], [0], [0], [1], [0, 0, 1, 1], [], []>} : vector<64x256xbf16>, vector<256x32xbf16>, vector<64x32xf32> -> vector<64x32xf32>
    %cst_104 = arith.constant 1.000000e-16 : f32
    %210 = vector.broadcast %cst_104 : f32 to vector<64x32xf32>
    %211 = arith.addf %209, %210 : vector<64x32xf32>
    %212 = tpu.reciprocal %211 {approx = true} : vector<64x32xf32> -> vector<64x32xf32>
    %213 = arith.mulf %207, %212 : vector<64x32xf32>
    %214 = arith.addf %213, %190 : vector<64x32xf32>
    %c0_105 = arith.constant 0 : index
    %c0_106 = arith.constant 0 : index
    %215 = vector.load %arg35[%c0_105, %c0_106] : memref<32x64xbf16, #tpu.memory_space<vmem>>, vector<32x64xbf16>
    %216 = arith.truncf %214 : vector<64x32xf32> to vector<64x32xbf16>
    %cst_107 = arith.constant dense<0.000000e+00> : vector<64x64xf32>
    %217 = tpu.matmul %216, %215, %cst_107 {dimension_numbers = #tpu.dot_dimension_numbers<[1], [0], [0], [1], [0, 0, 1, 1], [], []>} : vector<64x32xbf16>, vector<32x64xbf16>, vector<64x64xf32> -> vector<64x64xf32>
    %c0_108 = arith.constant 0 : index
    %c0_109 = arith.constant 0 : index
    %218 = vector.load %arg31[%c0_108, %c0_109] : memref<1x64xf32, #tpu.memory_space<vmem>>, vector<1x64xf32>
    %219 = vector.broadcast %218 : vector<1x64xf32> to vector<64x64xf32>
    %220 = arith.addf %217, %219 : vector<64x64xf32>
    %c0_110 = arith.constant 0 : index
    %c0_111 = arith.constant 0 : index
    %221 = vector.load %arg34[%c0_110, %c0_111] : memref<1x64xf32, #tpu.memory_space<vmem>>, vector<1x64xf32>
    %c0_112 = arith.constant 0 : index
    %c0_113 = arith.constant 0 : index
    %222 = vector.load %arg33[%c0_112, %c0_113] : memref<1x64xf32, #tpu.memory_space<vmem>>, vector<1x64xf32>
    %cst_114 = arith.constant dense<0.000000e+00> : vector<64xf32>
    %223 = vector.multi_reduction <add>, %220, %cst_114 [1] : vector<64x64xf32> to vector<64xf32>
    %224 = vector.shape_cast %223 : vector<64xf32> to vector<64x1xf32>
    %cst_115 = arith.constant 6.400000e+01 : f32
    %225 = vector.broadcast %cst_115 : f32 to vector<64x1xf32>
    %226 = arith.divf %224, %225 : vector<64x1xf32>
    %227 = vector.broadcast %226 : vector<64x1xf32> to vector<64x64xf32>
    %228 = arith.subf %220, %227 : vector<64x64xf32>
    %229 = arith.mulf %228, %228 : vector<64x64xf32>
    %cst_116 = arith.constant dense<0.000000e+00> : vector<64xf32>
    %230 = vector.multi_reduction <add>, %229, %cst_116 [1] : vector<64x64xf32> to vector<64xf32>
    %231 = vector.shape_cast %230 : vector<64xf32> to vector<64x1xf32>
    %cst_117 = arith.constant 6.400000e+01 : f32
    %232 = vector.broadcast %cst_117 : f32 to vector<64x1xf32>
    %233 = arith.divf %231, %232 : vector<64x1xf32>
    %234 = vector.broadcast %226 : vector<64x1xf32> to vector<64x64xf32>
    %235 = arith.subf %220, %234 : vector<64x64xf32>
    %cst_118 = arith.constant 9.99999974E-6 : f32
    %236 = vector.broadcast %cst_118 : f32 to vector<64x1xf32>
    %237 = arith.addf %233, %236 : vector<64x1xf32>
    %238 = math.rsqrt %237 : vector<64x1xf32>
    %239 = vector.broadcast %238 : vector<64x1xf32> to vector<64x64xf32>
    %240 = arith.mulf %235, %239 : vector<64x64xf32>
    %241 = vector.broadcast %221 : vector<1x64xf32> to vector<64x64xf32>
    %242 = arith.mulf %240, %241 : vector<64x64xf32>
    %243 = vector.broadcast %222 : vector<1x64xf32> to vector<64x64xf32>
    %244 = arith.addf %242, %243 : vector<64x64xf32>
    %cst_119 = arith.constant 0.000000e+00 : f32
    %245 = vector.broadcast %cst_119 : f32 to vector<64x64xf32>
    %246 = arith.maximumf %244, %245 : vector<64x64xf32>
    %c0_120 = arith.constant 0 : index
    %c0_121 = arith.constant 0 : index
    %247 = vector.load %arg36[%c0_120, %c0_121] : memref<64x32xbf16, #tpu.memory_space<vmem>>, vector<64x32xbf16>
    %248 = arith.truncf %246 : vector<64x64xf32> to vector<64x64xbf16>
    %cst_122 = arith.constant dense<0.000000e+00> : vector<64x32xf32>
    %249 = tpu.matmul %248, %247, %cst_122 {dimension_numbers = #tpu.dot_dimension_numbers<[1], [0], [0], [1], [0, 0, 1, 1], [], []>} : vector<64x64xbf16>, vector<64x32xbf16>, vector<64x32xf32> -> vector<64x32xf32>
    %c0_123 = arith.constant 0 : index
    %c0_124 = arith.constant 0 : index
    %250 = vector.load %arg32[%c0_123, %c0_124] : memref<1x32xf32, #tpu.memory_space<vmem>>, vector<1x32xf32>
    %251 = vector.broadcast %250 : vector<1x32xf32> to vector<64x32xf32>
    %252 = arith.addf %249, %251 : vector<64x32xf32>
    %c0_125 = arith.constant 0 : index
    %c0_126 = arith.constant 0 : index
    %253 = vector.load %arg30[%c0_125, %c0_126] : memref<1x32xf32, #tpu.memory_space<vmem>>, vector<1x32xf32>
    %c0_127 = arith.constant 0 : index
    %c0_128 = arith.constant 0 : index
    %254 = vector.load %arg29[%c0_127, %c0_128] : memref<1x32xf32, #tpu.memory_space<vmem>>, vector<1x32xf32>
    %c0_129 = arith.constant 0 : index
    %c0_130 = arith.constant 0 : index
    %255 = vector.load %arg28[%c0_129, %c0_130] : memref<1x32xf32, #tpu.memory_space<vmem>>, vector<1x32xf32>
    %cst_131 = arith.constant dense<0.000000e+00> : vector<32xf32>
    %256 = vector.multi_reduction <add>, %252, %cst_131 [0] : vector<64x32xf32> to vector<32xf32>
    %257 = vector.shape_cast %256 : vector<32xf32> to vector<1x32xf32>
    %cst_132 = arith.constant 6.400000e+01 : f32
    %258 = vector.broadcast %cst_132 : f32 to vector<1x32xf32>
    %259 = arith.divf %257, %258 : vector<1x32xf32>
    %260 = arith.mulf %255, %259 : vector<1x32xf32>
    %261 = vector.broadcast %260 : vector<1x32xf32> to vector<64x32xf32>
    %262 = arith.subf %252, %261 : vector<64x32xf32>
    %263 = arith.mulf %262, %262 : vector<64x32xf32>
    %cst_133 = arith.constant dense<0.000000e+00> : vector<32xf32>
    %264 = vector.multi_reduction <add>, %263, %cst_133 [0] : vector<64x32xf32> to vector<32xf32>
    %265 = vector.shape_cast %264 : vector<32xf32> to vector<1x32xf32>
    %cst_134 = arith.constant 6.400000e+01 : f32
    %266 = vector.broadcast %cst_134 : f32 to vector<1x32xf32>
    %267 = arith.divf %265, %266 : vector<1x32xf32>
    %268 = vector.broadcast %253 : vector<1x32xf32> to vector<64x32xf32>
    %269 = arith.mulf %268, %262 : vector<64x32xf32>
    %cst_135 = arith.constant 9.99999974E-6 : f32
    %270 = vector.broadcast %cst_135 : f32 to vector<1x32xf32>
    %271 = arith.addf %267, %270 : vector<1x32xf32>
    %272 = math.rsqrt %271 : vector<1x32xf32>
    %273 = vector.broadcast %272 : vector<1x32xf32> to vector<64x32xf32>
    %274 = arith.mulf %269, %273 : vector<64x32xf32>
    %275 = vector.broadcast %254 : vector<1x32xf32> to vector<64x32xf32>
    %276 = arith.addf %274, %275 : vector<64x32xf32>
    %cst_136 = arith.constant 0.000000e+00 : f32
    %277 = vector.broadcast %cst_136 : f32 to vector<64x32xf32>
    %278 = arith.maximumf %276, %277 : vector<64x32xf32>
    %c0_137 = arith.constant 0 : index
    %c0_138 = arith.constant 0 : index
    %279 = vector.load %arg42[%c0_137, %c0_138] : memref<32x32xbf16, #tpu.memory_space<vmem>>, vector<32x32xbf16>
    %280 = arith.truncf %278 : vector<64x32xf32> to vector<64x32xbf16>
    %cst_139 = arith.constant dense<0.000000e+00> : vector<64x32xf32>
    %281 = tpu.matmul %280, %279, %cst_139 {dimension_numbers = #tpu.dot_dimension_numbers<[1], [0], [0], [1], [0, 0, 1, 1], [], []>} : vector<64x32xbf16>, vector<32x32xbf16>, vector<64x32xf32> -> vector<64x32xf32>
    %c0_140 = arith.constant 0 : index
    %c0_141 = arith.constant 0 : index
    %282 = vector.load %arg39[%c0_140, %c0_141] : memref<1x32xf32, #tpu.memory_space<vmem>>, vector<1x32xf32>
    %283 = vector.broadcast %282 : vector<1x32xf32> to vector<64x32xf32>
    %284 = arith.addf %281, %283 : vector<64x32xf32>
    %c0_142 = arith.constant 0 : index
    %c0_143 = arith.constant 0 : index
    %285 = vector.load %arg41[%c0_142, %c0_143] : memref<1x32xf32, #tpu.memory_space<vmem>>, vector<1x32xf32>
    %c0_144 = arith.constant 0 : index
    %c0_145 = arith.constant 0 : index
    %286 = vector.load %arg40[%c0_144, %c0_145] : memref<1x32xf32, #tpu.memory_space<vmem>>, vector<1x32xf32>
    %cst_146 = arith.constant dense<0.000000e+00> : vector<64xf32>
    %287 = vector.multi_reduction <add>, %284, %cst_146 [1] : vector<64x32xf32> to vector<64xf32>
    %288 = vector.shape_cast %287 : vector<64xf32> to vector<64x1xf32>
    %cst_147 = arith.constant 3.200000e+01 : f32
    %289 = vector.broadcast %cst_147 : f32 to vector<64x1xf32>
    %290 = arith.divf %288, %289 : vector<64x1xf32>
    %291 = vector.broadcast %290 : vector<64x1xf32> to vector<64x32xf32>
    %292 = arith.subf %284, %291 : vector<64x32xf32>
    %293 = arith.mulf %292, %292 : vector<64x32xf32>
    %cst_148 = arith.constant dense<0.000000e+00> : vector<64xf32>
    %294 = vector.multi_reduction <add>, %293, %cst_148 [1] : vector<64x32xf32> to vector<64xf32>
    %295 = vector.shape_cast %294 : vector<64xf32> to vector<64x1xf32>
    %cst_149 = arith.constant 3.200000e+01 : f32
    %296 = vector.broadcast %cst_149 : f32 to vector<64x1xf32>
    %297 = arith.divf %295, %296 : vector<64x1xf32>
    %298 = vector.broadcast %290 : vector<64x1xf32> to vector<64x32xf32>
    %299 = arith.subf %284, %298 : vector<64x32xf32>
    %cst_150 = arith.constant 9.99999974E-6 : f32
    %300 = vector.broadcast %cst_150 : f32 to vector<64x1xf32>
    %301 = arith.addf %297, %300 : vector<64x1xf32>
    %302 = math.rsqrt %301 : vector<64x1xf32>
    %303 = vector.broadcast %302 : vector<64x1xf32> to vector<64x32xf32>
    %304 = arith.mulf %299, %303 : vector<64x32xf32>
    %305 = vector.broadcast %285 : vector<1x32xf32> to vector<64x32xf32>
    %306 = arith.mulf %304, %305 : vector<64x32xf32>
    %307 = vector.broadcast %286 : vector<1x32xf32> to vector<64x32xf32>
    %308 = arith.addf %306, %307 : vector<64x32xf32>
    %cst_151 = arith.constant 0.000000e+00 : f32
    %309 = vector.broadcast %cst_151 : f32 to vector<64x32xf32>
    %310 = arith.maximumf %308, %309 : vector<64x32xf32>
    %c0_152 = arith.constant 0 : index
    %c0_153 = arith.constant 0 : index
    %311 = vector.load %arg46[%c0_152, %c0_153] : memref<32x32xbf16, #tpu.memory_space<vmem>>, vector<32x32xbf16>
    %312 = arith.truncf %310 : vector<64x32xf32> to vector<64x32xbf16>
    %cst_154 = arith.constant dense<0.000000e+00> : vector<64x32xf32>
    %313 = tpu.matmul %312, %311, %cst_154 {dimension_numbers = #tpu.dot_dimension_numbers<[1], [0], [0], [1], [0, 0, 1, 1], [], []>} : vector<64x32xbf16>, vector<32x32xbf16>, vector<64x32xf32> -> vector<64x32xf32>
    %c0_155 = arith.constant 0 : index
    %c0_156 = arith.constant 0 : index
    %314 = vector.load %arg43[%c0_155, %c0_156] : memref<1x32xf32, #tpu.memory_space<vmem>>, vector<1x32xf32>
    %315 = vector.broadcast %314 : vector<1x32xf32> to vector<64x32xf32>
    %316 = arith.addf %313, %315 : vector<64x32xf32>
    %c0_157 = arith.constant 0 : index
    %c0_158 = arith.constant 0 : index
    %317 = vector.load %arg45[%c0_157, %c0_158] : memref<1x32xf32, #tpu.memory_space<vmem>>, vector<1x32xf32>
    %c0_159 = arith.constant 0 : index
    %c0_160 = arith.constant 0 : index
    %318 = vector.load %arg44[%c0_159, %c0_160] : memref<1x32xf32, #tpu.memory_space<vmem>>, vector<1x32xf32>
    %cst_161 = arith.constant dense<0.000000e+00> : vector<64xf32>
    %319 = vector.multi_reduction <add>, %316, %cst_161 [1] : vector<64x32xf32> to vector<64xf32>
    %320 = vector.shape_cast %319 : vector<64xf32> to vector<64x1xf32>
    %cst_162 = arith.constant 3.200000e+01 : f32
    %321 = vector.broadcast %cst_162 : f32 to vector<64x1xf32>
    %322 = arith.divf %320, %321 : vector<64x1xf32>
    %323 = vector.broadcast %322 : vector<64x1xf32> to vector<64x32xf32>
    %324 = arith.subf %316, %323 : vector<64x32xf32>
    %325 = arith.mulf %324, %324 : vector<64x32xf32>
    %cst_163 = arith.constant dense<0.000000e+00> : vector<64xf32>
    %326 = vector.multi_reduction <add>, %325, %cst_163 [1] : vector<64x32xf32> to vector<64xf32>
    %327 = vector.shape_cast %326 : vector<64xf32> to vector<64x1xf32>
    %cst_164 = arith.constant 3.200000e+01 : f32
    %328 = vector.broadcast %cst_164 : f32 to vector<64x1xf32>
    %329 = arith.divf %327, %328 : vector<64x1xf32>
    %330 = vector.broadcast %322 : vector<64x1xf32> to vector<64x32xf32>
    %331 = arith.subf %316, %330 : vector<64x32xf32>
    %cst_165 = arith.constant 9.99999974E-6 : f32
    %332 = vector.broadcast %cst_165 : f32 to vector<64x1xf32>
    %333 = arith.addf %329, %332 : vector<64x1xf32>
    %334 = math.rsqrt %333 : vector<64x1xf32>
    %335 = vector.broadcast %334 : vector<64x1xf32> to vector<64x32xf32>
    %336 = arith.mulf %331, %335 : vector<64x32xf32>
    %337 = vector.broadcast %317 : vector<1x32xf32> to vector<64x32xf32>
    %338 = arith.mulf %336, %337 : vector<64x32xf32>
    %339 = vector.broadcast %318 : vector<1x32xf32> to vector<64x32xf32>
    %340 = arith.addf %338, %339 : vector<64x32xf32>
    %cst_166 = arith.constant 0.000000e+00 : f32
    %341 = vector.broadcast %cst_166 : f32 to vector<64x32xf32>
    %342 = arith.maximumf %340, %341 : vector<64x32xf32>
    %c0_167 = arith.constant 0 : index
    %c0_168 = arith.constant 0 : index
    %343 = vector.load %arg47[%c0_167, %c0_168] : memref<32x2xbf16, #tpu.memory_space<vmem>>, vector<32x2xbf16>
    %344 = arith.truncf %342 : vector<64x32xf32> to vector<64x32xbf16>
    %cst_169 = arith.constant dense<0.000000e+00> : vector<64x2xf32>
    %345 = tpu.matmul %344, %343, %cst_169 {dimension_numbers = #tpu.dot_dimension_numbers<[1], [0], [0], [1], [0, 0, 1, 1], [], []>} : vector<64x32xbf16>, vector<32x2xbf16>, vector<64x2xf32> -> vector<64x2xf32>
    %c0_170 = arith.constant 0 : index
    %c0_171 = arith.constant 0 : index
    %346 = vector.load %arg38[%c0_170, %c0_171] : memref<1x2xf32, #tpu.memory_space<vmem>>, vector<1x2xf32>
    %347 = vector.broadcast %346 : vector<1x2xf32> to vector<64x2xf32>
    %348 = arith.addf %345, %347 : vector<64x2xf32>
    %c0_172 = arith.constant 0 : index
    %c0_173 = arith.constant 0 : index
    %349 = vector.load %arg3[%c0_172, %c0_173] : memref<64x1xf32, #tpu.memory_space<vmem>>, vector<64x1xf32>
    %350 = vector.broadcast %349 : vector<64x1xf32> to vector<64x2xf32>
    %351 = arith.mulf %348, %350 : vector<64x2xf32>
    %c0_174 = arith.constant 0 : index
    %c0_175 = arith.constant 0 : index
    %352 = vector.load %arg48[%c0_174, %c0_175] : memref<64x2xf32, #tpu.memory_space<vmem>>, vector<64x2xf32>
    tpu.vector_store %arg48[%c0_174, %c0_175], %351 {strides = array<i32>} : memref<64x2xf32, #tpu.memory_space<vmem>>, vector<64x2xf32>,
    return
  }
}

</mosaic_0001>

<bundles_post_ra>
// kernel: modular_gnn_forward.1
= control target key start
LH: loop header
LB: loop body
LE: loop exit
PB: predicated region body
PF: predicated region fallthrough
CT: control target
= control target key end

     0   :  { %s5975_s3 = smov 10   ;;  %vm269_vm0 = vcmask 130048   ;;  %s5976_s10 = smov 1   ;;  %vm511_vm1 = vcmask 523264   ;;  %vm819_vm2 = vcmask 261120   ;;  %vm4635_vm3 = vcmask 15360   ;;  %s8561_s0 = inlined_call_operand.smem [shape: u32[49], index: -1, kind: input, shape index: {}] }
   0x1   :  { %s4657_s6 = sld [smem:[%s8561_s0 + %s5975_s3]]   ;;  %s5977_s14 = smov 9  }
   0x2   :  { %s1_s9 = sld [smem:[%s8561_s0]]   ;;  %s5978_s18 = smov 8  }
   0x3   :  { %s6052_s13 = sld [smem:[%s8561_s0 + %s5976_s10]]   ;;  %s5979_s22 = smov 17  }
   0x4   :  { %s4656_s17 = sld [smem:[%s8561_s0 + %s5977_s14]]   ;;  %s5980_s26 = smov 2  }
   0x5   :  { %s4655_s21 = sld [smem:[%s8561_s0 + %s5978_s18]]   ;;  %s5981_s30 = smov 15  }
   0x6   :  { %s4664_s25 = sld [smem:[%s8561_s0 + %s5979_s22]]   ;;  %s5982_s4 = smov 7  }
   0x7   :  { %v5546_v0 = vld [vmem:[%s4657_s6] sm:$0xff]   ;;  %s6210_s29 = sld [smem:[%s8561_s0 + %s5980_s26]]   ;;  %s5983_s8 = smov 11  }
   0x8   :  { %v242_v1 = vld [vmem:[%s1_s9] sm:$0xff]  ;;  %v243_v2 = vld [vmem:[%s1_s9 + $0x8] sm:$0xff]  ;;  %v244_v3 = vld [vmem:[%s1_s9 + $0x10] sm:$0xff]  ;;  %5235 = vmatprep.subr.bf16.mxu0 %v5546_v0  ;;  %s4662_s3 = sld [smem:[%s8561_s0 + %s5981_s30]]   ;;  %s5984_s12 = smov 16  }
   0x9   :  { %v252_v4 = vpack.c.bf16 %v243_v2, %v242_v1  ;;  %v245_v5 = vld [vmem:[%s1_s9 + $0x18] sm:$0xff]  ;;  %v246_v6 = vld [vmem:[%s1_s9 + $0x20] sm:$0xff]  ;;  %v247_v7 = vld [vmem:[%s1_s9 + $0x28] sm:$0xff]  ;;  %5236 = vmatpush3.bf16.msra.mxu0 %v5546_v0  ;;  %s4654_s7 = sld [smem:[%s8561_s0 + %s5982_s4]]   ;;  %s5988_s30 = smov 4  }
   0xa   :  { %v6035_v8 = vpack.c.bf16 %v245_v5, %v244_v3  ;;  %v6037_v9 = vpack.c.bf16 %v247_v7, %v246_v6  ;;  %v248_v10 = vld [vmem:[%s1_s9 + $0x30] sm:$0xff]  ;;  %v249_v11 = vld [vmem:[%s1_s9 + $0x38] sm:$0xff]  ;;  %v5547_v13 = vld [vmem:[%s6052_s13] sm:$0xff]   ;;  %s4658_s11 = sld [smem:[%s8561_s0 + %s5983_s8]]   ;;  %s5989_s4 = smov 6  }
   0xb   :  { %5237 = vmatprep.mubr.msk.bf16.mxu0 %vm269_vm0, %v252_v4  ;;  %5247 = vmatprep.mubr.msk.bf16.mxu1 %vm269_vm0, %v252_v4  ;;  %v6045_v12 = vpack.c.bf16 %v249_v11, %v248_v10  ;;  %v4696_v15 = vld [vmem:[%s4656_s17] ss:$0 sm:$0xff]  ;;  %v5548_v35 = vld [vmem:[%s6052_s13 + $0x8] sm:$0xff]   ;;  %v5549_v36 = vld [vmem:[%s6052_s13 + $0x10] sm:$0xff]   ;;  %s4663_s16 = sld [smem:[%s8561_s0 + %s5984_s12]]   ;;  %s5985_s17 = smov 14  }
   0xc   :  { %5238 = vmatmul.mubr.msk.bf16.vlgmr.msra.gmra.mrb[0].mxu0 %vm269_vm0, %v6035_v8  ;;  %v5550_v37 = vld [vmem:[%s6052_s13 + $0x18] sm:$0xff]   ;;  %v5551_v38 = vld [vmem:[%s6052_s13 + $0x20] sm:$0xff]   ;;  %v5552_v39 = vld [vmem:[%s6052_s13 + $0x28] sm:$0xff]   ;;  %v6103_v60 = vstv %s4664_s25  ;;  %s4661_s20 = sld [smem:[%s8561_s0 + %s5985_s17]]   ;;  %s5987_s25 = smov 12  }
   0xd   :  { %5241 = vmatprep.mubr.msk.bf16.mxu0 %vm269_vm0, %v6037_v9  ;;  %v5553_v40 = vld [vmem:[%s6052_s13 + $0x30] sm:$0xff]   ;;  %v5554_v41 = vld [vmem:[%s6052_s13 + $0x38] sm:$0xff]   ;;  %v5555_v42 = vld [vmem:[%s6052_s13 + $0x40] sm:$0xff]   ;;  %s4659_s28 = sld [smem:[%s8561_s0 + %s5987_s25]]   ;;  %s5990_s8 = smov 5  }
   0xe   :  { %v5556_v43 = vld [vmem:[%s6052_s13 + $0x48] sm:$0xff]   ;;  %v5557_v44 = vld [vmem:[%s6052_s13 + $0x50] sm:$0xff]   ;;  %v5558_v45 = vld [vmem:[%s6052_s13 + $0x58] sm:$0xff]   ;;  %s5991_s12 = smov 27   ;;  %s5992_s17 = smov 25  }
   0xf   :  { %v5559_v46 = vld [vmem:[%s6052_s13 + $0x60] sm:$0xff]   ;;  %v5560_v47 = vld [vmem:[%s6052_s13 + $0x68] sm:$0xff]   ;;  %v5561_v48 = vld [vmem:[%s6052_s13 + $0x70] sm:$0xff]   ;;  %s5994_s25 = smov 26   ;;  %s6004_s6 = smov 36  }
  0x10   :  { %v5562_v49 = vld [vmem:[%s6052_s13 + $0x78] sm:$0xff]   ;;  %v5563_v50 = vld [vmem:[%s4655_s21] sm:$0xff]   ;;  %s5986_s21 = smov 13   ;;  %s4683_s9 = sld [smem:[%s8561_s0 + %s6004_s6]]  }
  0x11   :  { %5245 = vmatprep.subr.bf16.mxu1 %v5563_v50  ;;  %s4660_s24 = sld [smem:[%s8561_s0 + %s5986_s21]]   ;;  %s5993_s21 = smov 21  }
  0x12   :  { %5246 = vmatpush3.bf16.msra.mxu1 %v5563_v50  ;;  %s6005_s10 = smov 34   ;;  %s6006_s15 = smov 33  }
  0x13   :  { %s4681_s14 = sld [smem:[%s8561_s0 + %s6005_s10]]   ;;  %s6007_s19 = smov 42  }
  0x14   :  { %5242 = vmatmul.mubr.msk.bf16.gmra.mrb[4].mxu0 %vm269_vm0, %v6045_v12  ;;  %s4680_s18 = sld [smem:[%s8561_s0 + %s6006_s15]]   ;;  %s6008_s23 = smov 32  }
  0x15   :  { %5263 = vmatprep.mubr.msk.bf16.mxu0 %vm511_vm1, %v5547_v13  ;;  %5248 = vmatmul.mubr.msk.bf16.vlgmr.msra.gmra.mrb[0].mxu1 %vm269_vm0, %v6035_v8  ;;  %s4689_s22 = sld [smem:[%s8561_s0 + %s6007_s19]]   ;;  %s6009_s27 = smov 28  }
  0x16   :  { %5251 = vmatprep.mubr.msk.bf16.mxu1 %vm269_vm0, %v6037_v9  ;;  %s4679_s26 = sld [smem:[%s8561_s0 + %s6008_s23]]   ;;  %s6010_s1 = smov 30  }
  0x17   :  { %s6020_s6 = smov 45   ;;  %s6021_s10 = smov 44  }
  0x18   :  { %s6022_s15 = smov 38   ;;  %s6023_s19 = smov 48  }
  0x1d   :  { %5252 = vmatmul.mubr.msk.bf16.gmra.mrb[4].mxu1 %vm269_vm0, %v6045_v12 }
  0xdf   :  { %v5239_v14 = vpop.f32.mrb[0].mxu0 }
  0xe0   :  { %v316_v16 = vpop.f32.mrb[1].mxu0  ;;  %v325_v18 = vadd.f32 %v5239_v14, %v4696_v15 }
  0xe1   :  { %v5240_v17 = vpop.f32.mrb[2].mxu0  ;;  %v317_v21 = vadd.f32 %v4696_v15, %v316_v16 }
  0xe2   :  { %v328_v19 = vadd.f32 %v5240_v17, %v4696_v15  ;;  %v319_v20 = vpop.f32.mrb[3].mxu0 }
  0xe3   :  { %v320_v22 = vadd.f32 %v4696_v15, %v319_v20 }
  0xe4   :  { %v428_v23 = vpack.c.bf16 %v328_v19, %v325_v18 }
  0xe5   :  { %v427_v24 = vpack.c.bf16 %v320_v22, %v317_v21 }
  0xe7   :  { %v5243_v25 = vpop.f32.mrb[4].mxu0  ;;  %5255 = vmatprep.subr.bf16.mxu0 %v427_v24 }
  0xe8   :  { %v332_v26 = vpop.f32.mrb[5].mxu0  ;;  %5256 = vmatpush3.bf16.msra.mxu0 %v427_v24  ;;  %v341_v28 = vadd.f32 %v5243_v25, %v4696_v15 }
  0xe9   :  { %v5244_v27 = vpop.f32.mrb[6].mxu0  ;;  %5257 = vmatprep.subr.bf16.mxu0 %v428_v23  ;;  %v333_v31 = vadd.f32 %v4696_v15, %v332_v26 }
  0xea   :  { %v344_v29 = vadd.f32 %v5244_v27, %v4696_v15  ;;  %v335_v30 = vpop.f32.mrb[7].mxu0 }
  0xeb   :  { %v336_v32 = vadd.f32 %v4696_v15, %v335_v30 }
  0xec   :  { %v430_v33 = vpack.c.bf16 %v344_v29, %v341_v28  ;;  %5258 = vmatpush3.bf16.msra.mxu0 %v428_v23 }
  0xed   :  { %v429_v34 = vpack.c.bf16 %v336_v32, %v333_v31 }
  0xef   :  { %5259 = vmatprep.subr.bf16.mxu0 %v429_v34 }
  0xf0   :  { %5260 = vmatpush3.bf16.msra.mxu0 %v429_v34 }
  0xf1   :  { %5261 = vmatprep.subr.bf16.mxu0 %v430_v33 }
  0xf4   :  { %5262 = vmatpush3.bf16.msra.mxu0 %v430_v33 }
  0xf7   :  { %5264 = vmatmul.mubr.msk.bf16.vlgmr.msra.gmra.mrb[8].mxu0 %vm511_vm1, %v5548_v35 }
  0xf8   :  { %5267 = vmatprep.mubr.msk.bf16.mxu0 %vm511_vm1, %v5549_v36 }
  0xff   :  { %5268 = vmatmul.mubr.msk.bf16.gmra.mrb[12].mxu0 %vm511_vm1, %v5550_v37 }
 0x100   :  { %5271 = vmatprep.mubr.msk.bf16.mxu0 %vm511_vm1, %v5551_v38 }
 0x107   :  { %5272 = vmatmul.mubr.msk.bf16.gmra.mrb[16].mxu0 %vm511_vm1, %v5552_v39 }
 0x108   :  { %5275 = vmatprep.mubr.msk.bf16.mxu0 %vm511_vm1, %v5553_v40 }
 0x10f   :  { %5276 = vmatmul.mubr.msk.bf16.gmra.mrb[20].mxu0 %vm511_vm1, %v5554_v41 }
 0x110   :  { %5279 = vmatprep.mubr.msk.bf16.mxu0 %vm511_vm1, %v5555_v42 }
 0x117   :  { %5280 = vmatmul.mubr.msk.bf16.gmra.mrb[24].mxu0 %vm511_vm1, %v5556_v43 }
 0x118   :  { %5283 = vmatprep.mubr.msk.bf16.mxu0 %vm511_vm1, %v5557_v44 }
 0x11f   :  { %5284 = vmatmul.mubr.msk.bf16.gmra.mrb[28].mxu0 %vm511_vm1, %v5558_v45 }
 0x120   :  { %5287 = vmatprep.mubr.msk.bf16.mxu0 %vm511_vm1, %v5559_v46 }
 0x127   :  { %5288 = vmatmul.mubr.msk.bf16.gmra.mrb[32].mxu0 %vm511_vm1, %v5560_v47 }
 0x128   :  { %5291 = vmatprep.mubr.msk.bf16.mxu0 %vm511_vm1, %v5561_v48 }
 0x12f   :  { %5292 = vmatmul.mubr.msk.bf16.gmra.mrb[36].mxu0 %vm511_vm1, %v5562_v49 }
 0x1ca   :  { %v5265_v51 = vpop.f32.mrb[8].mxu0 }
 0x1cb   :  { %v594_v52 = vpop.f32.mrb[9].mxu0  ;;  %v723_v54 = vmax.f32 %v5265_v51, 0.0 }
 0x1cc   :  { %v5266_v53 = vpop.f32.mrb[10].mxu0  ;;  %v721_v56 = vmax.f32 %v594_v52, 0.0 }
 0x1cd   :  { %v597_v55 = vpop.f32.mrb[11].mxu0  ;;  %v724_v57 = vmax.f32 %v5266_v53, 0.0  ;;  %v6101_v59 = vadd.f32 1e-07, %v723_v54 }
 0x1ce   :  { %v722_v58 = vmax.f32 %v597_v55, 0.0  ;;  %v6105_v61 = vadd.f32 1e-07, %v721_v56 }
 0x1cf   :  { %v6107_v63 = vadd.f32 1e-07, %v724_v57  ;;  %v6113_v5 = vmul.f32 %v6103_v60, %v6101_v59 }
 0x1d0   :  { %v6109_v2 = vadd.f32 1e-07, %v722_v58  ;;  %v6119_v9 = vmul.f32 %v6103_v60, %v6105_v61 }
 0x1d1   :  { %v6125_v12 = vmul.f32 %v6103_v60, %v6107_v63  ;;  %v822_v18 = vsel %vm819_vm2, %v6113_v5, -inf }
 0x1d2   :  { %v5269_v62 = vpop.f32.mrb[12].mxu0  ;;  %v6135_v15 = vmul.f32 %v6103_v60, %v6109_v2  ;;  %v820_v21 = vsel %vm819_vm2, %v6119_v9, -inf }
 0x1d3   :  { %v727_v0 = vmax.f32 %v5269_v62, 0.0  ;;  %v610_v1 = vpop.f32.mrb[13].mxu0  ;;  %v823_v26 = vsel %vm819_vm2, %v6125_v12, -inf }
 0x1d4   :  { %v725_v3 = vmax.f32 %v610_v1, 0.0  ;;  %v5270_v4 = vpop.f32.mrb[14].mxu0  ;;  %v821_v30 = vsel %vm819_vm2, %v6135_v15, -inf }
 0x1d5   :  { %v6115_v6 = vadd.f32 1e-07, %v727_v0  ;;  %v728_v7 = vmax.f32 %v5270_v4, 0.0  ;;  %v613_v8 = vpop.f32.mrb[15].mxu0 }
 0x1d6   :  { %v6121_v10 = vadd.f32 1e-07, %v725_v3  ;;  %v726_v11 = vmax.f32 %v613_v8, 0.0 }
 0x1d7   :  { %v6129_v13 = vmul.f32 %v6103_v60, %v6115_v6  ;;  %v6131_v14 = vadd.f32 1e-07, %v728_v7 }
 0x1d8   :  { %v6139_v16 = vmul.f32 %v6103_v60, %v6121_v10  ;;  %v6141_v17 = vadd.f32 1e-07, %v726_v11 }
 0x1d9   :  { %v828_v19 = vsel %vm819_vm2, %v6129_v13, -inf  ;;  %v6149_v20 = vmul.f32 %v6103_v60, %v6131_v14 }
 0x1da   :  { %v829_v22 = vmax.f32 %v822_v18, %v828_v19  ;;  %v824_v23 = vsel %vm819_vm2, %v6139_v16, -inf  ;;  %v6157_v24 = vmul.f32 %v6103_v60, %v6141_v17  ;;  %v5273_v25 = vpop.f32.mrb[16].mxu0 }
 0x1db   :  { %v825_v27 = vmax.f32 %v820_v21, %v824_v23  ;;  %v830_v28 = vsel %vm819_vm2, %v6149_v20, -inf  ;;  %v626_v29 = vpop.f32.mrb[17].mxu0  ;;  %v731_v37 = vmax.f32 %v5273_v25, 0.0 }
 0x1dc   :  { %v831_v31 = vmax.f32 %v823_v26, %v830_v28  ;;  %v826_v32 = vsel %vm819_vm2, %v6157_v24, -inf  ;;  %v729_v33 = vmax.f32 %v626_v29, 0.0  ;;  %v5274_v34 = vpop.f32.mrb[18].mxu0 }
 0x1dd   :  { %v827_v35 = vmax.f32 %v821_v30, %v826_v32  ;;  %v629_v36 = vpop.f32.mrb[19].mxu0  ;;  %v732_v41 = vmax.f32 %v5274_v34, 0.0  ;;  %v6175_v43 = vadd.f32 1e-07, %v731_v37 }
 0x1de   :  { %v6167_v38 = vadd.f32 1e-07, %v729_v33  ;;  %v730_v39 = vmax.f32 %v629_v36, 0.0 }
 0x1df   :  { %8657 = vst [vmem:[#allocation5_spill] sm:$0xff] %v6175_v43  ;;  %v6183_v50 = vadd.f32 1e-07, %v732_v41  ;;  %v6191_v58 = vmul.f32 %v6103_v60, %v6175_v43 }
 0x1e0   :  { %v6171_v40 = vmul.f32 %v6103_v60, %v6167_v38  ;;  %v6173_v42 = vadd.f32 1e-07, %v730_v39 }
 0x1e1   :  { %8658 = vst [vmem:[#allocation6_spill] sm:$0xff] %v6183_v50  ;;  %v6199_v3 = vmul.f32 %v6103_v60, %v6183_v50  ;;  %v836_v8 = vsel %vm819_vm2, %v6191_v58, -inf }
 0x1e2   :  { %v832_v44 = vsel %vm819_vm2, %v6171_v40, -inf  ;;  %v6181_v45 = vmul.f32 %v6103_v60, %v6173_v42  ;;  %v5277_v46 = vpop.f32.mrb[20].mxu0  ;;  %v837_v29 = vmax.f32 %v829_v22, %v836_v8 }
 0x1e3   :  { %v833_v47 = vmax.f32 %v825_v27, %v832_v44  ;;  %v735_v48 = vmax.f32 %v5277_v46, 0.0  ;;  %v642_v49 = vpop.f32.mrb[21].mxu0  ;;  %v838_v25 = vsel %vm819_vm2, %v6199_v3, -inf  ;;  %v6245_v46 = vld [vmem:[%s6210_s29 + $0x4] ss:$8 sps:$4 sm:$0xff]  }
 0x1e4   :  { %v834_v51 = vsel %vm819_vm2, %v6181_v45, -inf  ;;  %v733_v52 = vmax.f32 %v642_v49, 0.0  ;;  %v5278_v53 = vpop.f32.mrb[22].mxu0  ;;  %v839_v41 = vmax.f32 %v831_v31, %v838_v25  ;;  %8666 = vst [vmem:[#allocation14_spill] sm:$0xff] %v6245_v46  ;;  %1105 = vmatprep.mubr.bf16.mxu1 %v6245_v46 }
 0x1e5   :  { %v835_v54 = vmax.f32 %v827_v35, %v834_v51  ;;  %v6187_v55 = vadd.f32 1e-07, %v735_v48  ;;  %v736_v56 = vmax.f32 %v5278_v53, 0.0  ;;  %v645_v57 = vpop.f32.mrb[23].mxu0 }
 0x1e6   :  { %v6193_v62 = vadd.f32 1e-07, %v733_v52  ;;  %v734_v0 = vmax.f32 %v645_v57, 0.0 }
 0x1e7   :  { %8659 = vst [vmem:[#allocation7_spill] sm:$0xff] %v6187_v55  ;;  %v6195_v1 = vadd.f32 1e-07, %v736_v56  ;;  %v6205_v7 = vmul.f32 %v6103_v60, %v6187_v55 }
 0x1e8   :  { %8660 = vst [vmem:[#allocation8_spill] sm:$0xff] %v6193_v62  ;;  %v6201_v4 = vadd.f32 1e-07, %v734_v0  ;;  %v6216_v11 = vmul.f32 %v6103_v60, %v6193_v62 }
 0x1e9   :  { %8661 = vst [vmem:[#allocation9_spill] sm:$0xff] %v6195_v1  ;;  %8663 = vst [vmem:[#allocation11_spill] sm:$0xff] %v6205_v7  ;;  %v6220_v18 = vmul.f32 %v6103_v60, %v6195_v1  ;;  %v844_v30 = vsel %vm819_vm2, %v6205_v7, -inf }
 0x1ea   :  { %8662 = vst [vmem:[#allocation10_spill] sm:$0xff] %v6201_v4  ;;  %v5281_v19 = vpop.f32.mrb[24].mxu0  ;;  %v6226_v26 = vmul.f32 %v6103_v60, %v6201_v4  ;;  %v840_v35 = vsel %vm819_vm2, %v6216_v11, -inf  ;;  %v845_v48 = vmax.f32 %v837_v29, %v844_v30 }
 0x1eb   :  { %8664 = vst [vmem:[#allocation12_spill] sm:$0xff] %v6220_v18  ;;  %v739_v21 = vmax.f32 %v5281_v19, 0.0  ;;  %v658_v23 = vpop.f32.mrb[25].mxu0  ;;  %v846_v36 = vsel %vm819_vm2, %v6220_v18, -inf  ;;  %v841_v53 = vmax.f32 %v833_v47, %v840_v35 }
 0x1ec   :  { %v737_v27 = vmax.f32 %v658_v23, 0.0  ;;  %v5282_v28 = vpop.f32.mrb[26].mxu0  ;;  %v842_v49 = vsel %vm819_vm2, %v6226_v26, -inf  ;;  %v847_v57 = vmax.f32 %v839_v41, %v846_v36 }
 0x1ed   :  { %v6230_v32 = vadd.f32 1e-07, %v739_v21  ;;  %v740_v33 = vmax.f32 %v5282_v28, 0.0  ;;  %v661_v34 = vpop.f32.mrb[27].mxu0  ;;  %v843_v47 = vmax.f32 %v835_v54, %v842_v49 }
 0x1ee   :  { %v6236_v37 = vadd.f32 1e-07, %v737_v27  ;;  %v738_v39 = vmax.f32 %v661_v34, 0.0 }
 0x1ef   :  { %v6240_v22 = vmul.f32 %v6103_v60, %v6230_v32  ;;  %v6242_v44 = vadd.f32 1e-07, %v740_v33 }
 0x1f0   :  { %v6251_v51 = vmul.f32 %v6103_v60, %v6236_v37  ;;  %v6253_v52 = vadd.f32 1e-07, %v738_v39 }
 0x1f1   :  { %8665 = vst [vmem:[#allocation13_spill] sm:$0xff] %v6242_v44  ;;  %v852_v31 = vsel %vm819_vm2, %v6240_v22, -inf  ;;  %v6259_v56 = vmul.f32 %v6103_v60, %v6242_v44 }
 0x1f2   :  { %v853_v0 = vmax.f32 %v845_v48, %v852_v31  ;;  %v848_v8 = vsel %vm819_vm2, %v6251_v51, -inf  ;;  %v6266_v19 = vmul.f32 %v6103_v60, %v6253_v52  ;;  %v5285_v21 = vpop.f32.mrb[28].mxu0 }
 0x1f3   :  { %v849_v23 = vmax.f32 %v841_v53, %v848_v8  ;;  %v854_v25 = vsel %vm819_vm2, %v6259_v56, -inf  ;;  %v743_v27 = vmax.f32 %v5285_v21, 0.0  ;;  %v674_v28 = vpop.f32.mrb[29].mxu0 }
 0x1f4   :  { %v855_v29 = vmax.f32 %v847_v57, %v854_v25  ;;  %v850_v30 = vsel %vm819_vm2, %v6266_v19, -inf  ;;  %v741_v33 = vmax.f32 %v674_v28, 0.0  ;;  %v5286_v34 = vpop.f32.mrb[30].mxu0 }
 0x1f5   :  { %v851_v35 = vmax.f32 %v843_v47, %v850_v30  ;;  %v6272_v36 = vadd.f32 1e-07, %v743_v27  ;;  %v744_v39 = vmax.f32 %v5286_v34, 0.0  ;;  %v677_v41 = vpop.f32.mrb[31].mxu0 }
 0x1f6   :  { %v6274_v48 = vadd.f32 1e-07, %v741_v33  ;;  %v742_v54 = vmax.f32 %v677_v41, 0.0 }
 0x1f7   :  { %8667 = vst [vmem:[#allocation15_spill] sm:$0xff] %v6272_v36  ;;  %v6278_v49 = vmul.f32 %v6103_v60, %v6272_v36  ;;  %v6280_v53 = vadd.f32 1e-07, %v744_v39 }
 0x1f8   :  { %8668 = vst [vmem:[#allocation16_spill] sm:$0xff] %v6274_v48  ;;  %v6284_v31 = vmul.f32 %v6103_v60, %v6274_v48  ;;  %v6286_v57 = vadd.f32 1e-07, %v742_v54 }
 0x1f9   :  { %8669 = vst [vmem:[#allocation17_spill] sm:$0xff] %v6280_v53  ;;  %v860_v8 = vsel %vm819_vm2, %v6278_v49, -inf  ;;  %v6292_v21 = vmul.f32 %v6103_v60, %v6280_v53 }
 0x1fa   :  { %8670 = vst [vmem:[#allocation18_spill] sm:$0xff] %v6286_v57  ;;  %v861_v47 = vmax.f32 %v853_v0, %v860_v8  ;;  %v856_v25 = vsel %vm819_vm2, %v6284_v31, -inf  ;;  %v6298_v27 = vmul.f32 %v6103_v60, %v6286_v57  ;;  %v5289_v28 = vpop.f32.mrb[32].mxu0 }
 0x1fb   :  { %v857_v30 = vmax.f32 %v849_v23, %v856_v25  ;;  %v862_v33 = vsel %vm819_vm2, %v6292_v21, -inf  ;;  %v747_v34 = vmax.f32 %v5289_v28, 0.0  ;;  %v690_v39 = vpop.f32.mrb[33].mxu0 }
 0x1fc   :  { %v863_v41 = vmax.f32 %v855_v29, %v862_v33  ;;  %v858_v54 = vsel %vm819_vm2, %v6298_v27, -inf  ;;  %v745_v46 = vmax.f32 %v690_v39, 0.0  ;;  %v5290_v0 = vpop.f32.mrb[34].mxu0 }
 0x1fd   :  { %v859_v8 = vmax.f32 %v851_v35, %v858_v54  ;;  %v6304_v1 = vadd.f32 1e-07, %v747_v34  ;;  %v748_v55 = vmax.f32 %v5290_v0, 0.0  ;;  %v693_v4 = vpop.f32.mrb[35].mxu0 }
 0x1fe   :  { %v6306_v62 = vadd.f32 1e-07, %v745_v46  ;;  %v746_v50 = vmax.f32 %v693_v4, 0.0 }
 0x1ff   :  { %8671 = vst [vmem:[#allocation19_spill] sm:$0xff] %v6304_v1  ;;  %v6310_v23 = vmul.f32 %v6103_v60, %v6304_v1  ;;  %v6312_v25 = vadd.f32 1e-07, %v748_v55 }
 0x200   :  { %8672 = vst [vmem:[#allocation20_spill] sm:$0xff] %v6306_v62  ;;  %v6316_v29 = vmul.f32 %v6103_v60, %v6306_v62  ;;  %v6318_v28 = vadd.f32 1e-07, %v746_v50 }
 0x201   :  { %8673 = vst [vmem:[#allocation21_spill] sm:$0xff] %v6312_v25  ;;  %v868_v35 = vsel %vm819_vm2, %v6310_v23, -inf  ;;  %v6324_v46 = vmul.f32 %v6103_v60, %v6312_v25 }
 0x202   :  { %8674 = vst [vmem:[#allocation22_spill] sm:$0xff] %v6318_v28  ;;  %v869_v4 = vmax.f32 %v861_v47, %v868_v35  ;;  %v864_v33 = vsel %vm819_vm2, %v6316_v29, -inf  ;;  %v6330_v55 = vmul.f32 %v6103_v60, %v6318_v28  ;;  %v5293_v34 = vpop.f32.mrb[36].mxu0 }
 0x203   :  { %v865_v39 = vmax.f32 %v857_v30, %v864_v33  ;;  %v870_v50 = vsel %vm819_vm2, %v6324_v46, -inf  ;;  %v751_v54 = vmax.f32 %v5293_v34, 0.0  ;;  %v706_v0 = vpop.f32.mrb[37].mxu0 }
 0x204   :  { %v871_v43 = vmax.f32 %v863_v41, %v870_v50  ;;  %v866_v25 = vsel %vm819_vm2, %v6330_v55, -inf  ;;  %v749_v1 = vmax.f32 %v706_v0, 0.0  ;;  %v5294_v47 = vpop.f32.mrb[38].mxu0 }
 0x205   :  { %v867_v35 = vmax.f32 %v859_v8, %v866_v25  ;;  %v6336_v62 = vadd.f32 1e-07, %v751_v54  ;;  %v752_v53 = vmax.f32 %v5294_v47, 0.0  ;;  %v709_v36 = vpop.f32.mrb[39].mxu0 }
 0x206   :  { %v6338_v28 = vadd.f32 1e-07, %v749_v1  ;;  %v750_v57 = vmax.f32 %v709_v36, 0.0 }
 0x207   :  { %8675 = vst [vmem:[#allocation23_spill] sm:$0xff] %v6336_v62  ;;  %v6342_v30 = vmul.f32 %v6103_v60, %v6336_v62  ;;  %v6344_v33 = vadd.f32 1e-07, %v752_v53 }
 0x208   :  { %8676 = vst [vmem:[#allocation24_spill] sm:$0xff] %v6338_v28  ;;  %v6348_v41 = vmul.f32 %v6103_v60, %v6338_v28  ;;  %v782_v34 = vadd.f32 1e-07, %v750_v57 }
 0x209   :  { %8677 = vst [vmem:[#allocation25_spill] sm:$0xff] %v6344_v33  ;;  %v876_v8 = vsel %vm819_vm2, %v6342_v30, -inf  ;;  %v6354_v25 = vmul.f32 %v6103_v60, %v6344_v33 }
 0x20a   :  { %v877_v1 = vmax.f32 %v869_v4, %v876_v8  ;;  %v872_v36 = vsel %vm819_vm2, %v6348_v41, -inf  ;;  %v816_v50 = vmul.f32 %v6103_v60, %v782_v34 }
 0x20b   :  { %v873_v53 = vmax.f32 %v865_v39, %v872_v36  ;;  %v878_v54 = vsel %vm819_vm2, %v6354_v25, -inf }
 0x20c   :  { %v879_v0 = vmax.f32 %v871_v43, %v878_v54  ;;  %v874_v57 = vsel %vm819_vm2, %v816_v50, -inf }
 0x20d   :  { %v875_v47 = vmax.f32 %v867_v35, %v874_v57 }
 0x20e   :  { %v881_v62 = vmax.f32 %v877_v1, %v879_v0 }
 0x20f   :  { %v880_v28 = vmax.f32 %v873_v53, %v875_v47 }
 0x211   :  { %v882_v18 = vmax.f32 %v880_v28, %v881_v62 }
 0x213   :  { %v883_v48 = vrot.slane %v882_v18, 4 }
 0x215   :  { %v884_v33 = vmax.f32 %v882_v18, %v883_v48 }
 0x217   :  { %v885_v7 = vrot.slane %v884_v33, 2 }
 0x219   :  { %v886_v4 = vmax.f32 %v884_v33, %v885_v7 }
 0x21b   :  { %v887_v8 = vrot.slane %v886_v4, 1 }
 0x21d   :  { %v6362_v44 = vmax.f32 %v886_v4, %v887_v8 }
 0x21f   :  { %v918_v60 = vsub.f32 %v816_v50, %v6362_v44  ;;  %v889_v39 = vsub.f32 %v6119_v9, %v6362_v44  ;;  %v890_v43 = vsub.f32 %v6135_v15, %v6362_v44  ;;  %v891_v35 = vsub.f32 %v6113_v5, %v6362_v44 }
 0x220   :  { %v892_v62 = vsub.f32 %v6125_v12, %v6362_v44  ;;  %v893_v7 = vsub.f32 %v6139_v16, %v6362_v44  ;;  %v894_v18 = vsub.f32 %v6157_v24, %v6362_v44  ;;  %v895_v48 = vsub.f32 %v6129_v13, %v6362_v44 }
 0x221   :  { %v979_v28 = vmul.f32 1.442695, %v918_v60  ;;  %v896_v9 = vsub.f32 %v6149_v20, %v6362_v44  ;;  %v897_v15 = vsub.f32 %v6171_v40, %v6362_v44  ;;  %v898_v5 = vsub.f32 %v6181_v45, %v6362_v44 }
 0x222   :  { %v905_v12 = vsub.f32 %v6251_v51, %v6362_v44  ;;  %v906_v16 = vsub.f32 %v6266_v19, %v6362_v44  ;;  %v907_v13 = vsub.f32 %v6240_v22, %v6362_v44  ;;  %v908_v24 = vsub.f32 %v6259_v56, %v6362_v44 }
 0x223   :  { %5600 = vpow2.f32 %v979_v28  ;;  %v909_v20 = vsub.f32 %v6284_v31, %v6362_v44  ;;  %v910_v40 = vsub.f32 %v6298_v27, %v6362_v44  ;;  %v911_v45 = vsub.f32 %v6278_v49, %v6362_v44 }
 0x224   :  { %v912_v51 = vsub.f32 %v6292_v21, %v6362_v44  ;;  %v913_v19 = vsub.f32 %v6316_v29, %v6362_v44  ;;  %v914_v22 = vsub.f32 %v6330_v55, %v6362_v44  ;;  %v915_v56 = vsub.f32 %v6310_v23, %v6362_v44 }
 0x225   :  { %v916_v31 = vsub.f32 %v6324_v46, %v6362_v44  ;;  %v917_v27 = vsub.f32 %v6348_v41, %v6362_v44  ;;  %v919_v49 = vsub.f32 %v6342_v30, %v6362_v44  ;;  %v920_v33 = vsub.f32 %v6354_v25, %v6362_v44 }
 0x226   :  { %v921_v1 = vmul.f32 1.442695, %v889_v39  ;;  %v923_v36 = vmul.f32 1.442695, %v890_v43  ;;  %v925_v50 = vmul.f32 1.442695, %v891_v35  ;;  %v899_v55 = vsub.f32 %v6191_v58, %v6362_v44 }
 0x227   :  { %v927_v53 = vmul.f32 1.442695, %v892_v62  ;;  %v929_v54 = vmul.f32 1.442695, %v893_v7  ;;  %v931_v0 = vmul.f32 1.442695, %v894_v18  ;;  %v900_v23 = vsub.f32 %v6199_v3, %v6362_v44 }
 0x228   :  { %5602 = vpow2.f32 %v921_v1  ;;  %v933_v57 = vmul.f32 1.442695, %v895_v48  ;;  %v935_v4 = vmul.f32 1.442695, %v896_v9  ;;  %v937_v60 = vmul.f32 1.442695, %v897_v15 }
 0x229   :  { %5604 = vpow2.f32 %v923_v36  ;;  %v939_v28 = vmul.f32 1.442695, %v898_v5  ;;  %v953_v48 = vmul.f32 1.442695, %v905_v12  ;;  %v957_v36 = vmul.f32 1.442695, %v907_v13 }
 0x22a   :  { %5606 = vpow2.f32 %v925_v50  ;;  %v959_v50 = vmul.f32 1.442695, %v908_v24  ;;  %v971_v29 = vmul.f32 1.442695, %v914_v22  ;;  %v981_v22 = vmul.f32 1.442695, %v919_v49 }
 0x22b   :  { %5608 = vpow2.f32 %v927_v53  ;;  %v983_v46 = vmul.f32 1.442695, %v920_v33  ;;  %v901_v58 = vsub.f32 %v6216_v11, %v6362_v44  ;;  %v902_v30 = vsub.f32 %v6226_v26, %v6362_v44 }
 0x22c   :  { %5610 = vpow2.f32 %v929_v54  ;;  %v941_v33 = vmul.f32 1.442695, %v899_v55  ;;  %v943_v11 = vmul.f32 1.442695, %v900_v23 }
 0x22d   :  { %v6415_v47 = vpop.eup %5600  ;;  %5612 = vpow2.f32 %v931_v0 }
 0x22e   :  { %v6418_v8 = vmul.f32 %v6415_v47, %v782_v34  ;;  %5614 = vpow2.f32 %v933_v57  ;;  %v965_v57 = vmul.f32 1.442695, %v911_v45  ;;  %v969_v45 = vmul.f32 1.442695, %v913_v19 }
 0x22f   :  { %5616 = vpow2.f32 %v935_v4  ;;  %v977_v19 = vmul.f32 1.442695, %v917_v27 }
 0x230   :  { %5618 = vpow2.f32 %v937_v60 }
 0x231   :  { %5620 = vpow2.f32 %v939_v28 }
 0x232   :  { %v6420_v39 = vpop.eup %5602  ;;  %5622 = vpow2.f32 %v953_v48 }
 0x233   :  { %v6422_v43 = vpop.eup %5604  ;;  %v6426_v35 = vmul.f32 %v6420_v39, %v6105_v61  ;;  %v955_v61 = vmul.f32 1.442695, %v906_v16 }
 0x234   :  { %v6428_v62 = vpop.eup %5606  ;;  %v6432_v34 = vmul.f32 %v6422_v43, %v6109_v2  ;;  %v1138_v7 = vpack.c.bf16 %v6422_v43, %v6420_v39  ;;  %v5572_v39 = vld [vmem:[%s6210_s29 + $0x20] ss:$8 sps:$4 sm:$0xff]   ;;  %v5573_v43 = vld [vmem:[%s6210_s29 + $0x34] ss:$8 sps:$4 sm:$0xff]  }
 0x235   :  { %v6436_v18 = vpop.eup %5608  ;;  %v6440_v9 = vmul.f32 %v6428_v62, %v6101_v59  ;;  %5624 = vpow2.f32 %v955_v61 }
 0x236   :  { %v6442_v15 = vpop.eup %5610  ;;  %v6446_v5 = vmul.f32 %v6436_v18, %v6107_v63  ;;  %v1017_v2 = vpack.c.bf16 %v6432_v34, %v6426_v35  ;;  %v1139_v1 = vpack.c.bf16 %v6436_v18, %v6428_v62  ;;  %v961_v63 = vmul.f32 1.442695, %v909_v20  ;;  %v8686_v35 = vld [vmem:[#allocation22_spill] sm:$0xff] }
 0x237   :  { %v6454_v12 = vmul.f32 %v6442_v15, %v6121_v10  ;;  %v6456_v59 = vpop.eup %5612  ;;  %v963_v10 = vmul.f32 1.442695, %v910_v40  ;;  %5626 = vpow2.f32 %v957_v36  ;;  %v8678_v36 = vld [vmem:[#allocation13_spill] sm:$0xff] }
 0x238   :  { %v1018_v16 = vpack.c.bf16 %v6446_v5, %v6440_v9  ;;  %v6460_v53 = vpop.eup %5614  ;;  %v6464_v54 = vmul.f32 %v6456_v59, %v6141_v17  ;;  %v1140_v13 = vpack.c.bf16 %v6456_v59, %v6442_v15  ;;  %5628 = vpow2.f32 %v959_v50  ;;  %v8698_v15 = vld [vmem:[#allocation14_spill] sm:$0xff]  ;;  %v6672_v59 = vpop.f32.mrb[0].mxu1 }
 0x239   :  { %v6468_v0 = vpop.eup %5616  ;;  %v6472_v24 = vmul.f32 %v6460_v53, %v6115_v6  ;;  %v967_v6 = vmul.f32 1.442695, %v912_v51  ;;  %5630 = vpow2.f32 %v961_v63  ;;  %v975_v51 = vmul.f32 1.442695, %v916_v31 }
 0x23a   :  { %v6474_v4 = vpop.eup %5618  ;;  %v6478_v20 = vmul.f32 %v6468_v0, %v6131_v14  ;;  %v1019_v17 = vpack.c.bf16 %v6464_v54, %v6454_v12  ;;  %v1141_v60 = vpack.c.bf16 %v6468_v0, %v6460_v53  ;;  %5632 = vpow2.f32 %v963_v10  ;;  %v8679_v10 = vld [vmem:[#allocation11_spill] sm:$0xff]  ;;  %v8693_v12 = vld [vmem:[#allocation6_spill] sm:$0xff]  ;;  %v6674_v53 = vpop.f32.mrb[1].mxu1 }
 0x23b   :  { %v6484_v40 = vpop.eup %5620  ;;  %v6494_v14 = vmul.f32 %v6474_v4, %v6167_v38  ;;  %v973_v38 = vmul.f32 1.442695, %v915_v56  ;;  %5634 = vpow2.f32 %v965_v57  ;;  %v903_v57 = vsub.f32 %v8679_v10, %v6362_v44 }
 0x23c   :  { %v6498_v28 = vmul.f32 %v6484_v40, %v6173_v42  ;;  %v1020_v48 = vpack.c.bf16 %v6478_v20, %v6472_v24  ;;  %v1142_v21 = vpack.c.bf16 %v6484_v40, %v6474_v4  ;;  %5636 = vpow2.f32 %v967_v6  ;;  %v6525_v56 = vpop.eup %5622  ;;  %v8680_v6 = vld [vmem:[#allocation16_spill] sm:$0xff] }
 0x23d   :  { %5638 = vpow2.f32 %v969_v45  ;;  %v1001_v3 = vmul.f32 %v6525_v56, %v6236_v37 }
 0x23e   :  { %v1021_v42 = vpack.c.bf16 %v6498_v28, %v6494_v14  ;;  %5640 = vpow2.f32 %v971_v29 }
 0x23f   :  { %5642 = vpow2.f32 %v973_v38  ;;  %v6530_v41 = vpop.eup %5624 }
 0x240   :  { %5644 = vpow2.f32 %v975_v51  ;;  %v1002_v25 = vmul.f32 %v6530_v41, %v6253_v52  ;;  %v1146_v27 = vpack.c.bf16 %v6530_v41, %v6525_v56  ;;  %v8682_v51 = vld [vmem:[#allocation18_spill] sm:$0xff]  ;;  %v5926_v56 = vld [vmem:[%s6052_s13] sm:$0xff]  }
 0x241   :  { %v6536_v31 = vpop.eup %5626  ;;  %5646 = vpow2.f32 %v977_v19  ;;  %v5576_v41 = vld [vmem:[%s4662_s3] sm:$0xff]  }
 0x242   :  { %v6544_v49 = vpop.eup %5628  ;;  %5648 = vpow2.f32 %v981_v22  ;;  %v1003_v37 = vmul.f32 %v6536_v31, %v6230_v32  ;;  %v1025_v50 = vpack.c.bf16 %v1002_v25, %v1001_v3  ;;  %v8681_v32 = vld [vmem:[#allocation12_spill] sm:$0xff]  ;;  %v947_v3 = vmul.f32 1.442695, %v902_v30  ;;  %v8683_v25 = vld [vmem:[#allocation15_spill] sm:$0xff]  ;;  %5295 = vmatprep.subr.bf16.mxu0 %v5576_v41 }
 0x243   :  { %v6548_v61 = vpop.eup %5630  ;;  %5650 = vpow2.f32 %v983_v46  ;;  %v1004_v26 = vmul.f32 %v6544_v49, %v8678_v36  ;;  %v1147_v52 = vpack.c.bf16 %v6544_v49, %v6536_v31  ;;  %v904_v38 = vsub.f32 %v8681_v32, %v6362_v44  ;;  %5296 = vmatpush3.bf16.msra.mxu0 %v5576_v41  ;;  %v5577_v31 = vld [vmem:[%s4662_s3 + $0x8] sm:$0xff]   ;;  %s4651_s3 = sld [smem:[%s8561_s0 + %s5988_s30]]   ;;  %s5995_s30 = smov 24  }
 0x244   :  { %v6554_v63 = vpop.eup %5632  ;;  %v1005_v45 = vmul.f32 %v6548_v61, %v8680_v6  ;;  %4895 = vmatprep.subr.bf16.mxu1 %v1025_v50  ;;  %v945_v46 = vmul.f32 1.442695, %v901_v58  ;;  %5652 = vpow2.f32 %v941_v33  ;;  %v8684_v50 = vld [vmem:[#allocation17_spill] sm:$0xff]  ;;  %v8685_v33 = vld [vmem:[#allocation20_spill] sm:$0xff]  ;;  %5297 = vmatprep.subr.bf16.mxu0 %v5577_v31 }
 0x245   :  { %v6560_v29 = vpop.eup %5634  ;;  %v1006_v19 = vmul.f32 %v6554_v63, %v8682_v51  ;;  %v1026_v55 = vpack.c.bf16 %v1004_v26, %v1003_v37  ;;  %v1148_v23 = vpack.c.bf16 %v6554_v63, %v6548_v61  ;;  %4896 = vmatpush3.bf16.msra.mxu1 %v1017_v2  ;;  %5654 = vpow2.f32 %v943_v11 }
 0x246   :  { %v6568_v22 = vpop.eup %5636  ;;  %v1007_v36 = vmul.f32 %v6560_v29, %v8683_v25  ;;  %v951_v51 = vmul.f32 1.442695, %v904_v38  ;;  %5656 = vpow2.f32 %v945_v46  ;;  %v8689_v46 = vld [vmem:[#allocation24_spill] sm:$0xff] }
 0x247   :  { %v6575_v44 = vpop.eup %5638  ;;  %v1008_v37 = vmul.f32 %v6568_v22, %v8684_v50  ;;  %4897 = vmatprep.subr.bf16.mxu1 %v1026_v55  ;;  %v1027_v26 = vpack.c.bf16 %v1006_v19, %v1005_v45  ;;  %v1149_v58 = vpack.c.bf16 %v6568_v22, %v6560_v29  ;;  %v949_v45 = vmul.f32 1.442695, %v903_v57  ;;  %v8687_v19 = vld [vmem:[#allocation19_spill] sm:$0xff]  ;;  %v8688_v50 = vld [vmem:[#allocation21_spill] sm:$0xff]  ;;  %5298 = vmatpush3.bf16.msra.mxu0 %v5577_v31 }
 0x248   :  { %v6581_v30 = vpop.eup %5640  ;;  %v1009_v10 = vmul.f32 %v6575_v44, %v8685_v33  ;;  %5658 = vpow2.f32 %v947_v3 }
 0x249   :  { %v6585_v6 = vpop.eup %5642  ;;  %v1010_v34 = vmul.f32 %v6581_v30, %v8686_v35  ;;  %v1028_v2 = vpack.c.bf16 %v1008_v37, %v1007_v36  ;;  %v1150_v11 = vpack.c.bf16 %v6581_v30, %v6575_v44  ;;  %4898 = vmatpush3.bf16.msra.mxu1 %v1018_v16  ;;  %v8690_v16 = vld [vmem:[#allocation23_spill] sm:$0xff]  ;;  %5660 = vpow2.f32 %v949_v45 }
 0x24a   :  { %v6591_v32 = vpop.eup %5644  ;;  %v1011_v55 = vmul.f32 %v6585_v6, %v8687_v19  ;;  %4899 = vmatprep.subr.bf16.mxu1 %v1027_v26  ;;  %v8691_v26 = vld [vmem:[#allocation25_spill] sm:$0xff]  ;;  %5662 = vpow2.f32 %v951_v51 }
 0x24b   :  { %v6598_v25 = vpop.eup %5646  ;;  %v1012_v36 = vmul.f32 %v6591_v32, %v8688_v50  ;;  %v1029_v37 = vpack.c.bf16 %v1010_v34, %v1009_v10  ;;  %v1151_v57 = vpack.c.bf16 %v6591_v32, %v6585_v6  ;;  %v8695_v50 = vld [vmem:[#allocation10_spill] sm:$0xff] }
 0x24c   :  { %v6604_v38 = vpop.eup %5648  ;;  %v1013_v33 = vmul.f32 %v6598_v25, %v8689_v46  ;;  %v1152_v9 = vpack.c.bf16 %v6415_v47, %v6598_v25 }
 0x24d   :  { %v6610_v5 = vpop.eup %5650  ;;  %v1015_v3 = vmul.f32 %v6604_v38, %v8690_v16  ;;  %v1030_v35 = vpack.c.bf16 %v1012_v36, %v1011_v55  ;;  %4900 = vmatpush3.bf16.msra.mxu1 %v1019_v17  ;;  %v8692_v55 = vld [vmem:[#allocation5_spill] sm:$0xff]  ;;  %v8696_v36 = vld [vmem:[#allocation7_spill] sm:$0xff] }
 0x24e   :  { %v1016_v10 = vmul.f32 %v6610_v5, %v8691_v26  ;;  %v1031_v6 = vpack.c.bf16 %v6418_v8, %v1013_v33  ;;  %v1153_v34 = vpack.c.bf16 %v6610_v5, %v6604_v38  ;;  %4901 = vmatprep.subr.bf16.mxu1 %v1028_v2  ;;  %v5653_v47 = vpop.eup %5652  ;;  %v8694_v2 = vld [vmem:[#allocation8_spill] sm:$0xff]  ;;  %v8697_v38 = vld [vmem:[#allocation9_spill] sm:$0xff] }
 0x24f   :  { %v5655_v19 = vpop.eup %5654  ;;  %v995_v25 = vmul.f32 %v5653_v47, %v8692_v55  ;;  %v5567_v33 = vld [vmem:[%s6210_s29 + $0x14] ss:$8 sps:$4 sm:$0xff]   ;;  %v5569_v5 = vld [vmem:[%s6210_s29 + $0x10] ss:$8 sps:$4 sm:$0xff]   ;;  %v5570_v16 = vld [vmem:[%s6210_s29 + $0x24] ss:$8 sps:$4 sm:$0xff]  }
 0x250   :  { %v1032_v32 = vpack.c.bf16 %v1016_v10, %v1015_v3  ;;  %v5657_v45 = vpop.eup %5656  ;;  %v996_v54 = vmul.f32 %v5655_v19, %v8693_v12  ;;  %v1143_v62 = vpack.c.bf16 %v5655_v19, %v5653_v47 }
 0x251   :  { %4902 = vmatpush3.bf16.msra.mxu1 %v1020_v48  ;;  %v997_v51 = vmul.f32 %v5657_v45, %v8694_v2 }
 0x252   :  { %4903 = vmatprep.subr.bf16.mxu1 %v1029_v37  ;;  %v5659_v17 = vpop.eup %5658  ;;  %v1022_v20 = vpack.c.bf16 %v996_v54, %v995_v25 }
 0x253   :  { %v5661_v8 = vpop.eup %5660  ;;  %v998_v24 = vmul.f32 %v5659_v17, %v8695_v50  ;;  %v1144_v18 = vpack.c.bf16 %v5659_v17, %v5657_v45 }
 0x254   :  { %v5663_v48 = vpop.eup %5662  ;;  %v999_v37 = vmul.f32 %v5661_v8, %v8696_v36 }
 0x255   :  { %4904 = vmatpush3.bf16.msra.mxu1 %v1021_v42  ;;  %v1000_v46 = vmul.f32 %v5663_v48, %v8697_v38  ;;  %v1023_v14 = vpack.c.bf16 %v998_v24, %v997_v51  ;;  %v5566_v42 = vld [vmem:[%s6210_s29] ss:$8 sps:$4 sm:$0xff]  }
 0x256   :  { %4905 = vmatprep.subr.bf16.mxu1 %v1030_v35 }
 0x257   :  { %v1024_v28 = vpack.c.bf16 %v1000_v46, %v999_v37  ;;  %v4702_v46 = vld [vmem:[%s4654_s7] ss:$0 sm:$0xff]  ;;  %s4653_s7 = sld [smem:[%s8561_s0 + %s5989_s4]]   ;;  %s5996_s4 = smov 23  }
 0x259   :  { %4906 = vmatpush3.bf16.msra.mxu1 %v1022_v20 }
 0x25a   :  { %4907 = vmatprep.subr.bf16.mxu1 %v1031_v6 }
 0x25d   :  { %4908 = vmatpush3.bf16.msra.mxu1 %v1023_v14 }
 0x25e   :  { %4909 = vmatprep.subr.bf16.mxu1 %v1032_v32 }
 0x261   :  { %4910 = vmatpush3.bf16.msra.mxu1 %v1024_v28 }
 0x262   :  { %4935 = vmatprep.subr.bf16.mxu1 %v1146_v27 }
 0x264   :  { %1106 = vmatmul.mubr.bf16.vlgmr.msra.gmra.mrb[8].mxu1 %v5566_v42 }
 0x265   :  { %4936 = vmatpush3.bf16.msra.mxu1 %v1138_v7  ;;  %1113 = vmatprep.mubr.bf16.mxu1 %v5567_v33  ;;  %v5575_v7 = vld [vmem:[%s6210_s29 + $0x30] ss:$8 sps:$4 sm:$0xff]  }
 0x266   :  { %4937 = vmatprep.subr.bf16.mxu1 %v1147_v52 }
 0x269   :  { %4938 = vmatpush3.bf16.msra.mxu1 %v1139_v1  ;;  %v1145_v1 = vpack.c.bf16 %v5663_v48, %v5661_v8 }
 0x26a   :  { %4939 = vmatprep.subr.bf16.mxu1 %v1148_v23 }
 0x26c   :  { %1114 = vmatmul.mubr.bf16.gmra.mrb[12].mxu1 %v5569_v5 }
 0x26d   :  { %4940 = vmatpush3.bf16.msra.mxu1 %v1140_v13  ;;  %1121 = vmatprep.mubr.bf16.mxu1 %v5570_v16  ;;  %v6676_v13 = vpop.f32.mrb[2].mxu1 }
 0x26e   :  { %4941 = vmatprep.subr.bf16.mxu1 %v1149_v58  ;;  %v6678_v0 = vpop.f32.mrb[3].mxu1 }
 0x26f   :  { %v6680_v4 = vpop.f32.mrb[4].mxu1 }
 0x271   :  { %4942 = vmatpush3.bf16.msra.mxu1 %v1141_v60  ;;  %v6682_v60 = vpop.f32.mrb[5].mxu1 }
 0x272   :  { %4943 = vmatprep.subr.bf16.mxu1 %v1150_v11  ;;  %v6684_v40 = vpop.f32.mrb[6].mxu1 }
 0x274   :  { %1122 = vmatmul.mubr.bf16.gmra.mrb[16].mxu1 %v5572_v39 }
 0x275   :  { %4944 = vmatpush3.bf16.msra.mxu1 %v1142_v21  ;;  %1129 = vmatprep.mubr.bf16.mxu1 %v5573_v43  ;;  %v6686_v21 = vpop.f32.mrb[7].mxu1 }
 0x276   :  { %4945 = vmatprep.subr.bf16.mxu1 %v1151_v57 }
 0x279   :  { %4946 = vmatpush3.bf16.msra.mxu1 %v1143_v62 }
 0x27a   :  { %4947 = vmatprep.subr.bf16.mxu1 %v1152_v9 }
 0x27c   :  { %1130 = vmatmul.mubr.bf16.gmra.mrb[20].mxu1 %v5575_v7 }
 0x27d   :  { %4948 = vmatpush3.bf16.msra.mxu1 %v1144_v18  ;;  %1186 = vmatprep.mubr.bf16.mxu1 %v8698_v15 }
 0x27e   :  { %4949 = vmatprep.subr.bf16.mxu1 %v1153_v34 }
 0x281   :  { %4950 = vmatpush3.bf16.msra.mxu1 %v1145_v1 }
 0x284   :  { %1187 = vmatmul.mubr.bf16.vlgmr.msra.gmra.mrb[24].mxu1 %v5566_v42 }
 0x285   :  { %1194 = vmatprep.mubr.bf16.mxu1 %v5567_v33  ;;  %v397_v33 = vadd.f32 %v4702_v46, %v6674_v53  ;;  %v405_v53 = vadd.f32 %v6672_v59, %v4702_v46 }
 0x28c   :  { %1195 = vmatmul.mubr.bf16.gmra.mrb[28].mxu1 %v5569_v5 }
 0x28d   :  { %1202 = vmatprep.mubr.bf16.mxu1 %v5570_v16 }
 0x294   :  { %1203 = vmatmul.mubr.bf16.gmra.mrb[32].mxu1 %v5572_v39 }
 0x295   :  { %1210 = vmatprep.mubr.bf16.mxu1 %v5573_v43 }
 0x29c   :  { %1211 = vmatmul.mubr.bf16.gmra.mrb[36].mxu1 %v5575_v7  ;;  %v400_v7 = vadd.f32 %v4702_v46, %v6678_v0 }
 0x29d   :  { %5331 = vmatprep.mubr.msk.bf16.mxu1 %vm511_vm1, %v5926_v56 }
 0x337   :  { %v4911_v27 = vpop.f32.mrb[8].mxu1 }
 0x338   :  { %v4912_v49 = vpop.f32.mrb[9].mxu1 }
 0x339   :  { %v4913_v61 = vadd.f32 %v4912_v49, %v4911_v27  ;;  %v4914_v52 = vpop.f32.mrb[10].mxu1 }
 0x33a   :  { %v4915_v63 = vpop.f32.mrb[11].mxu1 }
 0x33b   :  { %v4916_v29 = vadd.f32 %v4915_v63, %v4914_v52 }
 0x33f   :  { %v4917_v23 = vpop.f32.mrb[12].mxu1 }
 0x340   :  { %v4918_v22 = vpop.f32.mrb[13].mxu1 }
 0x341   :  { %v4919_v44 = vadd.f32 %v4918_v22, %v4917_v23  ;;  %v4920_v58 = vpop.f32.mrb[14].mxu1 }
 0x342   :  { %v4921_v30 = vpop.f32.mrb[15].mxu1 }
 0x343   :  { %v6693_v11 = vadd.f32 %v4921_v30, %v4920_v58 }
 0x347   :  { %v4923_v57 = vpop.f32.mrb[16].mxu1 }
 0x348   :  { %v4924_v9 = vpop.f32.mrb[17].mxu1 }
 0x349   :  { %v6695_v3 = vadd.f32 %v4924_v9, %v4923_v57  ;;  %v4926_v35 = vpop.f32.mrb[18].mxu1 }
 0x34a   :  { %v4927_v26 = vpop.f32.mrb[19].mxu1 }
 0x34b   :  { %v6697_v10 = vadd.f32 %v4927_v26, %v4926_v35 }
 0x34f   :  { %v4929_v6 = vpop.f32.mrb[20].mxu1 }
 0x350   :  { %v4930_v34 = vpop.f32.mrb[21].mxu1 }
 0x351   :  { %v6699_v47 = vadd.f32 %v4930_v34, %v4929_v6  ;;  %v4932_v32 = vpop.f32.mrb[22].mxu1 }
 0x352   :  { %v4933_v19 = vpop.f32.mrb[23].mxu1 }
 0x353   :  { %v6701_v45 = vadd.f32 %v4933_v19, %v4932_v32 }
 0x357   :  { %v4951_v55 = vpop.f32.mrb[24].mxu1 }
 0x358   :  { %v4952_v25 = vpop.f32.mrb[25].mxu1 }
 0x359   :  { %v4953_v12 = vadd.f32 %v4952_v25, %v4951_v55  ;;  %v4954_v54 = vpop.f32.mrb[26].mxu1 }
 0x35a   :  { %v4955_v17 = vpop.f32.mrb[27].mxu1 }
 0x35b   :  { %v1189_v8 = vadd.f32 1e-16, %v4953_v12  ;;  %v4956_v2 = vadd.f32 %v4955_v17, %v4954_v54 }
 0x35d   :  { %5664 = vrcp.f32 %v1189_v8  ;;  %v1192_v51 = vadd.f32 1e-16, %v4956_v2  ;;  %v421_v8 = vadd.f32 %v6680_v4, %v4702_v46  ;;  %v4748_v4 = vld [vmem:[%s4658_s11] ss:$0 sm:$0xff]  ;;  %s4652_s11 = sld [smem:[%s8561_s0 + %s5990_s8]]   ;;  %s5997_s8 = smov 22  }
 0x35f   :  { %5666 = vrcp.f32 %v1192_v51  ;;  %v4957_v50 = vpop.f32.mrb[28].mxu1  ;;  %v424_v51 = vadd.f32 %v6684_v40, %v4702_v46 }
 0x360   :  { %v4958_v24 = vpop.f32.mrb[29].mxu1 }
 0x361   :  { %v4959_v20 = vadd.f32 %v4958_v24, %v4957_v50  ;;  %v4960_v48 = vpop.f32.mrb[30].mxu1 }
 0x362   :  { %v4961_v36 = vpop.f32.mrb[31].mxu1 }
 0x363   :  { %v1197_v37 = vadd.f32 1e-16, %v4959_v20  ;;  %v4962_v38 = vadd.f32 %v4961_v36, %v4960_v48 }
 0x365   :  { %5668 = vrcp.f32 %v1197_v37  ;;  %v1200_v14 = vadd.f32 1e-16, %v4962_v38 }
 0x367   :  { %v5665_v28 = vpop.eup %5664  ;;  %5670 = vrcp.f32 %v1200_v14  ;;  %v4963_v42 = vpop.f32.mrb[32].mxu1 }
 0x368   :  { %v4964_v5 = vpop.f32.mrb[33].mxu1  ;;  %v1227_v16 = vmul.f32 %v5665_v28, %v4913_v61 }
 0x369   :  { %v5667_v39 = vpop.eup %5666  ;;  %v4965_v43 = vadd.f32 %v4964_v5, %v4963_v42  ;;  %v4966_v62 = vpop.f32.mrb[34].mxu1 }
 0x36a   :  { %v4967_v18 = vpop.f32.mrb[35].mxu1  ;;  %v1228_v15 = vmul.f32 %v5667_v39, %v4916_v29  ;;  %v1235_v1 = vadd.f32 %v1227_v16, %v397_v33  ;;  %v408_v29 = vadd.f32 %v6676_v13, %v4702_v46  ;;  %v416_v13 = vadd.f32 %v4702_v46, %v6686_v21 }
 0x36b   :  { %v1205_v56 = vadd.f32 1e-16, %v4965_v43  ;;  %v4968_v41 = vadd.f32 %v4967_v18, %v4966_v62 }
 0x36c   :  { %v1236_v31 = vadd.f32 %v1228_v15, %v400_v7 }
 0x36d   :  { %5672 = vrcp.f32 %v1205_v56  ;;  %v1208_v27 = vadd.f32 1e-16, %v4968_v41 }
 0x36e   :  { %v1247_v49 = vpack.c.bf16 %v1236_v31, %v1235_v1 }
 0x36f   :  { %v5669_v52 = vpop.eup %5668  ;;  %5674 = vrcp.f32 %v1208_v27  ;;  %v4969_v63 = vpop.f32.mrb[36].mxu1 }
 0x370   :  { %v1229_v61 = vmul.f32 %v5669_v52, %v4919_v44  ;;  %v4970_v23 = vpop.f32.mrb[37].mxu1  ;;  %5299 = vmatprep.mubr.msk.bf16.mxu0 %vm819_vm2, %v1247_v49  ;;  %v413_v44 = vadd.f32 %v4702_v46, %v6682_v60 }
 0x371   :  { %v5671_v22 = vpop.eup %5670  ;;  %v4971_v0 = vadd.f32 %v4970_v23, %v4969_v63  ;;  %v4972_v58 = vpop.f32.mrb[38].mxu1 }
 0x372   :  { %v1237_v30 = vadd.f32 %v1229_v61, %v405_v53  ;;  %v1230_v57 = vmul.f32 %v5671_v22, %v6693_v11  ;;  %v4973_v9 = vpop.f32.mrb[39].mxu1 }
 0x373   :  { %v1213_v35 = vadd.f32 1e-16, %v4971_v0  ;;  %v4974_v26 = vadd.f32 %v4973_v9, %v4972_v58 }
 0x374   :  { %v1238_v6 = vadd.f32 %v1230_v57, %v408_v29 }
 0x375   :  { %5676 = vrcp.f32 %v1213_v35  ;;  %v1216_v34 = vadd.f32 1e-16, %v4974_v26 }
 0x376   :  { %v1248_v32 = vpack.c.bf16 %v1238_v6, %v1237_v30 }
 0x377   :  { %v5673_v59 = vpop.eup %5672  ;;  %5678 = vrcp.f32 %v1216_v34 }
 0x378   :  { %5300 = vmatmul.mubr.msk.bf16.vlgmr.msra.gmra.mrb[40].mxu0 %vm819_vm2, %v1248_v32  ;;  %v1231_v19 = vmul.f32 %v5673_v59, %v6695_v3 }
 0x379   :  { %v5675_v55 = vpop.eup %5674 }
 0x37a   :  { %v1232_v11 = vmul.f32 %v5675_v55, %v6697_v10  ;;  %v1239_v25 = vadd.f32 %v1231_v19, %v413_v44 }
 0x37c   :  { %v1240_v12 = vadd.f32 %v1232_v11, %v416_v13 }
 0x37e   :  { %v1249_v54 = vpack.c.bf16 %v1240_v12, %v1239_v25 }
 0x37f   :  { %v5677_v17 = vpop.eup %5676 }
 0x380   :  { %5303 = vmatprep.mubr.msk.bf16.mxu0 %vm819_vm2, %v1249_v54  ;;  %v1233_v2 = vmul.f32 %v5677_v17, %v6699_v47 }
 0x381   :  { %v5679_v60 = vpop.eup %5678 }
 0x382   :  { %v1234_v3 = vmul.f32 %v5679_v60, %v6701_v45  ;;  %v1241_v50 = vadd.f32 %v1233_v2, %v421_v8 }
 0x384   :  { %v1242_v24 = vadd.f32 %v1234_v3, %v424_v51 }
 0x386   :  { %v1250_v21 = vpack.c.bf16 %v1242_v24, %v1241_v50 }
 0x388   :  { %5304 = vmatmul.mubr.msk.bf16.gmra.mrb[44].mxu0 %vm819_vm2, %v1250_v21 }
 0x44b   :  { %v5301_v10 = vpop.f32.mrb[40].mxu0 }
 0x44c   :  { %v1325_v20 = vadd.f32 %v5301_v10, %v4748_v4  ;;  %v1316_v48 = vpop.f32.mrb[41].mxu0  ;;  %v5578_v10 = vld [vmem:[%s4663_s16] sm:$0xff]  }
 0x44d   :  { %v1317_v47 = vadd.f32 %v4748_v4, %v1316_v48  ;;  %v5302_v36 = vpop.f32.mrb[42].mxu0  ;;  %5307 = vmatprep.subr.bf16.mxu0 %v5578_v10  ;;  %v5580_v48 = vld [vmem:[%s4663_s16 + $0x10] sm:$0xff]  }
 0x44e   :  { %v1328_v37 = vadd.f32 %v5302_v36, %v4748_v4  ;;  %v1319_v40 = vpop.f32.mrb[43].mxu0  ;;  %v1355_v45 = vsel %vm511_vm1, %v1325_v20, 0.0  ;;  %5308 = vmatpush3.bf16.msra.mxu0 %v5578_v10 }
 0x44f   :  { %v1320_v38 = vadd.f32 %v4748_v4, %v1319_v40  ;;  %1356 = vadd.xlane.f32.xlu1 %v1355_v45  ;;  %v1349_v46 = vsel %vm511_vm1, %v1317_v47, 0.0 }
 0x450   :  { %1350 = vadd.xlane.f32.xlu0 %v1349_v46  ;;  %v1358_v14 = vsel %vm511_vm1, %v1328_v37, 0.0 }
 0x451   :  { %v1352_v28 = vsel %vm511_vm1, %v1320_v38, 0.0 }
 0x453   :  { %1359 = vadd.xlane.f32.xlu1 %v1358_v14 }
 0x454   :  { %1353 = vadd.xlane.f32.xlu0 %v1352_v28 }
 0x45b   :  { %v5305_v42 = vpop.f32.mrb[44].mxu0 }
 0x45c   :  { %v1332_v33 = vpop.f32.mrb[45].mxu0  ;;  %v1341_v43 = vadd.f32 %v5305_v42, %v4748_v4 }
 0x45d   :  { %v1333_v5 = vadd.f32 %v4748_v4, %v1332_v33  ;;  %v5306_v16 = vpop.f32.mrb[46].mxu0 }
 0x45e   :  { %v1335_v39 = vpop.f32.mrb[47].mxu0  ;;  %v1344_v18 = vadd.f32 %v5306_v16, %v4748_v4  ;;  %v1367_v1 = vsel %vm511_vm1, %v1341_v43, 0.0 }
 0x45f   :  { %v1336_v62 = vadd.f32 %v4748_v4, %v1335_v39  ;;  %v1361_v7 = vsel %vm511_vm1, %v1333_v5, 0.0 }
 0x460   :  { %1362 = vadd.xlane.f32.xlu0 %v1361_v7  ;;  %v1370_v56 = vsel %vm511_vm1, %v1344_v18, 0.0 }
 0x461   :  { %v1364_v15 = vsel %vm511_vm1, %v1336_v62, 0.0 }
 0x462   :  { %1365 = vadd.xlane.f32.xlu1 %v1364_v15 }
 0x464   :  { %1368 = vadd.xlane.f32.xlu0 %v1367_v1 }
 0x466   :  { %1371 = vadd.xlane.f32.xlu1 %v1370_v56 }
 0x4dc   :  { %v1357_v41 = vpop.xlane.xlu1 %1356 }
 0x4dd   :  { %v1376_v31 = vmul.f32 0.015625, %v1357_v41  ;;  %v1351_v27 = vpop.xlane.xlu0 %1350  ;;  %v4756_v41 = vld [vmem:[%s4660_s24] ss:$0 sm:$0xff]  ;;  %s4668_s24 = sld [smem:[%s8561_s0 + %s5993_s21]]   ;;  %s6000_s21 = smov 19  }
 0x4de   :  { %v1374_v49 = vmul.f32 0.015625, %v1351_v27 }
 0x4df   :  { %v6734_v52 = vsub.f32 %v1325_v20, %v1376_v31  ;;  %v5579_v20 = vld [vmem:[%s4663_s16 + $0x8] sm:$0xff]  }
 0x4e0   :  { %v6736_v63 = vsub.f32 %v1317_v47, %v1374_v49  ;;  %v1360_v53 = vpop.xlane.xlu1 %1359  ;;  %5309 = vmatprep.subr.bf16.mxu0 %v5579_v20  ;;  %v5581_v47 = vld [vmem:[%s4663_s16 + $0x18] sm:$0xff]   ;;  %s4674_s16 = sld [smem:[%s8561_s0 + %s5991_s12]]   ;;  %s5998_s12 = smov 18  }
 0x4e1   :  { %v1377_v61 = vmul.f32 0.015625, %v1360_v53  ;;  %v1354_v23 = vpop.xlane.xlu0 %1353  ;;  %v1392_v57 = vmul.f32 %v6734_v52, %v6734_v52  ;;  %5310 = vmatpush3.bf16.msra.mxu0 %v5579_v20 }
 0x4e2   :  { %v1375_v22 = vmul.f32 0.015625, %v1354_v23  ;;  %v1390_v0 = vmul.f32 %v6736_v63, %v6736_v63  ;;  %5311 = vmatprep.subr.bf16.mxu0 %v5580_v48 }
 0x4e3   :  { %v6740_v58 = vsub.f32 %v1328_v37, %v1377_v61  ;;  %v1404_v35 = vsel %vm511_vm1, %v1392_v57, 0.0 }
 0x4e4   :  { %v6742_v29 = vsub.f32 %v1320_v38, %v1375_v22  ;;  %v1398_v30 = vsel %vm511_vm1, %v1390_v0, 0.0 }
 0x4e5   :  { %1399 = vadd.xlane.f32.xlu0 %v1398_v30  ;;  %v1393_v6 = vmul.f32 %v6740_v58, %v6740_v58  ;;  %5312 = vmatpush3.bf16.msra.mxu0 %v5580_v48 }
 0x4e6   :  { %v1391_v9 = vmul.f32 %v6742_v29, %v6742_v29  ;;  %5313 = vmatprep.subr.bf16.mxu0 %v5581_v47 }
 0x4e7   :  { %v1407_v34 = vsel %vm511_vm1, %v1393_v6, 0.0 }
 0x4e8   :  { %v1401_v26 = vsel %vm511_vm1, %v1391_v9, 0.0 }
 0x4e9   :  { %1405 = vadd.xlane.f32.xlu0 %v1404_v35  ;;  %1402 = vadd.xlane.f32.xlu1 %v1401_v26 }
 0x4ea   :  { %5314 = vmatpush3.bf16.msra.mxu0 %v5581_v47 }
 0x4ed   :  { %1408 = vadd.xlane.f32.xlu1 %v1407_v34  ;;  %v1363_v32 = vpop.xlane.xlu0 %1362 }
 0x4ee   :  { %v1378_v59 = vmul.f32 0.015625, %v1363_v32 }
 0x4ef   :  { %v1366_v44 = vpop.xlane.xlu1 %1365 }
 0x4f0   :  { %v6754_v19 = vsub.f32 %v1333_v5, %v1378_v59  ;;  %v1379_v55 = vmul.f32 0.015625, %v1366_v44 }
 0x4f1   :  { %v1369_v13 = vpop.xlane.xlu0 %1368 }
 0x4f2   :  { %v6756_v11 = vsub.f32 %v1336_v62, %v1379_v55  ;;  %v1380_v25 = vmul.f32 0.015625, %v1369_v13  ;;  %v1394_v12 = vmul.f32 %v6754_v19, %v6754_v19 }
 0x4f3   :  { %v1372_v54 = vpop.xlane.xlu1 %1371 }
 0x4f4   :  { %v6760_v17 = vsub.f32 %v1341_v43, %v1380_v25  ;;  %v1381_v8 = vmul.f32 0.015625, %v1372_v54  ;;  %v1410_v2 = vsel %vm511_vm1, %v1394_v12, 0.0  ;;  %v1395_v60 = vmul.f32 %v6756_v11, %v6756_v11  ;;  %v4755_v43 = vld [vmem:[%s4661_s20] ss:$0 sm:$0xff]  ;;  %s4672_s20 = sld [smem:[%s8561_s0 + %s5992_s17]]   ;;  %s5999_s17 = smov 20  }
 0x4f5   :  { %1411 = vadd.xlane.f32.xlu0 %v1410_v2 }
 0x4f6   :  { %v6765_v51 = vsub.f32 %v1344_v18, %v1381_v8  ;;  %v1413_v3 = vsel %vm511_vm1, %v1395_v60, 0.0  ;;  %v1396_v50 = vmul.f32 %v6760_v17, %v6760_v17 }
 0x4f7   :  { %1414 = vadd.xlane.f32.xlu1 %v1413_v3 }
 0x4f8   :  { %v1416_v24 = vsel %vm511_vm1, %v1396_v50, 0.0  ;;  %v1397_v21 = vmul.f32 %v6765_v51, %v6765_v51 }
 0x4f9   :  { %1417 = vadd.xlane.f32.xlu0 %v1416_v24 }
 0x4fa   :  { %v1419_v4 = vsel %vm511_vm1, %v1397_v21, 0.0 }
 0x4fb   :  { %1420 = vadd.xlane.f32.xlu1 %v1419_v4 }
 0x572   :  { %v1400_v36 = vpop.xlane.xlu0 %1399 }
 0x573   :  { %v1422_v37 = vmul.f32 0.015625, %v1400_v36 }
 0x575   :  { %v1430_v40 = vadd.f32 1e-05, %v1422_v37 }
 0x576   :  { %v1403_v45 = vpop.xlane.xlu1 %1402  ;;  %v1406_v38 = vpop.xlane.xlu0 %1405 }
 0x577   :  { %5680 = vrsqrt.f32 %v1430_v40  ;;  %v1423_v46 = vmul.f32 0.015625, %v1403_v45  ;;  %v1424_v14 = vmul.f32 0.015625, %v1406_v38 }
 0x579   :  { %v1431_v28 = vadd.f32 1e-05, %v1423_v46  ;;  %v1432_v42 = vadd.f32 1e-05, %v1424_v14 }
 0x57a   :  { %v1409_v33 = vpop.xlane.xlu1 %1408 }
 0x57b   :  { %5682 = vrsqrt.f32 %v1431_v28  ;;  %v1425_v5 = vmul.f32 0.015625, %v1409_v33 }
 0x57c   :  { %5684 = vrsqrt.f32 %v1432_v42 }
 0x57d   :  { %v1433_v16 = vadd.f32 1e-05, %v1425_v5 }
 0x57f   :  { %5686 = vrsqrt.f32 %v1433_v16 }
 0x581   :  { %v5681_v39 = vpop.eup %5680 }
 0x582   :  { %v1446_v62 = vmul.f32 %v5681_v39, %v6736_v63  ;;  %v1412_v7 = vpop.xlane.xlu0 %1411 }
 0x583   :  { %v1426_v18 = vmul.f32 0.015625, %v1412_v7 }
 0x584   :  { %v1415_v15 = vpop.xlane.xlu1 %1414  ;;  %v1460_v1 = vmul.f32 %v4755_v43, %v1446_v62 }
 0x585   :  { %v5683_v56 = vpop.eup %5682  ;;  %v1434_v31 = vadd.f32 1e-05, %v1426_v18  ;;  %v1427_v27 = vmul.f32 0.015625, %v1415_v15 }
 0x586   :  { %v5685_v49 = vpop.eup %5684  ;;  %v1447_v53 = vmul.f32 %v5683_v56, %v6742_v29  ;;  %v1418_v61 = vpop.xlane.xlu0 %1417  ;;  %v1474_v63 = vadd.f32 %v4756_v41, %v1460_v1 }
 0x587   :  { %v1448_v23 = vmul.f32 %v5685_v49, %v6734_v52  ;;  %5688 = vrsqrt.f32 %v1434_v31  ;;  %v1435_v22 = vadd.f32 1e-05, %v1427_v27  ;;  %v1428_v0 = vmul.f32 0.015625, %v1418_v61 }
 0x588   :  { %v1421_v30 = vpop.xlane.xlu1 %1420  ;;  %v1461_v57 = vmul.f32 %v4755_v43, %v1447_v53  ;;  %v1482_v55 = vmax.f32 %v1474_v63, 0.0 }
 0x589   :  { %v5687_v9 = vpop.eup %5686  ;;  %v1462_v35 = vmul.f32 %v4755_v43, %v1448_v23  ;;  %5690 = vrsqrt.f32 %v1435_v22  ;;  %v1436_v26 = vadd.f32 1e-05, %v1428_v0  ;;  %v1429_v6 = vmul.f32 0.015625, %v1421_v30 }
 0x58a   :  { %v1449_v34 = vmul.f32 %v5687_v9, %v6740_v58  ;;  %v1475_v32 = vadd.f32 %v4756_v41, %v1461_v57 }
 0x58b   :  { %5692 = vrsqrt.f32 %v1436_v26  ;;  %v1437_v59 = vadd.f32 1e-05, %v1429_v6  ;;  %v1476_v29 = vadd.f32 %v4756_v41, %v1462_v35 }
 0x58c   :  { %v1463_v44 = vmul.f32 %v4755_v43, %v1449_v34  ;;  %v1483_v52 = vmax.f32 %v1475_v32, 0.0 }
 0x58d   :  { %5694 = vrsqrt.f32 %v1437_v59  ;;  %v1484_v12 = vmax.f32 %v1476_v29, 0.0 }
 0x58e   :  { %v1477_v13 = vadd.f32 %v4756_v41, %v1463_v44  ;;  %v1498_v25 = vpack.c.bf16 %v1483_v52, %v1482_v55  ;;  %v1637_v52 = vlaneseq }
 0x590   :  { %v1485_v54 = vmax.f32 %v1477_v13, 0.0  ;;  %5315 = vmatprep.mubr.msk.bf16.mxu0 %vm511_vm1, %v1498_v25 }
 0x591   :  { %v5689_v8 = vpop.eup %5688 }
 0x592   :  { %v1450_v2 = vmul.f32 %v5689_v8, %v6754_v19  ;;  %v1499_v60 = vpack.c.bf16 %v1485_v54, %v1484_v12  ;;  %v1638_v12 = vshrl.u32 %v1637_v52, 7  ;;  %v1612_v8 = vld [vmem:[%s4651_s3] sm:$0x1]  ;;  %s4671_s3 = sld [smem:[%s8561_s0 + %s5995_s30]]  }
 0x593   :  { %v5691_v3 = vpop.eup %5690  ;;  %s4675_s30 = sld [smem:[%s8561_s0 + %s6009_s27]]  }
 0x594   :  { %v1451_v58 = vmul.f32 %v5691_v3, %v6756_v11  ;;  %5316 = vmatmul.mubr.msk.bf16.vlgmr.msra.gmra.mrb[48].mxu0 %vm511_vm1, %v1499_v60  ;;  %v1464_v50 = vmul.f32 %v4755_v43, %v1450_v2  ;;  %v6810_v60 = vsub.s32 0, %v1638_v12 }
 0x595   :  { %v5693_v24 = vpop.eup %5692 }
 0x596   :  { %v1452_v21 = vmul.f32 %v5693_v24, %v6760_v17  ;;  %v1465_v4 = vmul.f32 %v4755_v43, %v1451_v58  ;;  %v1478_v10 = vadd.f32 %v4756_v41, %v1464_v50  ;;  %v5927_v17 = vld [vmem:[%s6210_s29 + $0x4] ss:$8 sps:$4 sm:$0xff]   ;;  %8699 = vst [vmem:[#allocation13_spill] sm:$0xff] %v6810_v60 }
 0x597   :  { %v5695_v20 = vpop.eup %5694 }
 0x598   :  { %v1453_v48 = vmul.f32 %v5695_v20, %v6765_v51  ;;  %v1479_v47 = vadd.f32 %v4756_v41, %v1465_v4  ;;  %v1466_v36 = vmul.f32 %v4755_v43, %v1452_v21  ;;  %v1486_v37 = vmax.f32 %v1478_v10, 0.0  ;;  %v4757_v51 = vld [vmem:[%s4659_s28] ss:$0 sm:$0xff]  ;;  %s4673_s28 = sld [smem:[%s8561_s0 + %s5994_s25]]   ;;  %s6001_s25 = smov 37  }
 0x59a   :  { %v1487_v19 = vmax.f32 %v1479_v47, 0.0  ;;  %v1467_v40 = vmul.f32 %v4755_v43, %v1453_v48  ;;  %v1480_v45 = vadd.f32 %v4756_v41, %v1466_v36 }
 0x59c   :  { %v1500_v38 = vpack.c.bf16 %v1487_v19, %v1486_v37  ;;  %v1481_v11 = vadd.f32 %v4756_v41, %v1467_v40  ;;  %v1488_v46 = vmax.f32 %v1480_v45, 0.0 }
 0x59e   :  { %5319 = vmatprep.mubr.msk.bf16.mxu0 %vm511_vm1, %v1500_v38  ;;  %v1489_v14 = vmax.f32 %v1481_v11, 0.0 }
 0x5a0   :  { %v1501_v28 = vpack.c.bf16 %v1489_v14, %v1488_v46 }
 0x5a2   :  { %5320 = vmatmul.mubr.msk.bf16.gmra.mrb[52].mxu0 %vm511_vm1, %v1501_v28 }
 0x5a3   :  { %2234 = vmatprep.mubr.bf16.mxu0 %v5927_v17 }
 0x667   :  { %v5317_v42 = vpop.f32.mrb[48].mxu0 }
 0x668   :  { %v1579_v33 = vpop.f32.mrb[49].mxu0  ;;  %v1588_v43 = vadd.f32 %v5317_v42, %v4757_v51 }
 0x669   :  { %v1580_v5 = vadd.f32 %v4757_v51, %v1579_v33  ;;  %v5318_v16 = vpop.f32.mrb[50].mxu0 }
 0x66a   :  { %v1582_v39 = vpop.f32.mrb[51].mxu0  ;;  %v1591_v18 = vadd.f32 %v5318_v16, %v4757_v51  ;;  %v1616_v56 = vsel %vm819_vm2, %v1588_v43, 0.0 }
 0x66b   :  { %v1583_v62 = vadd.f32 %v4757_v51, %v1582_v39  ;;  %v1613_v7 = vsel %vm819_vm2, %v1580_v5, 0.0 }
 0x66c   :  { %v1618_v31 = vsel %vm819_vm2, %v1591_v18, 0.0 }
 0x66d   :  { %v1614_v15 = vsel %vm819_vm2, %v1583_v62, 0.0 }
 0x66e   :  { %v1615_v1 = vadd.f32 %v1614_v15, %v1613_v7 }
 0x670   :  { %v1617_v41 = vadd.f32 %v1616_v56, %v1615_v1 }
 0x672   :  { %v1619_v27 = vadd.f32 %v1618_v31, %v1617_v41 }
 0x675   :  { %v5321_v49 = vpop.f32.mrb[52].mxu0 }
 0x676   :  { %v1595_v53 = vpop.f32.mrb[53].mxu0  ;;  %v1604_v0 = vadd.f32 %v5321_v49, %v4757_v51 }
 0x677   :  { %v1596_v61 = vadd.f32 %v4757_v51, %v1595_v53  ;;  %v5322_v23 = vpop.f32.mrb[54].mxu0 }
 0x678   :  { %v1598_v22 = vpop.f32.mrb[55].mxu0  ;;  %v1607_v9 = vadd.f32 %v5322_v23, %v4757_v51  ;;  %v1624_v6 = vsel %vm819_vm2, %v1604_v0, 0.0 }
 0x679   :  { %v1620_v30 = vsel %vm819_vm2, %v1596_v61, 0.0  ;;  %v1599_v57 = vadd.f32 %v4757_v51, %v1598_v22  ;;  %v4766_v22 = vld [vmem:[%s4653_s7] ss:$0 sm:$0xff]  ;;  %s4670_s7 = sld [smem:[%s8561_s0 + %s5996_s4]]   ;;  %s6011_s4 = smov 29  }
 0x67a   :  { %v1621_v63 = vadd.f32 %v1620_v30, %v1619_v27  ;;  %v1626_v32 = vsel %vm819_vm2, %v1607_v9, 0.0 }
 0x67b   :  { %v1622_v35 = vsel %vm819_vm2, %v1599_v57, 0.0 }
 0x67c   :  { %v1623_v26 = vadd.f32 %v1622_v35, %v1621_v63  ;;  %v4767_v35 = vld [vmem:[%s4652_s11] ss:$0 sm:$0xff]  ;;  %s4669_s11 = sld [smem:[%s8561_s0 + %s5997_s8]]   ;;  %s6012_s8 = smov 39  }
 0x67e   :  { %v1625_v34 = vadd.f32 %v1624_v6, %v1623_v26 }
 0x680   :  { %v1627_v59 = vadd.f32 %v1626_v32, %v1625_v34 }
 0x682   :  { %v1628_v29 = vrot.slane %v1627_v59, 4 }
 0x684   :  { %v1629_v44 = vadd.f32 %v1628_v29, %v1627_v59 }
 0x686   :  { %v1630_v55 = vrot.slane %v1629_v44, 2 }
 0x688   :  { %v1631_v13 = vadd.f32 %v1630_v55, %v1629_v44 }
 0x68a   :  { %v1632_v25 = vrot.slane %v1631_v13, 1 }
 0x68c   :  { %v1633_v54 = vadd.f32 %v1632_v25, %v1631_v13 }
 0x68e   :  { %v1634_v2 = vmul.f32 0.015625, %v1633_v54 }
 0x690   :  { %v1635_v3 = vmul.f32 %v1634_v2, %v1612_v8 }
 0x692   :  { %v1640_v58 = vrot.slane %v1635_v3, %v6810_v60 }
 0x694   :  { %v1642_v50 = vsub.f32 %v1580_v5, %v1640_v58  ;;  %v1643_v24 = vsub.f32 %v1583_v62, %v1640_v58  ;;  %v1644_v21 = vsub.f32 %v1588_v43, %v1640_v58  ;;  %v1645_v4 = vsub.f32 %v1591_v18, %v1640_v58 }
 0x695   :  { %v1646_v10 = vsub.f32 %v1596_v61, %v1640_v58  ;;  %v1647_v20 = vsub.f32 %v1599_v57, %v1640_v58  ;;  %v1648_v48 = vsub.f32 %v1604_v0, %v1640_v58  ;;  %v1649_v47 = vsub.f32 %v1607_v9, %v1640_v58 }
 0x696   :  { %v1650_v36 = vmul.f32 %v1642_v50, %v1642_v50  ;;  %v1651_v37 = vmul.f32 %v1643_v24, %v1643_v24  ;;  %v1652_v19 = vmul.f32 %v1644_v21, %v1644_v21  ;;  %v1653_v40 = vmul.f32 %v1645_v4, %v1645_v4 }
 0x697   :  { %v1654_v46 = vmul.f32 %v1646_v10, %v1646_v10  ;;  %v1655_v17 = vmul.f32 %v1647_v20, %v1647_v20  ;;  %v1656_v33 = vmul.f32 %v1648_v48, %v1648_v48  ;;  %v1657_v39 = vmul.f32 %v1649_v47, %v1649_v47 }
 0x698   :  { %v1658_v45 = vsel %vm819_vm2, %v1650_v36, 0.0  ;;  %v1659_v38 = vsel %vm819_vm2, %v1651_v37, 0.0  ;;  %v1661_v14 = vsel %vm819_vm2, %v1652_v19, 0.0  ;;  %v1663_v51 = vsel %vm819_vm2, %v1653_v40, 0.0 }
 0x699   :  { %v1660_v11 = vadd.f32 %v1659_v38, %v1658_v45  ;;  %v1665_v5 = vsel %vm819_vm2, %v1654_v46, 0.0  ;;  %v1667_v43 = vsel %vm819_vm2, %v1655_v17, 0.0  ;;  %v1669_v7 = vsel %vm819_vm2, %v1656_v33, 0.0  ;;  %v5928_v46 = vld [vmem:[%s6052_s13 + $0x8] sm:$0xff]   ;;  %v5931_v17 = vld [vmem:[%s6052_s13 + $0x20] sm:$0xff]   ;;  %v5934_v33 = vld [vmem:[%s6052_s13 + $0x38] sm:$0xff]  }
 0x69a   :  { %v1671_v15 = vsel %vm819_vm2, %v1657_v39, 0.0  ;;  %v1691_v0 = vmul.f32 %v4766_v22, %v1647_v20  ;;  %v1686_v30 = vmul.f32 %v4766_v22, %v1642_v50  ;;  %v1687_v57 = vmul.f32 %v4766_v22, %v1643_v24  ;;  %v5937_v39 = vld [vmem:[%s6052_s13 + $0x50] sm:$0xff]  }
 0x69b   :  { %v1662_v28 = vadd.f32 %v1661_v14, %v1660_v11  ;;  %v1688_v63 = vmul.f32 %v4766_v22, %v1644_v21  ;;  %v1689_v26 = vmul.f32 %v4766_v22, %v1645_v4  ;;  %v1690_v6 = vmul.f32 %v4766_v22, %v1646_v10  ;;  %v5929_v14 = vld [vmem:[%s6052_s13 + $0x10] sm:$0xff]  }
 0x69c   :  { %v1692_v34 = vmul.f32 %v4766_v22, %v1648_v48  ;;  %v1693_v32 = vmul.f32 %v4766_v22, %v1649_v47  ;;  %v6902_v22 = vstv %s4674_s16  ;;  %s4665_s16 = sld [smem:[%s8561_s0 + %s5998_s12]]   ;;  %s6013_s12 = smov 46  }
 0x69d   :  { %v1664_v42 = vadd.f32 %v1663_v51, %v1662_v28  ;;  %v5930_v28 = vld [vmem:[%s6052_s13 + $0x18] sm:$0xff]   ;;  %v5932_v51 = vld [vmem:[%s6052_s13 + $0x28] sm:$0xff]  }
 0x69f   :  { %v1666_v16 = vadd.f32 %v1665_v5, %v1664_v42  ;;  %v5933_v42 = vld [vmem:[%s6052_s13 + $0x30] sm:$0xff]   ;;  %v5935_v5 = vld [vmem:[%s6052_s13 + $0x40] sm:$0xff]  }
 0x6a1   :  { %v1668_v62 = vadd.f32 %v1667_v43, %v1666_v16  ;;  %v5936_v16 = vld [vmem:[%s6052_s13 + $0x48] sm:$0xff]   ;;  %v5938_v43 = vld [vmem:[%s6052_s13 + $0x58] sm:$0xff]  }
 0x6a3   :  { %v1670_v18 = vadd.f32 %v1669_v7, %v1668_v62  ;;  %v5939_v62 = vld [vmem:[%s6052_s13 + $0x60] sm:$0xff]   ;;  %v5940_v7 = vld [vmem:[%s6052_s13 + $0x68] sm:$0xff]  }
 0x6a5   :  { %v1672_v1 = vadd.f32 %v1671_v15, %v1670_v18  ;;  %v5941_v18 = vld [vmem:[%s6052_s13 + $0x70] sm:$0xff]   ;;  %v5942_v15 = vld [vmem:[%s6052_s13 + $0x78] sm:$0xff]  }
 0x6a7   :  { %v1673_v56 = vrot.slane %v1672_v1, 4 }
 0x6a9   :  { %v1674_v41 = vadd.f32 %v1673_v56, %v1672_v1 }
 0x6ab   :  { %v1675_v31 = vrot.slane %v1674_v41, 2 }
 0x6ad   :  { %v1676_v27 = vadd.f32 %v1675_v31, %v1674_v41 }
 0x6af   :  { %v1677_v49 = vrot.slane %v1676_v27, 1 }
 0x6b1   :  { %v1678_v53 = vadd.f32 %v1677_v49, %v1676_v27 }
 0x6b3   :  { %v1679_v61 = vmul.f32 0.015625, %v1678_v53 }
 0x6b5   :  { %v1694_v23 = vadd.f32 1e-05, %v1679_v61 }
 0x6b7   :  { %5696 = vrsqrt.f32 %v1694_v23 }
 0x6c1   :  { %v5697_v9 = vpop.eup %5696 }
 0x6c2   :  { %v1701_v59 = vmul.f32 %v5697_v9, %v1691_v0  ;;  %v1696_v29 = vmul.f32 %v5697_v9, %v1686_v30  ;;  %v1697_v44 = vmul.f32 %v5697_v9, %v1687_v57  ;;  %v1698_v55 = vmul.f32 %v5697_v9, %v1688_v63 }
 0x6c3   :  { %v1699_v52 = vmul.f32 %v5697_v9, %v1689_v26  ;;  %v1700_v13 = vmul.f32 %v5697_v9, %v1690_v6  ;;  %v1702_v25 = vmul.f32 %v5697_v9, %v1692_v34  ;;  %v1703_v12 = vmul.f32 %v5697_v9, %v1693_v32 }
 0x6c4   :  { %v6827_v54 = vadd.f32 %v4767_v35, %v1696_v29  ;;  %v6829_v8 = vadd.f32 %v4767_v35, %v1697_v44  ;;  %v6831_v2 = vadd.f32 %v4767_v35, %v1698_v55  ;;  %v6835_v58 = vadd.f32 %v4767_v35, %v1701_v59 }
 0x6c5   :  { %v6833_v3 = vadd.f32 %v4767_v35, %v1699_v52  ;;  %v6840_v4 = vadd.f32 %v4767_v35, %v1700_v13  ;;  %v6847_v48 = vadd.f32 %v4767_v35, %v1702_v25  ;;  %v6855_v19 = vadd.f32 %v4767_v35, %v1703_v12 }
 0x6c6   :  { %8700 = vst [vmem:[#allocation11_spill] sm:$0xff] %v6827_v54  ;;  %8701 = vst [vmem:[#allocation16_spill] sm:$0xff] %v6829_v8  ;;  %v8590_v50 = vmax.f32 %v6827_v54, 0.0  ;;  %v8589_v24 = vmax.f32 %v6829_v8, 0.0  ;;  %v8588_v21 = vmax.f32 %v6831_v2, 0.0  ;;  %v8585_v37 = vmax.f32 %v6835_v58, 0.0 }
 0x6c7   :  { %8702 = vst [vmem:[#allocation12_spill] sm:$0xff] %v6831_v2  ;;  %8703 = vst [vmem:[#allocation18_spill] sm:$0xff] %v6833_v3  ;;  %v8587_v10 = vmax.f32 %v6833_v3, 0.0  ;;  %v8586_v36 = vmax.f32 %v6840_v4, 0.0  ;;  %v8584_v45 = vmax.f32 %v6847_v48, 0.0  ;;  %v8583_v38 = vmax.f32 %v6855_v19, 0.0 }
 0x6c8   :  { %8704 = vst [vmem:[#allocation15_spill] sm:$0xff] %v6835_v58  ;;  %8705 = vst [vmem:[#allocation17_spill] sm:$0xff] %v6840_v4  ;;  %v1726_v20 = vpack.c.bf16 %v8589_v24, %v8590_v50 }
 0x6c9   :  { %8706 = vst [vmem:[#allocation20_spill] sm:$0xff] %v6847_v48  ;;  %v1727_v47 = vpack.c.bf16 %v8587_v10, %v8588_v21  ;;  %8707 = vst [vmem:[#allocation22_spill] sm:$0xff] %v6855_v19  ;;  %v1728_v40 = vpack.c.bf16 %v8585_v37, %v8586_v36  ;;  %v1729_v11 = vpack.c.bf16 %v8583_v38, %v8584_v45 }
 0x6ca   :  { %5323 = vmatprep.subr.bf16.mxu1 %v1726_v20 }
 0x6cb   :  { %5324 = vmatpush3.bf16.msra.mxu1 %v1726_v20 }
 0x6cc   :  { %5325 = vmatprep.subr.bf16.mxu1 %v1727_v47 }
 0x6cf   :  { %5326 = vmatpush3.bf16.msra.mxu1 %v1727_v47 }
 0x6d0   :  { %5327 = vmatprep.subr.bf16.mxu1 %v1728_v40 }
 0x6d3   :  { %5328 = vmatpush3.bf16.msra.mxu1 %v1728_v40 }
 0x6d4   :  { %5329 = vmatprep.subr.bf16.mxu1 %v1729_v11 }
 0x6d7   :  { %5330 = vmatpush3.bf16.msra.mxu1 %v1729_v11 }
 0x6da   :  { %5332 = vmatmul.mubr.msk.bf16.vlgmr.msra.gmra.mrb[40].mxu1 %vm511_vm1, %v5928_v46 }
 0x6db   :  { %5335 = vmatprep.mubr.msk.bf16.mxu1 %vm511_vm1, %v5929_v14 }
 0x6e2   :  { %5336 = vmatmul.mubr.msk.bf16.gmra.mrb[44].mxu1 %vm511_vm1, %v5930_v28 }
 0x6e3   :  { %5339 = vmatprep.mubr.msk.bf16.mxu1 %vm511_vm1, %v5931_v17 }
 0x6ea   :  { %5340 = vmatmul.mubr.msk.bf16.gmra.mrb[48].mxu1 %vm511_vm1, %v5932_v51 }
 0x6eb   :  { %5343 = vmatprep.mubr.msk.bf16.mxu1 %vm511_vm1, %v5933_v42 }
 0x6f2   :  { %5344 = vmatmul.mubr.msk.bf16.gmra.mrb[52].mxu1 %vm511_vm1, %v5934_v33 }
 0x6f3   :  { %5347 = vmatprep.mubr.msk.bf16.mxu1 %vm511_vm1, %v5935_v5 }
 0x6fa   :  { %5348 = vmatmul.mubr.msk.bf16.gmra.mrb[56].mxu1 %vm511_vm1, %v5936_v16 }
 0x6fb   :  { %5351 = vmatprep.mubr.msk.bf16.mxu1 %vm511_vm1, %v5937_v39 }
 0x702   :  { %5352 = vmatmul.mubr.msk.bf16.gmra.mrb[60].mxu1 %vm511_vm1, %v5938_v43 }
 0x703   :  { %5355 = vmatprep.mubr.msk.bf16.mxu1 %vm511_vm1, %v5939_v62 }
 0x70a   :  { %5356 = vmatmul.mubr.msk.bf16.gmra.mrb[64].mxu1 %vm511_vm1, %v5940_v7 }
 0x70b   :  { %5359 = vmatprep.mubr.msk.bf16.mxu1 %vm511_vm1, %v5941_v18 }
 0x712   :  { %5360 = vmatmul.mubr.msk.bf16.gmra.mrb[68].mxu1 %vm511_vm1, %v5942_v15 }
 0x7ad   :  { %v5333_v1 = vpop.f32.mrb[40].mxu1 }
 0x7ae   :  { %v1764_v56 = vpop.f32.mrb[41].mxu1  ;;  %v1893_v31 = vmax.f32 %v5333_v1, 0.0 }
 0x7af   :  { %v5334_v41 = vpop.f32.mrb[42].mxu1  ;;  %v1891_v49 = vmax.f32 %v1764_v56, 0.0 }
 0x7b0   :  { %v1767_v27 = vpop.f32.mrb[43].mxu1  ;;  %v1894_v53 = vmax.f32 %v5334_v41, 0.0  ;;  %v6900_v23 = vadd.f32 1e-07, %v1893_v31 }
 0x7b1   :  { %v1892_v61 = vmax.f32 %v1767_v27, 0.0  ;;  %v6904_v0 = vadd.f32 1e-07, %v1891_v49 }
 0x7b2   :  { %v6906_v57 = vadd.f32 1e-07, %v1894_v53  ;;  %v6912_v34 = vmul.f32 %v6902_v22, %v6900_v23 }
 0x7b3   :  { %v6908_v35 = vadd.f32 1e-07, %v1892_v61  ;;  %v6918_v44 = vmul.f32 %v6902_v22, %v6904_v0 }
 0x7b4   :  { %v6924_v13 = vmul.f32 %v6902_v22, %v6906_v57  ;;  %v1991_v11 = vsel %vm819_vm2, %v6912_v34, -inf }
 0x7b5   :  { %v5337_v30 = vpop.f32.mrb[44].mxu1  ;;  %v6934_v20 = vmul.f32 %v6902_v22, %v6908_v35  ;;  %v1989_v28 = vsel %vm819_vm2, %v6918_v44, -inf }
 0x7b6   :  { %v1897_v63 = vmax.f32 %v5337_v30, 0.0  ;;  %v1780_v9 = vpop.f32.mrb[45].mxu1  ;;  %v1992_v5 = vsel %vm819_vm2, %v6924_v13, -inf }
 0x7b7   :  { %v1895_v26 = vmax.f32 %v1780_v9, 0.0  ;;  %v5338_v6 = vpop.f32.mrb[46].mxu1  ;;  %v1990_v62 = vsel %vm819_vm2, %v6934_v20, -inf }
 0x7b8   :  { %v6914_v32 = vadd.f32 1e-07, %v1897_v63  ;;  %v1898_v59 = vmax.f32 %v5338_v6, 0.0  ;;  %v1783_v29 = vpop.f32.mrb[47].mxu1 }
 0x7b9   :  { %v6920_v55 = vadd.f32 1e-07, %v1895_v26  ;;  %v1896_v52 = vmax.f32 %v1783_v29, 0.0 }
 0x7ba   :  { %v6928_v25 = vmul.f32 %v6902_v22, %v6914_v32  ;;  %v6930_v12 = vadd.f32 1e-07, %v1898_v59 }
 0x7bb   :  { %v6938_v47 = vmul.f32 %v6902_v22, %v6920_v55  ;;  %v6940_v40 = vadd.f32 1e-07, %v1896_v52 }
 0x7bc   :  { %v1997_v46 = vsel %vm819_vm2, %v6928_v25, -inf  ;;  %v6948_v14 = vmul.f32 %v6902_v22, %v6930_v12 }
 0x7bd   :  { %v1998_v17 = vmax.f32 %v1991_v11, %v1997_v46  ;;  %v1993_v51 = vsel %vm819_vm2, %v6938_v47, -inf  ;;  %v6956_v42 = vmul.f32 %v6902_v22, %v6940_v40  ;;  %v5341_v33 = vpop.f32.mrb[48].mxu1 }
 0x7be   :  { %v1994_v16 = vmax.f32 %v1989_v28, %v1993_v51  ;;  %v1999_v39 = vsel %vm819_vm2, %v6948_v14, -inf  ;;  %v1796_v43 = vpop.f32.mrb[49].mxu1  ;;  %v1901_v49 = vmax.f32 %v5341_v33, 0.0 }
 0x7bf   :  { %v2000_v7 = vmax.f32 %v1992_v5, %v1999_v39  ;;  %v1995_v18 = vsel %vm819_vm2, %v6956_v42, -inf  ;;  %v1899_v15 = vmax.f32 %v1796_v43, 0.0  ;;  %v5342_v1 = vpop.f32.mrb[50].mxu1 }
 0x7c0   :  { %v1996_v56 = vmax.f32 %v1990_v62, %v1995_v18  ;;  %v1799_v41 = vpop.f32.mrb[51].mxu1  ;;  %v1902_v61 = vmax.f32 %v5342_v1, 0.0  ;;  %v6980_v6 = vadd.f32 1e-07, %v1901_v49 }
 0x7c1   :  { %v6966_v31 = vadd.f32 1e-07, %v1899_v15  ;;  %v1900_v27 = vmax.f32 %v1799_v41, 0.0 }
 0x7c2   :  { %8708 = vst [vmem:[#allocation19_spill] sm:$0xff] %v6980_v6  ;;  %v6982_v11 = vadd.f32 1e-07, %v1902_v61 }
 0x7c3   :  { %v6970_v53 = vmul.f32 %v6902_v22, %v6966_v31  ;;  %v6972_v30 = vadd.f32 1e-07, %v1900_v27 }
 0x7c4   :  { %8709 = vst [vmem:[#allocation21_spill] sm:$0xff] %v6982_v11  ;;  %v6998_v1 = vmul.f32 %v6902_v22, %v6982_v11 }
 0x7c5   :  { %v2001_v63 = vsel %vm819_vm2, %v6970_v53, -inf  ;;  %v6978_v9 = vmul.f32 %v6902_v22, %v6972_v30  ;;  %v5345_v26 = vpop.f32.mrb[52].mxu1 }
 0x7c6   :  { %v2002_v59 = vmax.f32 %v1994_v16, %v2001_v63  ;;  %v1905_v29 = vmax.f32 %v5345_v26, 0.0  ;;  %v1812_v52 = vpop.f32.mrb[53].mxu1  ;;  %v6992_v16 = vmul.f32 %v6902_v22, %v6980_v6 }
 0x7c7   :  { %v2003_v46 = vsel %vm819_vm2, %v6978_v9, -inf  ;;  %v1903_v28 = vmax.f32 %v1812_v52, 0.0  ;;  %v5346_v51 = vpop.f32.mrb[54].mxu1  ;;  %v2007_v52 = vsel %vm819_vm2, %v6998_v1, -inf }
 0x7c8   :  { %v2004_v33 = vmax.f32 %v1996_v56, %v2003_v46  ;;  %v6986_v5 = vadd.f32 1e-07, %v1905_v29  ;;  %v1906_v39 = vmax.f32 %v5346_v51, 0.0  ;;  %v1815_v43 = vpop.f32.mrb[55].mxu1  ;;  %v2005_v61 = vsel %vm819_vm2, %v6992_v16, -inf }
 0x7c9   :  { %v6988_v62 = vadd.f32 1e-07, %v1903_v28  ;;  %v1904_v18 = vmax.f32 %v1815_v43, 0.0  ;;  %v2006_v45 = vmax.f32 %v1998_v17, %v2005_v61  ;;  %v2008_v10 = vmax.f32 %v2000_v7, %v2007_v52 }
 0x7ca   :  { %8710 = vst [vmem:[#allocation24_spill] sm:$0xff] %v6986_v5  ;;  %v6994_v15 = vadd.f32 1e-07, %v1906_v39  ;;  %v7004_v56 = vmul.f32 %v6902_v22, %v6986_v5 }
 0x7cb   :  { %8711 = vst [vmem:[#allocation23_spill] sm:$0xff] %v6988_v62  ;;  %v7000_v41 = vadd.f32 1e-07, %v1904_v18  ;;  %v7008_v27 = vmul.f32 %v6902_v22, %v6988_v62 }
 0x7cc   :  { %8712 = vst [vmem:[#allocation25_spill] sm:$0xff] %v6994_v15  ;;  %8714 = vst [vmem:[#allocation6_spill] sm:$0xff] %v7004_v56  ;;  %v7014_v63 = vmul.f32 %v6902_v22, %v6994_v15  ;;  %v2013_v39 = vsel %vm819_vm2, %v7004_v56, -inf }
 0x7cd   :  { %8713 = vst [vmem:[#allocation5_spill] sm:$0xff] %v7000_v41  ;;  %v5349_v49 = vpop.f32.mrb[56].mxu1  ;;  %v7020_v46 = vmul.f32 %v6902_v22, %v7000_v41 }
 0x7ce   :  { %8715 = vst [vmem:[#allocation8_spill] sm:$0xff] %v7014_v63  ;;  %v1909_v26 = vmax.f32 %v5349_v49, 0.0  ;;  %v1828_v29 = vpop.f32.mrb[57].mxu1  ;;  %v2009_v49 = vsel %vm819_vm2, %v7008_v27, -inf  ;;  %v2015_v21 = vsel %vm819_vm2, %v7014_v63, -inf }
 0x7cf   :  { %v1907_v28 = vmax.f32 %v1828_v29, 0.0  ;;  %v5350_v51 = vpop.f32.mrb[58].mxu1  ;;  %v2011_v17 = vsel %vm819_vm2, %v7020_v46, -inf }
 0x7d0   :  { %v7024_v43 = vadd.f32 1e-07, %v1909_v26  ;;  %v1910_v18 = vmax.f32 %v5350_v51, 0.0  ;;  %v1831_v38 = vpop.f32.mrb[59].mxu1  ;;  %v2014_v26 = vmax.f32 %v2006_v45, %v2013_v39  ;;  %v2016_v51 = vmax.f32 %v2008_v10, %v2015_v21 }
 0x7d1   :  { %v7028_v37 = vadd.f32 1e-07, %v1907_v28  ;;  %v1908_v36 = vmax.f32 %v1831_v38, 0.0  ;;  %v2010_v38 = vmax.f32 %v2002_v59, %v2009_v49 }
 0x7d2   :  { %v7034_v29 = vmul.f32 %v6902_v22, %v7024_v43  ;;  %v7036_v24 = vadd.f32 1e-07, %v1910_v18 }
 0x7d3   :  { %v7042_v61 = vmul.f32 %v6902_v22, %v7028_v37  ;;  %v7044_v28 = vadd.f32 1e-07, %v1908_v36  ;;  %v2012_v36 = vmax.f32 %v2004_v33, %v2011_v17 }
 0x7d4   :  { %8716 = vst [vmem:[#allocation10_spill] sm:$0xff] %v7036_v24  ;;  %v2021_v7 = vsel %vm819_vm2, %v7034_v29, -inf  ;;  %v7050_v52 = vmul.f32 %v6902_v22, %v7036_v24 }
 0x7d5   :  { %v2022_v18 = vmax.f32 %v2014_v26, %v2021_v7  ;;  %v2017_v45 = vsel %vm819_vm2, %v7042_v61, -inf  ;;  %v7056_v39 = vmul.f32 %v6902_v22, %v7044_v28  ;;  %v5353_v50 = vpop.f32.mrb[60].mxu1 }
 0x7d6   :  { %v2018_v60 = vmax.f32 %v2010_v38, %v2017_v45  ;;  %v2023_v59 = vsel %vm819_vm2, %v7050_v52, -inf  ;;  %v1913_v49 = vmax.f32 %v5353_v50, 0.0  ;;  %v1844_v19 = vpop.f32.mrb[61].mxu1 }
 0x7d7   :  { %v2024_v48 = vmax.f32 %v2016_v51, %v2023_v59  ;;  %v2019_v21 = vsel %vm819_vm2, %v7056_v39, -inf  ;;  %v1911_v10 = vmax.f32 %v1844_v19, 0.0  ;;  %v5354_v26 = vpop.f32.mrb[62].mxu1 }
 0x7d8   :  { %v2020_v7 = vmax.f32 %v2012_v36, %v2019_v21  ;;  %v7062_v58 = vadd.f32 1e-07, %v1913_v49  ;;  %v1914_v4 = vmax.f32 %v5354_v26, 0.0  ;;  %v1847_v3 = vpop.f32.mrb[63].mxu1 }
 0x7d9   :  { %v7064_v2 = vadd.f32 1e-07, %v1911_v10  ;;  %v1912_v33 = vmax.f32 %v1847_v3, 0.0 }
 0x7da   :  { %8717 = vst [vmem:[#allocation7_spill] sm:$0xff] %v7062_v58  ;;  %v7068_v17 = vmul.f32 %v6902_v22, %v7062_v58  ;;  %v7070_v50 = vadd.f32 1e-07, %v1914_v4 }
 0x7db   :  { %8718 = vst [vmem:[#allocation9_spill] sm:$0xff] %v7064_v2  ;;  %v7074_v38 = vmul.f32 %v6902_v22, %v7064_v2  ;;  %v7076_v19 = vadd.f32 1e-07, %v1912_v33 }
 0x7dc   :  { %8719 = vst [vmem:[#allocation14_spill] sm:$0xff] %v7070_v50  ;;  %v2029_v51 = vsel %vm819_vm2, %v7068_v17, -inf  ;;  %v7082_v45 = vmul.f32 %v6902_v22, %v7070_v50 }
 0x7dd   :  { %8720 = vst [vmem:[#allocation26_spill] sm:$0xff] %v7076_v19  ;;  %v2030_v3 = vmax.f32 %v2022_v18, %v2029_v51  ;;  %v2025_v36 = vsel %vm819_vm2, %v7074_v38, -inf  ;;  %v7088_v4 = vmul.f32 %v6902_v22, %v7076_v19  ;;  %v5357_v59 = vpop.f32.mrb[64].mxu1 }
 0x7de   :  { %v2026_v49 = vmax.f32 %v2018_v60, %v2025_v36  ;;  %v2031_v21 = vsel %vm819_vm2, %v7082_v45, -inf  ;;  %v1917_v10 = vmax.f32 %v5357_v59, 0.0  ;;  %v1860_v26 = vpop.f32.mrb[65].mxu1 }
 0x7df   :  { %v2032_v33 = vmax.f32 %v2024_v48, %v2031_v21  ;;  %v2027_v8 = vsel %vm819_vm2, %v7088_v4, -inf  ;;  %v1915_v54 = vmax.f32 %v1860_v26, 0.0  ;;  %v5358_v18 = vpop.f32.mrb[66].mxu1 }
 0x7e0   :  { %v2028_v51 = vmax.f32 %v2020_v7, %v2027_v8  ;;  %v7094_v15 = vadd.f32 1e-07, %v1917_v10  ;;  %v1918_v5 = vmax.f32 %v5358_v18, 0.0  ;;  %v1863_v41 = vpop.f32.mrb[67].mxu1 }
 0x7e1   :  { %v7096_v62 = vadd.f32 1e-07, %v1915_v54  ;;  %v1916_v11 = vmax.f32 %v1863_v41, 0.0 }
 0x7e2   :  { %8721 = vst [vmem:[#allocation27_spill] sm:$0xff] %v7094_v15  ;;  %v7100_v60 = vmul.f32 %v6902_v22, %v7094_v15  ;;  %v7102_v36 = vadd.f32 1e-07, %v1918_v5 }
 0x7e3   :  { %8722 = vst [vmem:[#allocation28_spill] sm:$0xff] %v7096_v62  ;;  %v7106_v48 = vmul.f32 %v6902_v22, %v7096_v62  ;;  %v7108_v59 = vadd.f32 1e-07, %v1916_v11 }
 0x7e4   :  { %8723 = vst [vmem:[#allocation29_spill] sm:$0xff] %v7102_v36  ;;  %v2037_v8 = vsel %vm819_vm2, %v7100_v60, -inf  ;;  %v7114_v54 = vmul.f32 %v6902_v22, %v7102_v36 }
 0x7e5   :  { %8724 = vst [vmem:[#allocation30_spill] sm:$0xff] %v7108_v59  ;;  %v2038_v41 = vmax.f32 %v2030_v3, %v2037_v8  ;;  %v2033_v7 = vsel %vm819_vm2, %v7106_v48, -inf  ;;  %v7120_v5 = vmul.f32 %v6902_v22, %v7108_v59  ;;  %v5361_v21 = vpop.f32.mrb[68].mxu1 }
 0x7e6   :  { %v2034_v10 = vmax.f32 %v2026_v49, %v2033_v7  ;;  %v2039_v11 = vsel %vm819_vm2, %v7114_v54, -inf  ;;  %v1921_v26 = vmax.f32 %v5361_v21, 0.0  ;;  %v1876_v18 = vpop.f32.mrb[69].mxu1 }
 0x7e7   :  { %v2040_v6 = vmax.f32 %v2032_v33, %v2039_v11  ;;  %v2035_v36 = vsel %vm819_vm2, %v7120_v5, -inf  ;;  %v1919_v15 = vmax.f32 %v1876_v18, 0.0  ;;  %v5362_v3 = vpop.f32.mrb[70].mxu1 }
 0x7e8   :  { %v2036_v8 = vmax.f32 %v2028_v51, %v2035_v36  ;;  %v7126_v62 = vadd.f32 1e-07, %v1921_v26  ;;  %v1922_v50 = vmax.f32 %v5362_v3, 0.0  ;;  %v1879_v58 = vpop.f32.mrb[71].mxu1 }
 0x7e9   :  { %v7128_v59 = vadd.f32 1e-07, %v1919_v15  ;;  %v1920_v19 = vmax.f32 %v1879_v58, 0.0 }
 0x7ea   :  { %8725 = vst [vmem:[#allocation31_spill] sm:$0xff] %v7126_v62  ;;  %v7132_v49 = vmul.f32 %v6902_v22, %v7126_v62  ;;  %v7134_v7 = vadd.f32 1e-07, %v1922_v50 }
 0x7eb   :  { %8726 = vst [vmem:[#allocation32_spill] sm:$0xff] %v7128_v59  ;;  %v7138_v33 = vmul.f32 %v6902_v22, %v7128_v59  ;;  %v7140_v21 = vadd.f32 1e-07, %v1920_v19 }
 0x7ec   :  { %8727 = vst [vmem:[#allocation33_spill] sm:$0xff] %v7134_v7  ;;  %v2045_v51 = vsel %vm819_vm2, %v7132_v49, -inf  ;;  %v7146_v15 = vmul.f32 %v6902_v22, %v7134_v7 }
 0x7ed   :  { %v2046_v58 = vmax.f32 %v2038_v41, %v2045_v51  ;;  %v2041_v36 = vsel %vm819_vm2, %v7138_v33, -inf  ;;  %v1986_v50 = vmul.f32 %v6902_v22, %v7140_v21 }
 0x7ee   :  { %v2042_v11 = vmax.f32 %v2034_v10, %v2041_v36  ;;  %v2047_v26 = vsel %vm819_vm2, %v7146_v15, -inf }
 0x7ef   :  { %v2048_v19 = vmax.f32 %v2040_v6, %v2047_v26  ;;  %v2043_v18 = vsel %vm819_vm2, %v1986_v50, -inf }
 0x7f0   :  { %v2044_v3 = vmax.f32 %v2036_v8, %v2043_v18 }
 0x7f1   :  { %v2050_v62 = vmax.f32 %v2046_v58, %v2048_v19 }
 0x7f2   :  { %v2049_v59 = vmax.f32 %v2042_v11, %v2044_v3 }
 0x7f4   :  { %v2051_v63 = vmax.f32 %v2049_v59, %v2050_v62 }
 0x7f6   :  { %v2052_v7 = vrot.slane %v2051_v63, 4 }
 0x7f8   :  { %v2053_v2 = vmax.f32 %v2051_v63, %v2052_v7 }
 0x7fa   :  { %v2054_v41 = vrot.slane %v2053_v2, 2 }
 0x7fc   :  { %v2055_v51 = vmax.f32 %v2053_v2, %v2054_v41 }
 0x7fe   :  { %v2056_v56 = vrot.slane %v2055_v51, 1 }
 0x800   :  { %v7155_v24 = vmax.f32 %v2055_v51, %v2056_v56 }
 0x802   :  { %v2087_v22 = vsub.f32 %v1986_v50, %v7155_v24  ;;  %v2058_v10 = vsub.f32 %v6918_v44, %v7155_v24  ;;  %v2059_v6 = vsub.f32 %v6934_v20, %v7155_v24  ;;  %v2060_v8 = vsub.f32 %v6912_v34, %v7155_v24 }
 0x803   :  { %v2061_v62 = vsub.f32 %v6924_v13, %v7155_v24  ;;  %v2062_v2 = vsub.f32 %v6938_v47, %v7155_v24  ;;  %v2063_v56 = vsub.f32 %v6956_v42, %v7155_v24  ;;  %v2064_v63 = vsub.f32 %v6928_v25, %v7155_v24 }
 0x804   :  { %v2148_v59 = vmul.f32 1.442695, %v2087_v22  ;;  %v2065_v44 = vsub.f32 %v6948_v14, %v7155_v24  ;;  %v2066_v20 = vsub.f32 %v6970_v53, %v7155_v24  ;;  %v2067_v34 = vsub.f32 %v6978_v9, %v7155_v24 }
 0x805   :  { %v2074_v13 = vsub.f32 %v7042_v61, %v7155_v24  ;;  %v2075_v47 = vsub.f32 %v7056_v39, %v7155_v24  ;;  %v2076_v25 = vsub.f32 %v7034_v29, %v7155_v24  ;;  %v2077_v42 = vsub.f32 %v7050_v52, %v7155_v24 }
 0x806   :  { %5698 = vpow2.f32 %v2148_v59  ;;  %v2078_v14 = vsub.f32 %v7074_v38, %v7155_v24  ;;  %v2079_v53 = vsub.f32 %v7088_v4, %v7155_v24  ;;  %v2080_v9 = vsub.f32 %v7068_v17, %v7155_v24 }
 0x807   :  { %v2081_v61 = vsub.f32 %v7082_v45, %v7155_v24  ;;  %v2082_v39 = vsub.f32 %v7106_v48, %v7155_v24  ;;  %v2083_v29 = vsub.f32 %v7120_v5, %v7155_v24  ;;  %v2084_v52 = vsub.f32 %v7100_v60, %v7155_v24 }
 0x808   :  { %v2085_v38 = vsub.f32 %v7114_v54, %v7155_v24  ;;  %v2086_v4 = vsub.f32 %v7138_v33, %v7155_v24  ;;  %v2088_v17 = vsub.f32 %v7132_v49, %v7155_v24  ;;  %v2089_v7 = vsub.f32 %v7146_v15, %v7155_v24 }
 0x809   :  { %v2090_v58 = vmul.f32 1.442695, %v2058_v10  ;;  %v2092_v36 = vmul.f32 1.442695, %v2059_v6  ;;  %v2094_v50 = vmul.f32 1.442695, %v2060_v8  ;;  %v2068_v5 = vsub.f32 %v6992_v16, %v7155_v24 }
 0x80a   :  { %v2096_v11 = vmul.f32 1.442695, %v2061_v62  ;;  %v2098_v26 = vmul.f32 1.442695, %v2062_v2  ;;  %v2100_v19 = vmul.f32 1.442695, %v2063_v56  ;;  %v2069_v60 = vsub.f32 %v6998_v1, %v7155_v24 }
 0x80b   :  { %5700 = vpow2.f32 %v2090_v58  ;;  %v2102_v18 = vmul.f32 1.442695, %v2064_v63  ;;  %v2104_v3 = vmul.f32 1.442695, %v2065_v44  ;;  %v2106_v51 = vmul.f32 1.442695, %v2066_v20 }
 0x80c   :  { %5702 = vpow2.f32 %v2092_v36  ;;  %v2108_v10 = vmul.f32 1.442695, %v2067_v34  ;;  %v2122_v56 = vmul.f32 1.442695, %v2074_v13  ;;  %v2124_v44 = vmul.f32 1.442695, %v2075_v47 }
 0x80d   :  { %5704 = vpow2.f32 %v2094_v50  ;;  %v2128_v47 = vmul.f32 1.442695, %v2077_v42  ;;  %v2130_v50 = vmul.f32 1.442695, %v2078_v14  ;;  %v2132_v42 = vmul.f32 1.442695, %v2079_v53 }
 0x80e   :  { %5706 = vpow2.f32 %v2096_v11  ;;  %v2134_v14 = vmul.f32 1.442695, %v2080_v9  ;;  %v2138_v53 = vmul.f32 1.442695, %v2082_v39  ;;  %v2140_v48 = vmul.f32 1.442695, %v2083_v29 }
 0x80f   :  { %5708 = vpow2.f32 %v2098_v26  ;;  %v2146_v39 = vmul.f32 1.442695, %v2086_v4  ;;  %v2150_v29 = vmul.f32 1.442695, %v2088_v17  ;;  %v2152_v54 = vmul.f32 1.442695, %v2089_v7 }
 0x810   :  { %v7208_v41 = vpop.eup %5698  ;;  %5710 = vpow2.f32 %v2100_v19  ;;  %v2070_v16 = vsub.f32 %v7008_v27, %v7155_v24  ;;  %v2071_v49 = vsub.f32 %v7020_v46, %v7155_v24  ;;  %v2110_v7 = vmul.f32 1.442695, %v2068_v5 }
 0x811   :  { %v7212_v22 = vmul.f32 %v7208_v41, %v7140_v21  ;;  %5712 = vpow2.f32 %v2102_v18  ;;  %v2112_v27 = vmul.f32 1.442695, %v2069_v60 }
 0x812   :  { %5714 = vpow2.f32 %v2104_v3 }
 0x813   :  { %5716 = vpow2.f32 %v2106_v51 }
 0x814   :  { %5718 = vpow2.f32 %v2108_v10 }
 0x815   :  { %v7214_v6 = vpop.eup %5700  ;;  %5720 = vpow2.f32 %v2122_v56 }
 0x816   :  { %v7216_v8 = vpop.eup %5702  ;;  %v7220_v62 = vmul.f32 %v7214_v6, %v6904_v0  ;;  %v2126_v0 = vmul.f32 1.442695, %v2076_v25  ;;  %5722 = vpow2.f32 %v2124_v44 }
 0x817   :  { %v7222_v2 = vpop.eup %5704  ;;  %v7226_v21 = vmul.f32 %v7216_v8, %v6908_v35  ;;  %v2267_v63 = vpack.c.bf16 %v7216_v8, %v7214_v6  ;;  %v5946_v6 = vld [vmem:[%s6210_s29 + $0x24] ss:$8 sps:$4 sm:$0xff]   ;;  %v5947_v8 = vld [vmem:[%s6210_s29 + $0x20] ss:$8 sps:$4 sm:$0xff]  }
 0x818   :  { %v7230_v59 = vpop.eup %5706  ;;  %v7234_v20 = vmul.f32 %v7222_v2, %v6900_v23  ;;  %5724 = vpow2.f32 %v2126_v0  ;;  %v8728_v0 = vld [vmem:[#allocation10_spill] sm:$0xff] }
 0x819   :  { %v7236_v34 = vpop.eup %5708  ;;  %v7240_v13 = vmul.f32 %v7230_v59, %v6906_v57  ;;  %v2186_v35 = vpack.c.bf16 %v7226_v21, %v7220_v62  ;;  %v2268_v58 = vpack.c.bf16 %v7230_v59, %v7222_v2  ;;  %5726 = vpow2.f32 %v2128_v47  ;;  %v8736_v62 = vld [vmem:[#allocation30_spill] sm:$0xff]  ;;  %v5948_v2 = vld [vmem:[%s6210_s29 + $0x34] ss:$8 sps:$4 sm:$0xff]  }
 0x81a   :  { %v7246_v36 = vpop.eup %5710  ;;  %v7250_v23 = vmul.f32 %v7236_v34, %v6920_v55  ;;  %5728 = vpow2.f32 %v2130_v50 }
 0x81b   :  { %v7252_v11 = vpop.eup %5712  ;;  %v7256_v57 = vmul.f32 %v7246_v36, %v6940_v40  ;;  %v2187_v25 = vpack.c.bf16 %v7240_v13, %v7234_v20  ;;  %v2269_v26 = vpack.c.bf16 %v7246_v36, %v7236_v34  ;;  %5730 = vpow2.f32 %v2132_v42  ;;  %v8729_v42 = vld [vmem:[#allocation6_spill] sm:$0xff]  ;;  %v5949_v34 = vld [vmem:[%s6210_s29 + $0x30] ss:$8 sps:$4 sm:$0xff]  }
 0x81c   :  { %v7262_v19 = vpop.eup %5714  ;;  %v7266_v55 = vmul.f32 %v7252_v11, %v6914_v32  ;;  %v2136_v32 = vmul.f32 1.442695, %v2081_v61  ;;  %5732 = vpow2.f32 %v2134_v14  ;;  %v2144_v61 = vmul.f32 1.442695, %v2085_v38 }
 0x81d   :  { %v7268_v18 = vpop.eup %5716  ;;  %v7272_v40 = vmul.f32 %v7262_v19, %v6930_v12  ;;  %v2188_v3 = vpack.c.bf16 %v7256_v57, %v7250_v23  ;;  %v2270_v51 = vpack.c.bf16 %v7262_v19, %v7252_v11  ;;  %v2072_v14 = vsub.f32 %v8729_v42, %v7155_v24  ;;  %v8743_v23 = vld [vmem:[#allocation21_spill] sm:$0xff]  ;;  %v5583_v19 = vld [vmem:[%s4672_s20 + $0x8] sm:$0xff]  }
 0x81e   :  { %v7278_v10 = vpop.eup %5718  ;;  %v7288_v12 = vmul.f32 %v7268_v18, %v6966_v31  ;;  %v2142_v31 = vmul.f32 1.442695, %v2084_v52  ;;  %5734 = vpow2.f32 %v2136_v32  ;;  %v8730_v32 = vld [vmem:[#allocation9_spill] sm:$0xff] }
 0x81f   :  { %v7292_v9 = vmul.f32 %v7278_v10, %v6972_v30  ;;  %v2189_v56 = vpack.c.bf16 %v7272_v40, %v7266_v55  ;;  %v2271_v45 = vpack.c.bf16 %v7278_v10, %v7268_v18  ;;  %5736 = vpow2.f32 %v2138_v53  ;;  %v7319_v52 = vpop.eup %5720  ;;  %v5951_v11 = vld [vmem:[%s6052_s13] sm:$0xff]  }
 0x820   :  { %5738 = vpow2.f32 %v2140_v48  ;;  %v7324_v33 = vpop.eup %5722  ;;  %v2170_v1 = vmul.f32 %v7319_v52, %v7028_v37 }
 0x821   :  { %v2190_v30 = vpack.c.bf16 %v7292_v9, %v7288_v12  ;;  %5740 = vpow2.f32 %v2142_v31  ;;  %v2171_v4 = vmul.f32 %v7324_v33, %v7044_v28  ;;  %v2275_v15 = vpack.c.bf16 %v7324_v33, %v7319_v52  ;;  %v5943_v9 = vld [vmem:[%s6210_s29] ss:$8 sps:$4 sm:$0xff]   ;;  %v5945_v52 = vld [vmem:[%s6210_s29 + $0x10] ss:$8 sps:$4 sm:$0xff]  }
 0x822   :  { %5742 = vpow2.f32 %v2144_v61  ;;  %v7330_v38 = vpop.eup %5724  ;;  %v8732_v61 = vld [vmem:[#allocation26_spill] sm:$0xff] }
 0x823   :  { %5744 = vpow2.f32 %v2146_v39  ;;  %v7338_v17 = vpop.eup %5726  ;;  %v2172_v37 = vmul.f32 %v7330_v38, %v7024_v43  ;;  %v2194_v47 = vpack.c.bf16 %v2171_v4, %v2170_v1  ;;  %v8731_v43 = vld [vmem:[#allocation8_spill] sm:$0xff]  ;;  %v2116_v1 = vmul.f32 1.442695, %v2071_v49  ;;  %v8733_v4 = vld [vmem:[#allocation7_spill] sm:$0xff] }
 0x824   :  { %5746 = vpow2.f32 %v2150_v29  ;;  %v7342_v44 = vpop.eup %5728  ;;  %v2173_v46 = vmul.f32 %v7338_v17, %v8728_v0  ;;  %v2276_v28 = vpack.c.bf16 %v7338_v17, %v7330_v38  ;;  %v2073_v31 = vsub.f32 %v8731_v43, %v7155_v24  ;;  %v8735_v49 = vld [vmem:[#allocation28_spill] sm:$0xff] }
 0x825   :  { %5748 = vpow2.f32 %v2152_v54  ;;  %v7348_v50 = vpop.eup %5730  ;;  %v2174_v53 = vmul.f32 %v7342_v44, %v8730_v32  ;;  %5009 = vmatprep.subr.bf16.mxu0 %v2194_v47  ;;  %v2114_v54 = vmul.f32 1.442695, %v2070_v16  ;;  %v8734_v47 = vld [vmem:[#allocation14_spill] sm:$0xff] }
 0x826   :  { %v7354_v48 = vpop.eup %5732  ;;  %v2175_v39 = vmul.f32 %v7348_v50, %v8732_v61  ;;  %v2195_v5 = vpack.c.bf16 %v2173_v46, %v2172_v37  ;;  %v2277_v60 = vpack.c.bf16 %v7348_v50, %v7342_v44  ;;  %5750 = vpow2.f32 %v2110_v7  ;;  %5010 = vmatpush3.bf16.msra.mxu0 %v2186_v35 }
 0x827   :  { %v2176_v0 = vmul.f32 %v7354_v48, %v8733_v4  ;;  %5752 = vpow2.f32 %v2112_v27  ;;  %v2120_v61 = vmul.f32 1.442695, %v2073_v31  ;;  %v8739_v31 = vld [vmem:[#allocation32_spill] sm:$0xff] }
 0x828   :  { %v7362_v29 = vpop.eup %5734  ;;  %5011 = vmatprep.subr.bf16.mxu0 %v2195_v5  ;;  %v2196_v46 = vpack.c.bf16 %v2175_v39, %v2174_v53  ;;  %5754 = vpow2.f32 %v2114_v54  ;;  %v2118_v53 = vmul.f32 1.442695, %v2072_v14  ;;  %v8737_v39 = vld [vmem:[#allocation27_spill] sm:$0xff] }
 0x829   :  { %v7369_v24 = vpop.eup %5736  ;;  %v2177_v37 = vmul.f32 %v7362_v29, %v8734_v47  ;;  %v2278_v7 = vpack.c.bf16 %v7362_v29, %v7354_v48  ;;  %5756 = vpow2.f32 %v2116_v1  ;;  %v8738_v47 = vld [vmem:[#allocation29_spill] sm:$0xff] }
 0x82a   :  { %v7375_v16 = vpop.eup %5738  ;;  %v2178_v42 = vmul.f32 %v7369_v24, %v8735_v49  ;;  %5012 = vmatpush3.bf16.msra.mxu0 %v2187_v25  ;;  %v8740_v25 = vld [vmem:[#allocation31_spill] sm:$0xff]  ;;  %5758 = vpow2.f32 %v2118_v53 }
 0x82b   :  { %v7379_v32 = vpop.eup %5740  ;;  %v2179_v21 = vmul.f32 %v7375_v16, %v8736_v62  ;;  %v2197_v35 = vpack.c.bf16 %v2177_v37, %v2176_v0  ;;  %v2279_v27 = vpack.c.bf16 %v7375_v16, %v7369_v24  ;;  %5013 = vmatprep.subr.bf16.mxu0 %v2196_v46  ;;  %v8741_v46 = vld [vmem:[#allocation33_spill] sm:$0xff]  ;;  %5760 = vpow2.f32 %v2120_v61 }
 0x82c   :  { %v7385_v43 = vpop.eup %5742  ;;  %v2180_v5 = vmul.f32 %v7379_v32, %v8737_v39 }
 0x82d   :  { %v7392_v4 = vpop.eup %5744  ;;  %v2181_v0 = vmul.f32 %v7385_v43, %v8738_v47  ;;  %v2198_v37 = vpack.c.bf16 %v2179_v21, %v2178_v42  ;;  %v2280_v54 = vpack.c.bf16 %v7385_v43, %v7379_v32  ;;  %v8745_v47 = vld [vmem:[#allocation5_spill] sm:$0xff] }
 0x82e   :  { %v7398_v14 = vpop.eup %5746  ;;  %v2182_v49 = vmul.f32 %v7392_v4, %v8739_v31  ;;  %v2281_v20 = vpack.c.bf16 %v7208_v41, %v7392_v4  ;;  %5014 = vmatpush3.bf16.msra.mxu0 %v2188_v3 }
 0x82f   :  { %v7404_v13 = vpop.eup %5748  ;;  %v2184_v1 = vmul.f32 %v7398_v14, %v8740_v25  ;;  %v2199_v62 = vpack.c.bf16 %v2181_v0, %v2180_v5  ;;  %5015 = vmatprep.subr.bf16.mxu0 %v2197_v35  ;;  %v8742_v5 = vld [vmem:[#allocation19_spill] sm:$0xff] }
 0x830   :  { %v2185_v42 = vmul.f32 %v7404_v13, %v8741_v46  ;;  %v2200_v32 = vpack.c.bf16 %v7212_v22, %v2182_v49  ;;  %v2282_v21 = vpack.c.bf16 %v7404_v13, %v7398_v14  ;;  %v5751_v41 = vpop.eup %5750  ;;  %v8744_v35 = vld [vmem:[#allocation23_spill] sm:$0xff]  ;;  %v8747_v14 = vld [vmem:[#allocation25_spill] sm:$0xff] }
 0x831   :  { %v5753_v39 = vpop.eup %5752  ;;  %v2164_v4 = vmul.f32 %v5751_v41, %v8742_v5 }
 0x832   :  { %v2201_v43 = vpack.c.bf16 %v2185_v42, %v2184_v1  ;;  %5016 = vmatpush3.bf16.msra.mxu0 %v2189_v56  ;;  %v5755_v53 = vpop.eup %5754  ;;  %v2165_v57 = vmul.f32 %v5753_v39, %v8743_v23  ;;  %v8746_v56 = vld [vmem:[#allocation24_spill] sm:$0xff] }
 0x833   :  { %5017 = vmatprep.subr.bf16.mxu0 %v2198_v37  ;;  %v5757_v3 = vpop.eup %5756  ;;  %v2166_v61 = vmul.f32 %v5755_v53, %v8744_v35 }
 0x834   :  { %v5759_v22 = vpop.eup %5758  ;;  %v2167_v0 = vmul.f32 %v5757_v3, %v8745_v47  ;;  %v2191_v55 = vpack.c.bf16 %v2165_v57, %v2164_v4  ;;  %v2273_v59 = vpack.c.bf16 %v5757_v3, %v5755_v53 }
 0x835   :  { %v5761_v40 = vpop.eup %5760  ;;  %v2168_v37 = vmul.f32 %v5759_v22, %v8746_v56 }
 0x836   :  { %5018 = vmatpush3.bf16.msra.mxu0 %v2190_v30  ;;  %v2169_v31 = vmul.f32 %v5761_v40, %v8747_v14  ;;  %v2192_v49 = vpack.c.bf16 %v2167_v0, %v2166_v61  ;;  %v5944_v30 = vld [vmem:[%s6210_s29 + $0x14] ss:$8 sps:$4 sm:$0xff]   ;;  %v2274_v36 = vpack.c.bf16 %v5761_v40, %v5759_v22 }
 0x837   :  { %5019 = vmatprep.subr.bf16.mxu0 %v2199_v62 }
 0x838   :  { %v2193_v12 = vpack.c.bf16 %v2169_v31, %v2168_v37 }
 0x83a   :  { %5020 = vmatpush3.bf16.msra.mxu0 %v2191_v55 }
 0x83b   :  { %5021 = vmatprep.subr.bf16.mxu0 %v2200_v32 }
 0x83e   :  { %5022 = vmatpush3.bf16.msra.mxu0 %v2192_v49 }
 0x83f   :  { %5023 = vmatprep.subr.bf16.mxu0 %v2201_v43 }
 0x842   :  { %5024 = vmatpush3.bf16.msra.mxu0 %v2193_v12 }
 0x843   :  { %5049 = vmatprep.subr.bf16.mxu0 %v2275_v15 }
 0x845   :  { %2235 = vmatmul.mubr.bf16.vlgmr.msra.gmra.mrb[56].mxu0 %v5943_v9 }
 0x846   :  { %5050 = vmatpush3.bf16.msra.mxu0 %v2267_v63  ;;  %2242 = vmatprep.mubr.bf16.mxu0 %v5944_v30  ;;  %v2272_v63 = vpack.c.bf16 %v5753_v39, %v5751_v41 }
 0x847   :  { %5051 = vmatprep.subr.bf16.mxu0 %v2276_v28 }
 0x84a   :  { %5052 = vmatpush3.bf16.msra.mxu0 %v2268_v58  ;;  %v7466_v58 = vld [vmem:[%s6210_s29 + $0x4] ss:$8 sps:$4 sm:$0xff]  }
 0x84b   :  { %5053 = vmatprep.subr.bf16.mxu0 %v2277_v60 }
 0x84d   :  { %2243 = vmatmul.mubr.bf16.gmra.mrb[60].mxu0 %v5945_v52 }
 0x84e   :  { %5054 = vmatpush3.bf16.msra.mxu0 %v2269_v26  ;;  %2250 = vmatprep.mubr.bf16.mxu0 %v5946_v6  ;;  %v5582_v26 = vld [vmem:[%s4672_s20] sm:$0xff]   ;;  %s4667_s20 = sld [smem:[%s8561_s0 + %s5999_s17]]   ;;  %s6014_s17 = smov 41  }
 0x84f   :  { %5055 = vmatprep.subr.bf16.mxu0 %v2278_v7  ;;  %5363 = vmatprep.subr.bf16.mxu1 %v5582_v26 }
 0x850   :  { %5364 = vmatpush3.bf16.msra.mxu1 %v5582_v26 }
 0x851   :  { %5365 = vmatprep.subr.bf16.mxu1 %v5583_v19 }
 0x852   :  { %5056 = vmatpush3.bf16.msra.mxu0 %v2270_v51 }
 0x853   :  { %5057 = vmatprep.subr.bf16.mxu0 %v2279_v27 }
 0x854   :  { %5366 = vmatpush3.bf16.msra.mxu1 %v5583_v19 }
 0x855   :  { %2251 = vmatmul.mubr.bf16.gmra.mrb[64].mxu0 %v5947_v8 }
 0x856   :  { %5058 = vmatpush3.bf16.msra.mxu0 %v2271_v45  ;;  %2258 = vmatprep.mubr.bf16.mxu0 %v5948_v2 }
 0x857   :  { %5059 = vmatprep.subr.bf16.mxu0 %v2280_v54 }
 0x85a   :  { %5060 = vmatpush3.bf16.msra.mxu0 %v2272_v63 }
 0x85b   :  { %5061 = vmatprep.subr.bf16.mxu0 %v2281_v20 }
 0x85d   :  { %2259 = vmatmul.mubr.bf16.gmra.mrb[68].mxu0 %v5949_v34 }
 0x85e   :  { %5062 = vmatpush3.bf16.msra.mxu0 %v2273_v59  ;;  %2315 = vmatprep.mubr.bf16.mxu0 %v7466_v58 }
 0x85f   :  { %5063 = vmatprep.subr.bf16.mxu0 %v2282_v21 }
 0x862   :  { %5064 = vmatpush3.bf16.msra.mxu0 %v2274_v36 }
 0x865   :  { %2316 = vmatmul.mubr.bf16.vlgmr.msra.gmra.mrb[72].mxu0 %v5943_v9 }
 0x866   :  { %2323 = vmatprep.mubr.bf16.mxu0 %v5944_v30  ;;  %v8748_v30 = vld [vmem:[#allocation11_spill] sm:$0xff] }
 0x86d   :  { %2324 = vmatmul.mubr.bf16.gmra.mrb[76].mxu0 %v5945_v52  ;;  %v8749_v52 = vmax.f32 %v8748_v30, 0.0 }
 0x86e   :  { %2331 = vmatprep.mubr.bf16.mxu0 %v5946_v6 }
 0x875   :  { %2332 = vmatmul.mubr.bf16.gmra.mrb[80].mxu0 %v5947_v8  ;;  %v8750_v8 = vld [vmem:[#allocation16_spill] sm:$0xff] }
 0x876   :  { %2339 = vmatprep.mubr.bf16.mxu0 %v5948_v2  ;;  %v8751_v2 = vmax.f32 %v8750_v8, 0.0 }
 0x87d   :  { %2340 = vmatmul.mubr.bf16.gmra.mrb[84].mxu0 %v5949_v34 }
 0x87e   :  { %5399 = vmatprep.mubr.msk.bf16.mxu0 %vm511_vm1, %v5951_v11 }
 0x918   :  { %v5025_v18 = vpop.f32.mrb[56].mxu0 }
 0x919   :  { %v5026_v51 = vpop.f32.mrb[57].mxu0 }
 0x91a   :  { %v5027_v10 = vadd.f32 %v5026_v51, %v5025_v18  ;;  %v5028_v45 = vpop.f32.mrb[58].mxu0 }
 0x91b   :  { %v5029_v33 = vpop.f32.mrb[59].mxu0 }
 0x91c   :  { %v5030_v38 = vadd.f32 %v5029_v33, %v5028_v45 }
 0x920   :  { %v5031_v15 = vpop.f32.mrb[60].mxu0 }
 0x921   :  { %v5032_v17 = vpop.f32.mrb[61].mxu0 }
 0x922   :  { %v5033_v44 = vadd.f32 %v5032_v17, %v5031_v15  ;;  %v5034_v28 = vpop.f32.mrb[62].mxu0  ;;  %v8752_v17 = vld [vmem:[#allocation12_spill] sm:$0xff] }
 0x923   :  { %v5035_v50 = vpop.f32.mrb[63].mxu0 }
 0x924   :  { %v5036_v48 = vadd.f32 %v5035_v50, %v5034_v28  ;;  %v8753_v28 = vmax.f32 %v8752_v17, 0.0 }
 0x928   :  { %v5037_v60 = vpop.f32.mrb[64].mxu0 }
 0x929   :  { %v5038_v29 = vpop.f32.mrb[65].mxu0 }
 0x92a   :  { %v7474_v24 = vadd.f32 %v5038_v29, %v5037_v60  ;;  %v5040_v7 = vpop.f32.mrb[66].mxu0  ;;  %v8754_v60 = vld [vmem:[#allocation18_spill] sm:$0xff] }
 0x92b   :  { %v5041_v16 = vpop.f32.mrb[67].mxu0  ;;  %v8755_v29 = vmax.f32 %v8754_v60, 0.0 }
 0x92c   :  { %v7476_v27 = vadd.f32 %v5041_v16, %v5040_v7 }
 0x930   :  { %v5043_v54 = vpop.f32.mrb[68].mxu0 }
 0x931   :  { %v5044_v20 = vpop.f32.mrb[69].mxu0 }
 0x932   :  { %v7478_v13 = vadd.f32 %v5044_v20, %v5043_v54  ;;  %v5046_v25 = vpop.f32.mrb[70].mxu0 }
 0x933   :  { %v5047_v1 = vpop.f32.mrb[71].mxu0 }
 0x934   :  { %v7480_v62 = vadd.f32 %v5047_v1, %v5046_v25  ;;  %v8756_v1 = vld [vmem:[#allocation17_spill] sm:$0xff] }
 0x938   :  { %v5065_v46 = vpop.f32.mrb[72].mxu0 }
 0x939   :  { %v5066_v42 = vpop.f32.mrb[73].mxu0 }
 0x93a   :  { %v5067_v32 = vadd.f32 %v5066_v42, %v5065_v46  ;;  %v5068_v21 = vpop.f32.mrb[74].mxu0  ;;  %v8757_v46 = vmax.f32 %v8756_v1, 0.0 }
 0x93b   :  { %v5069_v41 = vpop.f32.mrb[75].mxu0 }
 0x93c   :  { %v2318_v43 = vadd.f32 1e-16, %v5067_v32  ;;  %v5070_v39 = vadd.f32 %v5069_v41, %v5068_v21  ;;  %v8758_v32 = vld [vmem:[#allocation15_spill] sm:$0xff] }
 0x93d   :  { %v8759_v21 = vmax.f32 %v8758_v32, 0.0 }
 0x93e   :  { %5762 = vrcp.f32 %v2318_v43  ;;  %v2321_v53 = vadd.f32 1e-16, %v5070_v39 }
 0x940   :  { %5764 = vrcp.f32 %v2321_v53  ;;  %v5071_v5 = vpop.f32.mrb[76].mxu0 }
 0x941   :  { %v5072_v4 = vpop.f32.mrb[77].mxu0 }
 0x942   :  { %v5073_v23 = vadd.f32 %v5072_v4, %v5071_v5  ;;  %v5074_v57 = vpop.f32.mrb[78].mxu0 }
 0x943   :  { %v5075_v3 = vpop.f32.mrb[79].mxu0 }
 0x944   :  { %v2326_v22 = vadd.f32 1e-16, %v5073_v23  ;;  %v5076_v35 = vadd.f32 %v5075_v3, %v5074_v57  ;;  %v8760_v23 = vld [vmem:[#allocation20_spill] sm:$0xff]  ;;  %v8762_v3 = vld [vmem:[#allocation22_spill] sm:$0xff] }
 0x946   :  { %5766 = vrcp.f32 %v2326_v22  ;;  %v2329_v61 = vadd.f32 1e-16, %v5076_v35 }
 0x948   :  { %v5763_v47 = vpop.eup %5762  ;;  %5768 = vrcp.f32 %v2329_v61  ;;  %v5077_v0 = vpop.f32.mrb[80].mxu0  ;;  %v4784_v61 = vld [vmem:[%s4668_s24] ss:$0 sm:$0xff]  ;;  %s4666_s24 = sld [smem:[%s8561_s0 + %s6000_s21]]   ;;  %s6015_s21 = smov 40  }
 0x949   :  { %v5078_v55 = vpop.f32.mrb[81].mxu0  ;;  %v2356_v40 = vmul.f32 %v5763_v47, %v5027_v10 }
 0x94a   :  { %v5765_v56 = vpop.eup %5764  ;;  %v5079_v37 = vadd.f32 %v5078_v55, %v5077_v0  ;;  %v5080_v14 = vpop.f32.mrb[82].mxu0 }
 0x94b   :  { %v5081_v31 = vpop.f32.mrb[83].mxu0  ;;  %v2357_v49 = vmul.f32 %v5765_v56, %v5030_v38  ;;  %v2364_v6 = vadd.f32 %v2356_v40, %v8749_v52 }
 0x94c   :  { %v2334_v12 = vadd.f32 1e-16, %v5079_v37  ;;  %v5082_v9 = vadd.f32 %v5081_v31, %v5080_v14 }
 0x94d   :  { %v2365_v63 = vadd.f32 %v2357_v49, %v8751_v2 }
 0x94e   :  { %5770 = vrcp.f32 %v2334_v12  ;;  %v2337_v59 = vadd.f32 1e-16, %v5082_v9 }
 0x94f   :  { %v2376_v34 = vpack.c.bf16 %v2365_v63, %v2364_v6 }
 0x950   :  { %v5767_v36 = vpop.eup %5766  ;;  %5772 = vrcp.f32 %v2337_v59  ;;  %v5083_v11 = vpop.f32.mrb[84].mxu0 }
 0x951   :  { %v2358_v26 = vmul.f32 %v5767_v36, %v5033_v44  ;;  %v5084_v19 = vpop.f32.mrb[85].mxu0  ;;  %5367 = vmatprep.mubr.msk.bf16.mxu1 %vm819_vm2, %v2376_v34 }
 0x952   :  { %v5769_v18 = vpop.eup %5768  ;;  %v5085_v51 = vadd.f32 %v5084_v19, %v5083_v11  ;;  %v5086_v10 = vpop.f32.mrb[86].mxu0 }
 0x953   :  { %v2359_v45 = vmul.f32 %v5769_v18, %v5036_v48  ;;  %v5087_v33 = vpop.f32.mrb[87].mxu0  ;;  %v2366_v50 = vadd.f32 %v2358_v26, %v8753_v28 }
 0x954   :  { %v2342_v38 = vadd.f32 1e-16, %v5085_v51  ;;  %v5088_v15 = vadd.f32 %v5087_v33, %v5086_v10 }
 0x955   :  { %v2367_v7 = vadd.f32 %v2359_v45, %v8755_v29 }
 0x956   :  { %5774 = vrcp.f32 %v2342_v38  ;;  %v2345_v16 = vadd.f32 1e-16, %v5088_v15 }
 0x957   :  { %v2377_v54 = vpack.c.bf16 %v2367_v7, %v2366_v50 }
 0x958   :  { %v5771_v44 = vpop.eup %5770  ;;  %5776 = vrcp.f32 %v2345_v16 }
 0x959   :  { %5368 = vmatmul.mubr.msk.bf16.vlgmr.msra.gmra.mrb[72].mxu1 %vm819_vm2, %v2377_v54  ;;  %v2360_v20 = vmul.f32 %v5771_v44, %v7474_v24  ;;  %v8761_v24 = vmax.f32 %v8760_v23, 0.0 }
 0x95a   :  { %v5773_v25 = vpop.eup %5772 }
 0x95b   :  { %v2361_v48 = vmul.f32 %v5773_v25, %v7476_v27  ;;  %v2368_v42 = vadd.f32 %v2360_v20, %v8757_v46  ;;  %v8763_v27 = vmax.f32 %v8762_v3, 0.0 }
 0x95d   :  { %v2369_v41 = vadd.f32 %v2361_v48, %v8759_v21 }
 0x95f   :  { %v2378_v43 = vpack.c.bf16 %v2369_v41, %v2368_v42 }
 0x960   :  { %v5775_v39 = vpop.eup %5774 }
 0x961   :  { %5371 = vmatprep.mubr.msk.bf16.mxu1 %vm819_vm2, %v2378_v43  ;;  %v2362_v53 = vmul.f32 %v5775_v39, %v7478_v13 }
 0x962   :  { %v5777_v5 = vpop.eup %5776 }
 0x963   :  { %v2363_v4 = vmul.f32 %v5777_v5, %v7480_v62  ;;  %v2370_v57 = vadd.f32 %v2362_v53, %v8761_v24 }
 0x965   :  { %v2371_v22 = vadd.f32 %v2363_v4, %v8763_v27 }
 0x967   :  { %v2379_v35 = vpack.c.bf16 %v2371_v22, %v2370_v57 }
 0x969   :  { %5372 = vmatmul.mubr.msk.bf16.gmra.mrb[76].mxu1 %vm819_vm2, %v2379_v35 }
 0xa2c   :  { %v5369_v47 = vpop.f32.mrb[72].mxu1 }
 0xa2d   :  { %v2445_v13 = vpop.f32.mrb[73].mxu1  ;;  %v2454_v40 = vadd.f32 %v5369_v47, %v4784_v61 }
 0xa2e   :  { %v2446_v0 = vadd.f32 %v4784_v61, %v2445_v13  ;;  %v5370_v55 = vpop.f32.mrb[74].mxu1  ;;  %v5584_v13 = vld [vmem:[%s4673_s28] sm:$0xff]  }
 0xa2f   :  { %v2448_v62 = vpop.f32.mrb[75].mxu1  ;;  %v2457_v14 = vadd.f32 %v5370_v55, %v4784_v61  ;;  %v2484_v49 = vsel %vm511_vm1, %v2454_v40, 0.0  ;;  %5375 = vmatprep.subr.bf16.mxu1 %v5584_v13  ;;  %v5586_v55 = vld [vmem:[%s4673_s28 + $0x10] sm:$0xff]  }
 0xa30   :  { %v2449_v56 = vadd.f32 %v4784_v61, %v2448_v62  ;;  %v2478_v37 = vsel %vm511_vm1, %v2446_v0, 0.0  ;;  %5376 = vmatpush3.bf16.msra.mxu1 %v5584_v13  ;;  %v5587_v62 = vld [vmem:[%s4673_s28 + $0x18] sm:$0xff]  }
 0xa31   :  { %2479 = vadd.xlane.f32.xlu0 %v2478_v37  ;;  %v2487_v12 = vsel %vm511_vm1, %v2457_v14, 0.0 }
 0xa32   :  { %v2481_v31 = vsel %vm511_vm1, %v2449_v56, 0.0 }
 0xa33   :  { %2482 = vadd.xlane.f32.xlu1 %v2481_v31 }
 0xa35   :  { %2485 = vadd.xlane.f32.xlu0 %v2484_v49 }
 0xa37   :  { %2488 = vadd.xlane.f32.xlu1 %v2487_v12 }
 0xa3c   :  { %v5373_v9 = vpop.f32.mrb[76].mxu1 }
 0xa3d   :  { %v2461_v30 = vpop.f32.mrb[77].mxu1  ;;  %v2470_v2 = vadd.f32 %v5373_v9, %v4784_v61 }
 0xa3e   :  { %v2462_v52 = vadd.f32 %v4784_v61, %v2461_v30  ;;  %v5374_v6 = vpop.f32.mrb[78].mxu1 }
 0xa3f   :  { %v2464_v8 = vpop.f32.mrb[79].mxu1  ;;  %v2473_v34 = vadd.f32 %v5374_v6, %v4784_v61  ;;  %v2496_v11 = vsel %vm511_vm1, %v2470_v2, 0.0 }
 0xa40   :  { %v2465_v63 = vadd.f32 %v4784_v61, %v2464_v8  ;;  %v2490_v59 = vsel %vm511_vm1, %v2462_v52, 0.0 }
 0xa41   :  { %2491 = vadd.xlane.f32.xlu0 %v2490_v59  ;;  %v2499_v26 = vsel %vm511_vm1, %v2473_v34, 0.0 }
 0xa42   :  { %v2493_v36 = vsel %vm511_vm1, %v2465_v63, 0.0 }
 0xa43   :  { %2494 = vadd.xlane.f32.xlu1 %v2493_v36 }
 0xa45   :  { %2497 = vadd.xlane.f32.xlu0 %v2496_v11  ;;  %v4792_v11 = vld [vmem:[%s4670_s7] ss:$0 sm:$0xff]  ;;  %s4676_s7 = sld [smem:[%s8561_s0 + %s6011_s4]]  }
 0xa47   :  { %2500 = vadd.xlane.f32.xlu1 %v2499_v26 }
 0xabe   :  { %v2480_v19 = vpop.xlane.xlu0 %2479 }
 0xabf   :  { %v2502_v18 = vmul.f32 0.015625, %v2480_v19 }
 0xac0   :  { %v2483_v51 = vpop.xlane.xlu1 %2482 }
 0xac1   :  { %v7517_v10 = vsub.f32 %v2446_v0, %v2502_v18  ;;  %v2503_v45 = vmul.f32 0.015625, %v2483_v51  ;;  %v5585_v0 = vld [vmem:[%s4673_s28 + $0x8] sm:$0xff]   ;;  %s4684_s28 = sld [smem:[%s8561_s0 + %s6001_s25]]   ;;  %s6016_s25 = smov 43  }
 0xac2   :  { %v2486_v33 = vpop.xlane.xlu0 %2485  ;;  %5377 = vmatprep.subr.bf16.mxu1 %v5585_v0 }
 0xac3   :  { %v7519_v38 = vsub.f32 %v2449_v56, %v2503_v45  ;;  %v2504_v15 = vmul.f32 0.015625, %v2486_v33  ;;  %v2518_v17 = vmul.f32 %v7517_v10, %v7517_v10  ;;  %5378 = vmatpush3.bf16.msra.mxu1 %v5585_v0 }
 0xac4   :  { %v2489_v28 = vpop.xlane.xlu1 %2488  ;;  %5379 = vmatprep.subr.bf16.mxu1 %v5586_v55 }
 0xac5   :  { %v7523_v50 = vsub.f32 %v2454_v40, %v2504_v15  ;;  %v2505_v60 = vmul.f32 0.015625, %v2489_v28  ;;  %v2526_v29 = vsel %vm511_vm1, %v2518_v17, 0.0  ;;  %v2519_v7 = vmul.f32 %v7519_v38, %v7519_v38 }
 0xac6   :  { %2527 = vadd.xlane.f32.xlu0 %v2526_v29 }
 0xac7   :  { %v7528_v16 = vsub.f32 %v2457_v14, %v2505_v60  ;;  %v2529_v54 = vsel %vm511_vm1, %v2519_v7, 0.0  ;;  %v2520_v44 = vmul.f32 %v7523_v50, %v7523_v50  ;;  %5380 = vmatpush3.bf16.msra.mxu1 %v5586_v55 }
 0xac8   :  { %2530 = vadd.xlane.f32.xlu1 %v2529_v54  ;;  %5381 = vmatprep.subr.bf16.mxu1 %v5587_v62 }
 0xac9   :  { %v2532_v20 = vsel %vm511_vm1, %v2520_v44, 0.0  ;;  %v2521_v25 = vmul.f32 %v7528_v16, %v7528_v16 }
 0xaca   :  { %2533 = vadd.xlane.f32.xlu0 %v2532_v20 }
 0xacb   :  { %v2535_v48 = vsel %vm511_vm1, %v2521_v25, 0.0  ;;  %5382 = vmatpush3.bf16.msra.mxu1 %v5587_v62 }
 0xacc   :  { %2536 = vadd.xlane.f32.xlu1 %v2535_v48 }
 0xace   :  { %v2492_v1 = vpop.xlane.xlu0 %2491 }
 0xacf   :  { %v2506_v46 = vmul.f32 0.015625, %v2492_v1 }
 0xad0   :  { %v2495_v42 = vpop.xlane.xlu1 %2494 }
 0xad1   :  { %v7537_v32 = vsub.f32 %v2462_v52, %v2506_v46  ;;  %v2507_v21 = vmul.f32 0.015625, %v2495_v42 }
 0xad2   :  { %v2498_v41 = vpop.xlane.xlu0 %2497 }
 0xad3   :  { %v7539_v43 = vsub.f32 %v2465_v63, %v2507_v21  ;;  %v2508_v39 = vmul.f32 0.015625, %v2498_v41  ;;  %v2522_v53 = vmul.f32 %v7537_v32, %v7537_v32  ;;  %v4791_v63 = vld [vmem:[%s4671_s3] ss:$0 sm:$0xff]  ;;  %s4677_s3 = sld [smem:[%s8561_s0 + %s6010_s1]]  }
 0xad4   :  { %v2501_v5 = vpop.xlane.xlu1 %2500 }
 0xad5   :  { %v7543_v4 = vsub.f32 %v2470_v2, %v2508_v39  ;;  %v2509_v23 = vmul.f32 0.015625, %v2501_v5  ;;  %v2538_v24 = vsel %vm511_vm1, %v2522_v53, 0.0  ;;  %v2523_v57 = vmul.f32 %v7539_v43, %v7539_v43 }
 0xad6   :  { %2539 = vadd.xlane.f32.xlu0 %v2538_v24 }
 0xad7   :  { %v7548_v3 = vsub.f32 %v2473_v34, %v2509_v23  ;;  %v2541_v27 = vsel %vm511_vm1, %v2523_v57, 0.0  ;;  %v2524_v22 = vmul.f32 %v7543_v4, %v7543_v4 }
 0xad8   :  { %2542 = vadd.xlane.f32.xlu1 %v2541_v27 }
 0xad9   :  { %v2544_v35 = vsel %vm511_vm1, %v2524_v22, 0.0  ;;  %v2525_v61 = vmul.f32 %v7548_v3, %v7548_v3 }
 0xada   :  { %2545 = vadd.xlane.f32.xlu0 %v2544_v35 }
 0xadb   :  { %v2547_v47 = vsel %vm511_vm1, %v2525_v61, 0.0 }
 0xadc   :  { %2548 = vadd.xlane.f32.xlu1 %v2547_v47 }
 0xb53   :  { %v2528_v40 = vpop.xlane.xlu0 %2527 }
 0xb54   :  { %v2550_v56 = vmul.f32 0.015625, %v2528_v40 }
 0xb55   :  { %v2531_v37 = vpop.xlane.xlu1 %2530 }
 0xb56   :  { %v2558_v14 = vadd.f32 1e-05, %v2550_v56  ;;  %v2551_v31 = vmul.f32 0.015625, %v2531_v37 }
 0xb57   :  { %v2534_v49 = vpop.xlane.xlu0 %2533 }
 0xb58   :  { %5778 = vrsqrt.f32 %v2558_v14  ;;  %v2559_v12 = vadd.f32 1e-05, %v2551_v31  ;;  %v2552_v9 = vmul.f32 0.015625, %v2534_v49 }
 0xb59   :  { %v2537_v30 = vpop.xlane.xlu1 %2536 }
 0xb5a   :  { %5780 = vrsqrt.f32 %v2559_v12  ;;  %v2560_v52 = vadd.f32 1e-05, %v2552_v9  ;;  %v2553_v6 = vmul.f32 0.015625, %v2537_v30 }
 0xb5c   :  { %5782 = vrsqrt.f32 %v2560_v52  ;;  %v2561_v8 = vadd.f32 1e-05, %v2553_v6 }
 0xb5e   :  { %5784 = vrsqrt.f32 %v2561_v8 }
 0xb62   :  { %v5779_v2 = vpop.eup %5778 }
 0xb63   :  { %v2574_v59 = vmul.f32 %v5779_v2, %v7517_v10  ;;  %v2540_v34 = vpop.xlane.xlu0 %2539 }
 0xb64   :  { %v5781_v36 = vpop.eup %5780  ;;  %v2554_v26 = vmul.f32 0.015625, %v2540_v34 }
 0xb65   :  { %v2575_v19 = vmul.f32 %v5781_v36, %v7519_v38  ;;  %v2543_v18 = vpop.xlane.xlu1 %2542  ;;  %v2588_v51 = vmul.f32 %v4791_v63, %v2574_v59 }
 0xb66   :  { %v5783_v45 = vpop.eup %5782  ;;  %v2562_v33 = vadd.f32 1e-05, %v2554_v26  ;;  %v2555_v15 = vmul.f32 0.015625, %v2543_v18 }
 0xb67   :  { %v2576_v17 = vmul.f32 %v5783_v45, %v7523_v50  ;;  %v2546_v28 = vpop.xlane.xlu0 %2545  ;;  %v2589_v60 = vmul.f32 %v4791_v63, %v2575_v19  ;;  %v2602_v29 = vadd.f32 %v4792_v11, %v2588_v51 }
 0xb68   :  { %v5785_v7 = vpop.eup %5784  ;;  %5786 = vrsqrt.f32 %v2562_v33  ;;  %v2563_v54 = vadd.f32 1e-05, %v2555_v15  ;;  %v2556_v10 = vmul.f32 0.015625, %v2546_v28 }
 0xb69   :  { %v2590_v44 = vmul.f32 %v4791_v63, %v2576_v17  ;;  %v2577_v20 = vmul.f32 %v5785_v7, %v7528_v16  ;;  %v2549_v25 = vpop.xlane.xlu1 %2548  ;;  %v2603_v48 = vadd.f32 %v4792_v11, %v2589_v60  ;;  %v2610_v21 = vmax.f32 %v2602_v29, 0.0 }
 0xb6a   :  { %5788 = vrsqrt.f32 %v2563_v54  ;;  %v2564_v38 = vadd.f32 1e-05, %v2556_v10  ;;  %v2557_v1 = vmul.f32 0.015625, %v2549_v25 }
 0xb6b   :  { %v2604_v46 = vadd.f32 %v4792_v11, %v2590_v44  ;;  %v2591_v42 = vmul.f32 %v4791_v63, %v2577_v20  ;;  %v2611_v41 = vmax.f32 %v2603_v48, 0.0 }
 0xb6c   :  { %5790 = vrsqrt.f32 %v2564_v38  ;;  %v2565_v50 = vadd.f32 1e-05, %v2557_v1 }
 0xb6d   :  { %v2605_v39 = vadd.f32 %v4792_v11, %v2591_v42  ;;  %v2626_v53 = vpack.c.bf16 %v2611_v41, %v2610_v21  ;;  %v2612_v5 = vmax.f32 %v2604_v46, 0.0 }
 0xb6e   :  { %5792 = vrsqrt.f32 %v2565_v50 }
 0xb6f   :  { %v2613_v23 = vmax.f32 %v2605_v39, 0.0  ;;  %5383 = vmatprep.mubr.msk.bf16.mxu1 %vm511_vm1, %v2626_v53  ;;  %v2740_v53 = vld [vmem:[%s4665_s16] sm:$0x1]  ;;  %s4693_s16 = sld [smem:[%s8561_s0 + %s6013_s12]]  }
 0xb71   :  { %v2627_v24 = vpack.c.bf16 %v2613_v23, %v2612_v5 }
 0xb72   :  { %v5787_v16 = vpop.eup %5786 }
 0xb73   :  { %v2578_v57 = vmul.f32 %v5787_v16, %v7537_v32  ;;  %5384 = vmatmul.mubr.msk.bf16.vlgmr.msra.gmra.mrb[80].mxu1 %vm511_vm1, %v2627_v24  ;;  %v8764_v24 = vld [vmem:[#allocation13_spill] sm:$0xff] }
 0xb74   :  { %v5789_v27 = vpop.eup %5788 }
 0xb75   :  { %v2579_v22 = vmul.f32 %v5789_v27, %v7539_v43  ;;  %v2592_v35 = vmul.f32 %v4791_v63, %v2578_v57 }
 0xb76   :  { %v5791_v61 = vpop.eup %5790 }
 0xb77   :  { %v2580_v47 = vmul.f32 %v5791_v61, %v7543_v4  ;;  %v2593_v13 = vmul.f32 %v4791_v63, %v2579_v22  ;;  %v2606_v0 = vadd.f32 %v4792_v11, %v2592_v35  ;;  %v4793_v4 = vld [vmem:[%s4669_s11] ss:$0 sm:$0xff]  ;;  %s4686_s11 = sld [smem:[%s8561_s0 + %s6012_s8]]  }
 0xb78   :  { %v5793_v55 = vpop.eup %5792 }
 0xb79   :  { %v2581_v62 = vmul.f32 %v5793_v55, %v7548_v3  ;;  %v2607_v40 = vadd.f32 %v4792_v11, %v2593_v13  ;;  %v2594_v56 = vmul.f32 %v4791_v63, %v2580_v47  ;;  %v2614_v37 = vmax.f32 %v2606_v0, 0.0 }
 0xb7b   :  { %v2615_v14 = vmax.f32 %v2607_v40, 0.0  ;;  %v2595_v31 = vmul.f32 %v4791_v63, %v2581_v62  ;;  %v2608_v32 = vadd.f32 %v4792_v11, %v2594_v56 }
 0xb7d   :  { %v2628_v49 = vpack.c.bf16 %v2615_v14, %v2614_v37  ;;  %v2609_v12 = vadd.f32 %v4792_v11, %v2595_v31  ;;  %v2616_v43 = vmax.f32 %v2608_v32, 0.0 }
 0xb7f   :  { %5387 = vmatprep.mubr.msk.bf16.mxu1 %vm511_vm1, %v2628_v49  ;;  %v2617_v9 = vmax.f32 %v2609_v12, 0.0 }
 0xb81   :  { %v2629_v30 = vpack.c.bf16 %v2617_v9, %v2616_v43 }
 0xb83   :  { %5388 = vmatmul.mubr.msk.bf16.gmra.mrb[84].mxu1 %vm511_vm1, %v2629_v30 }
 0xb84   :  { %3362 = vmatprep.mubr.bf16.mxu1 %v7466_v58 }
 0xc46   :  { %v5385_v3 = vpop.f32.mrb[80].mxu1 }
 0xc47   :  { %v2707_v52 = vpop.f32.mrb[81].mxu1  ;;  %v2716_v63 = vadd.f32 %v5385_v3, %v4793_v4 }
 0xc48   :  { %v2708_v6 = vadd.f32 %v4793_v4, %v2707_v52  ;;  %v5386_v8 = vpop.f32.mrb[82].mxu1 }
 0xc49   :  { %v2710_v2 = vpop.f32.mrb[83].mxu1  ;;  %v2719_v36 = vadd.f32 %v5386_v8, %v4793_v4  ;;  %v2744_v58 = vsel %vm819_vm2, %v2716_v63, 0.0 }
 0xc4a   :  { %v2711_v59 = vadd.f32 %v4793_v4, %v2710_v2  ;;  %v2741_v34 = vsel %vm819_vm2, %v2708_v6, 0.0 }
 0xc4b   :  { %v2746_v18 = vsel %vm819_vm2, %v2719_v36, 0.0 }
 0xc4c   :  { %v2742_v11 = vsel %vm819_vm2, %v2711_v59, 0.0 }
 0xc4d   :  { %v2743_v26 = vadd.f32 %v2742_v11, %v2741_v34 }
 0xc4f   :  { %v2745_v19 = vadd.f32 %v2744_v58, %v2743_v26 }
 0xc51   :  { %v2747_v51 = vadd.f32 %v2746_v18, %v2745_v19 }
 0xc56   :  { %v5389_v45 = vpop.f32.mrb[84].mxu1 }
 0xc57   :  { %v2723_v33 = vpop.f32.mrb[85].mxu1  ;;  %v2732_v60 = vadd.f32 %v5389_v45, %v4793_v4 }
 0xc58   :  { %v2724_v15 = vadd.f32 %v4793_v4, %v2723_v33  ;;  %v5390_v17 = vpop.f32.mrb[86].mxu1 }
 0xc59   :  { %v2726_v28 = vpop.f32.mrb[87].mxu1  ;;  %v2735_v10 = vadd.f32 %v5390_v17, %v4793_v4  ;;  %v2752_v25 = vsel %vm819_vm2, %v2732_v60, 0.0 }
 0xc5a   :  { %v2748_v29 = vsel %vm819_vm2, %v2724_v15, 0.0  ;;  %v2727_v7 = vadd.f32 %v4793_v4, %v2726_v28 }
 0xc5b   :  { %v2749_v54 = vadd.f32 %v2748_v29, %v2747_v51  ;;  %v2754_v38 = vsel %vm819_vm2, %v2735_v10, 0.0 }
 0xc5c   :  { %v2750_v44 = vsel %vm819_vm2, %v2727_v7, 0.0 }
 0xc5d   :  { %v2751_v20 = vadd.f32 %v2750_v44, %v2749_v54  ;;  %v4803_v54 = vld [vmem:[%s4666_s24] ss:$0 sm:$0xff]  ;;  %s4687_s24 = sld [smem:[%s8561_s0 + %s6015_s21]]  }
 0xc5f   :  { %v2753_v48 = vadd.f32 %v2752_v25, %v2751_v20 }
 0xc61   :  { %v2755_v1 = vadd.f32 %v2754_v38, %v2753_v48 }
 0xc63   :  { %v2756_v46 = vrot.slane %v2755_v1, 4 }
 0xc65   :  { %v2757_v42 = vadd.f32 %v2756_v46, %v2755_v1 }
 0xc67   :  { %v2758_v21 = vrot.slane %v2757_v42, 2 }
 0xc69   :  { %v2759_v41 = vadd.f32 %v2758_v21, %v2757_v42 }
 0xc6b   :  { %v2760_v50 = vrot.slane %v2759_v41, 1 }
 0xc6d   :  { %v2761_v39 = vadd.f32 %v2760_v50, %v2759_v41 }
 0xc6f   :  { %v2762_v5 = vmul.f32 0.015625, %v2761_v39 }
 0xc71   :  { %v2763_v23 = vmul.f32 %v2762_v5, %v2740_v53 }
 0xc73   :  { %v2768_v16 = vrot.slane %v2763_v23, %v8764_v24 }
 0xc75   :  { %v2770_v57 = vsub.f32 %v2708_v6, %v2768_v16  ;;  %v2771_v27 = vsub.f32 %v2711_v59, %v2768_v16  ;;  %v2772_v22 = vsub.f32 %v2716_v63, %v2768_v16  ;;  %v2773_v35 = vsub.f32 %v2719_v36, %v2768_v16 }
 0xc76   :  { %v2774_v61 = vsub.f32 %v2724_v15, %v2768_v16  ;;  %v2775_v47 = vsub.f32 %v2727_v7, %v2768_v16  ;;  %v2776_v13 = vsub.f32 %v2732_v60, %v2768_v16  ;;  %v2777_v0 = vsub.f32 %v2735_v10, %v2768_v16  ;;  %v4802_v15 = vld [vmem:[%s4667_s20] ss:$0 sm:$0xff]  ;;  %s4688_s20 = sld [smem:[%s8561_s0 + %s6014_s17]]  }
 0xc77   :  { %v2778_v55 = vmul.f32 %v2770_v57, %v2770_v57  ;;  %v2779_v62 = vmul.f32 %v2771_v27, %v2771_v27  ;;  %v2780_v40 = vmul.f32 %v2772_v22, %v2772_v22  ;;  %v2781_v56 = vmul.f32 %v2773_v35, %v2773_v35 }
 0xc78   :  { %v2782_v32 = vmul.f32 %v2774_v61, %v2774_v61  ;;  %v2783_v43 = vmul.f32 %v2775_v47, %v2775_v47  ;;  %v2784_v4 = vmul.f32 %v2776_v13, %v2776_v13  ;;  %v2785_v6 = vmul.f32 %v2777_v0, %v2777_v0 }
 0xc79   :  { %v2786_v37 = vsel %vm819_vm2, %v2778_v55, 0.0  ;;  %v2787_v14 = vsel %vm819_vm2, %v2779_v62, 0.0  ;;  %v2789_v49 = vsel %vm819_vm2, %v2780_v40, 0.0  ;;  %v2791_v9 = vsel %vm819_vm2, %v2781_v56, 0.0 }
 0xc7a   :  { %v2788_v31 = vadd.f32 %v2787_v14, %v2786_v37  ;;  %v2793_v3 = vsel %vm819_vm2, %v2782_v32, 0.0  ;;  %v2795_v8 = vsel %vm819_vm2, %v2783_v43, 0.0  ;;  %v2797_v63 = vsel %vm819_vm2, %v2784_v4, 0.0  ;;  %v5952_v32 = vld [vmem:[%s6052_s13 + $0x8] sm:$0xff]   ;;  %v5955_v43 = vld [vmem:[%s6052_s13 + $0x20] sm:$0xff]   ;;  %v5958_v4 = vld [vmem:[%s6052_s13 + $0x38] sm:$0xff]  }
 0xc7b   :  { %v2799_v34 = vsel %vm819_vm2, %v2785_v6, 0.0  ;;  %v2819_v17 = vmul.f32 %v4802_v15, %v2775_v47  ;;  %v2814_v28 = vmul.f32 %v4802_v15, %v2770_v57  ;;  %v2815_v60 = vmul.f32 %v4802_v15, %v2771_v27  ;;  %v5961_v6 = vld [vmem:[%s6052_s13 + $0x50] sm:$0xff]  }
 0xc7c   :  { %v2790_v12 = vadd.f32 %v2789_v49, %v2788_v31  ;;  %v2816_v29 = vmul.f32 %v4802_v15, %v2772_v22  ;;  %v2817_v10 = vmul.f32 %v4802_v15, %v2773_v35  ;;  %v2818_v44 = vmul.f32 %v4802_v15, %v2774_v61  ;;  %v5953_v49 = vld [vmem:[%s6052_s13 + $0x10] sm:$0xff]  }
 0xc7d   :  { %v2820_v20 = vmul.f32 %v4802_v15, %v2776_v13  ;;  %v2821_v25 = vmul.f32 %v4802_v15, %v2777_v0  ;;  %v7683_v15 = vstv %s4684_s28  ;;  %s4690_s28 = sld [smem:[%s8561_s0 + %s6016_s25]]  }
 0xc7e   :  { %v2792_v30 = vadd.f32 %v2791_v9, %v2790_v12  ;;  %v5954_v12 = vld [vmem:[%s6052_s13 + $0x18] sm:$0xff]   ;;  %v5956_v9 = vld [vmem:[%s6052_s13 + $0x28] sm:$0xff]  }
 0xc80   :  { %v2794_v52 = vadd.f32 %v2793_v3, %v2792_v30  ;;  %v5957_v30 = vld [vmem:[%s6052_s13 + $0x30] sm:$0xff]   ;;  %v5959_v3 = vld [vmem:[%s6052_s13 + $0x40] sm:$0xff]  }
 0xc82   :  { %v2796_v2 = vadd.f32 %v2795_v8, %v2794_v52  ;;  %v5960_v52 = vld [vmem:[%s6052_s13 + $0x48] sm:$0xff]   ;;  %v5962_v8 = vld [vmem:[%s6052_s13 + $0x58] sm:$0xff]  }
 0xc84   :  { %v2798_v59 = vadd.f32 %v2797_v63, %v2796_v2  ;;  %v5963_v2 = vld [vmem:[%s6052_s13 + $0x60] sm:$0xff]   ;;  %v5964_v63 = vld [vmem:[%s6052_s13 + $0x68] sm:$0xff]  }
 0xc86   :  { %v2800_v36 = vadd.f32 %v2799_v34, %v2798_v59  ;;  %v5965_v59 = vld [vmem:[%s6052_s13 + $0x70] sm:$0xff]   ;;  %v5966_v34 = vld [vmem:[%s6052_s13 + $0x78] sm:$0xff]   ;;  %s6002_s13 = smov 35  }
 0xc87   :  { %s4682_s2 = sld [smem:[%s8561_s0 + %s6002_s13]]   ;;  %s6017_s13 = smov 47  }
 0xc88   :  { %v2801_v11 = vrot.slane %v2800_v36, 4 }
 0xc8a   :  { %v2802_v26 = vadd.f32 %v2801_v11, %v2800_v36 }
 0xc8c   :  { %v2803_v58 = vrot.slane %v2802_v26, 2 }
 0xc8e   :  { %v2804_v19 = vadd.f32 %v2803_v58, %v2802_v26 }
 0xc90   :  { %v2805_v18 = vrot.slane %v2804_v19, 1 }
 0xc92   :  { %v2806_v51 = vadd.f32 %v2805_v18, %v2804_v19 }
 0xc94   :  { %v2807_v45 = vmul.f32 0.015625, %v2806_v51 }
 0xc96   :  { %v2822_v33 = vadd.f32 1e-05, %v2807_v45 }
 0xc98   :  { %5794 = vrsqrt.f32 %v2822_v33 }
 0xca2   :  { %v5795_v7 = vpop.eup %5794 }
 0xca3   :  { %v2829_v48 = vmul.f32 %v5795_v7, %v2819_v17  ;;  %v2824_v38 = vmul.f32 %v5795_v7, %v2814_v28  ;;  %v2825_v1 = vmul.f32 %v5795_v7, %v2815_v60  ;;  %v2826_v46 = vmul.f32 %v5795_v7, %v2816_v29 }
 0xca4   :  { %v2827_v42 = vmul.f32 %v5795_v7, %v2817_v10  ;;  %v2828_v21 = vmul.f32 %v5795_v7, %v2818_v44  ;;  %v2830_v41 = vmul.f32 %v5795_v7, %v2820_v20  ;;  %v2831_v50 = vmul.f32 %v5795_v7, %v2821_v25 }
 0xca5   :  { %v7608_v39 = vadd.f32 %v4803_v54, %v2824_v38  ;;  %v7610_v53 = vadd.f32 %v4803_v54, %v2825_v1  ;;  %v7612_v5 = vadd.f32 %v4803_v54, %v2826_v46  ;;  %v7616_v16 = vadd.f32 %v4803_v54, %v2829_v48 }
 0xca6   :  { %v7614_v23 = vadd.f32 %v4803_v54, %v2827_v42  ;;  %v7621_v35 = vadd.f32 %v4803_v54, %v2828_v21  ;;  %v7628_v13 = vadd.f32 %v4803_v54, %v2830_v41  ;;  %v7636_v40 = vadd.f32 %v4803_v54, %v2831_v50 }
 0xca7   :  { %8765 = vst [vmem:[#allocation10_spill] sm:$0xff] %v7608_v39  ;;  %8766 = vst [vmem:[#allocation6_spill] sm:$0xff] %v7610_v53  ;;  %v8628_v57 = vmax.f32 %v7608_v39, 0.0  ;;  %v8627_v27 = vmax.f32 %v7610_v53, 0.0  ;;  %v8626_v22 = vmax.f32 %v7612_v5, 0.0  ;;  %v8623_v62 = vmax.f32 %v7616_v16, 0.0 }
 0xca8   :  { %8767 = vst [vmem:[#allocation9_spill] sm:$0xff] %v7612_v5  ;;  %8768 = vst [vmem:[#allocation8_spill] sm:$0xff] %v7614_v23  ;;  %v8625_v61 = vmax.f32 %v7614_v23, 0.0  ;;  %v8624_v55 = vmax.f32 %v7621_v35, 0.0  ;;  %v8622_v37 = vmax.f32 %v7628_v13, 0.0  ;;  %v8621_v14 = vmax.f32 %v7636_v40, 0.0 }
 0xca9   :  { %8769 = vst [vmem:[#allocation26_spill] sm:$0xff] %v7616_v16  ;;  %8770 = vst [vmem:[#allocation7_spill] sm:$0xff] %v7621_v35  ;;  %v2854_v47 = vpack.c.bf16 %v8627_v27, %v8628_v57 }
 0xcaa   :  { %8771 = vst [vmem:[#allocation14_spill] sm:$0xff] %v7628_v13  ;;  %v2855_v0 = vpack.c.bf16 %v8625_v61, %v8626_v22  ;;  %8772 = vst [vmem:[#allocation28_spill] sm:$0xff] %v7636_v40  ;;  %v2856_v56 = vpack.c.bf16 %v8623_v62, %v8624_v55  ;;  %v2857_v31 = vpack.c.bf16 %v8621_v14, %v8622_v37 }
 0xcab   :  { %5391 = vmatprep.subr.bf16.mxu0 %v2854_v47 }
 0xcac   :  { %5392 = vmatpush3.bf16.msra.mxu0 %v2854_v47 }
 0xcad   :  { %5393 = vmatprep.subr.bf16.mxu0 %v2855_v0 }
 0xcb0   :  { %5394 = vmatpush3.bf16.msra.mxu0 %v2855_v0 }
 0xcb1   :  { %5395 = vmatprep.subr.bf16.mxu0 %v2856_v56 }
 0xcb4   :  { %5396 = vmatpush3.bf16.msra.mxu0 %v2856_v56 }
 0xcb5   :  { %5397 = vmatprep.subr.bf16.mxu0 %v2857_v31 }
 0xcb8   :  { %5398 = vmatpush3.bf16.msra.mxu0 %v2857_v31 }
 0xcbb   :  { %5400 = vmatmul.mubr.msk.bf16.vlgmr.msra.gmra.mrb[88].mxu0 %vm511_vm1, %v5952_v32 }
 0xcbc   :  { %5403 = vmatprep.mubr.msk.bf16.mxu0 %vm511_vm1, %v5953_v49 }
 0xcc3   :  { %5404 = vmatmul.mubr.msk.bf16.gmra.mrb[92].mxu0 %vm511_vm1, %v5954_v12 }
 0xcc4   :  { %5407 = vmatprep.mubr.msk.bf16.mxu0 %vm511_vm1, %v5955_v43 }
 0xccb   :  { %5408 = vmatmul.mubr.msk.bf16.gmra.mrb[96].mxu0 %vm511_vm1, %v5956_v9 }
 0xccc   :  { %5411 = vmatprep.mubr.msk.bf16.mxu0 %vm511_vm1, %v5957_v30 }
 0xcd3   :  { %5412 = vmatmul.mubr.msk.bf16.gmra.mrb[100].mxu0 %vm511_vm1, %v5958_v4 }
 0xcd4   :  { %5415 = vmatprep.mubr.msk.bf16.mxu0 %vm511_vm1, %v5959_v3 }
 0xcdb   :  { %5416 = vmatmul.mubr.msk.bf16.gmra.mrb[104].mxu0 %vm511_vm1, %v5960_v52 }
 0xcdc   :  { %5419 = vmatprep.mubr.msk.bf16.mxu0 %vm511_vm1, %v5961_v6 }
 0xce3   :  { %5420 = vmatmul.mubr.msk.bf16.gmra.mrb[108].mxu0 %vm511_vm1, %v5962_v8 }
 0xce4   :  { %5423 = vmatprep.mubr.msk.bf16.mxu0 %vm511_vm1, %v5963_v2 }
 0xceb   :  { %5424 = vmatmul.mubr.msk.bf16.gmra.mrb[112].mxu0 %vm511_vm1, %v5964_v63 }
 0xcec   :  { %5427 = vmatprep.mubr.msk.bf16.mxu0 %vm511_vm1, %v5965_v59 }
 0xcf3   :  { %5428 = vmatmul.mubr.msk.bf16.gmra.mrb[116].mxu0 %vm511_vm1, %v5966_v34 }
 0xd8e   :  { %v5401_v36 = vpop.f32.mrb[88].mxu0 }
 0xd8f   :  { %v2892_v11 = vpop.f32.mrb[89].mxu0  ;;  %v3021_v58 = vmax.f32 %v5401_v36, 0.0 }
 0xd90   :  { %v5402_v26 = vpop.f32.mrb[90].mxu0  ;;  %v3019_v18 = vmax.f32 %v2892_v11, 0.0 }
 0xd91   :  { %v2895_v19 = vpop.f32.mrb[91].mxu0  ;;  %v3022_v51 = vmax.f32 %v5402_v26, 0.0  ;;  %v7681_v33 = vadd.f32 1e-07, %v3021_v58 }
 0xd92   :  { %v3020_v45 = vmax.f32 %v2895_v19, 0.0  ;;  %v7685_v17 = vadd.f32 1e-07, %v3019_v18 }
 0xd93   :  { %v7687_v60 = vadd.f32 1e-07, %v3022_v51  ;;  %v7693_v20 = vmul.f32 %v7683_v15, %v7681_v33 }
 0xd94   :  { %v7689_v54 = vadd.f32 1e-07, %v3020_v45  ;;  %v7699_v1 = vmul.f32 %v7683_v15, %v7685_v17 }
 0xd95   :  { %v7705_v21 = vmul.f32 %v7683_v15, %v7687_v60  ;;  %v3119_v31 = vsel %vm819_vm2, %v7693_v20, -inf }
 0xd96   :  { %v5405_v28 = vpop.f32.mrb[92].mxu0  ;;  %v7715_v47 = vmul.f32 %v7683_v15, %v7689_v54  ;;  %v3117_v12 = vsel %vm819_vm2, %v7699_v1, -inf }
 0xd97   :  { %v3025_v29 = vmax.f32 %v5405_v28, 0.0  ;;  %v2908_v7 = vpop.f32.mrb[93].mxu0  ;;  %v3120_v3 = vsel %vm819_vm2, %v7705_v21, -inf }
 0xd98   :  { %v3023_v10 = vmax.f32 %v2908_v7, 0.0  ;;  %v5406_v44 = vpop.f32.mrb[94].mxu0  ;;  %v3118_v2 = vsel %vm819_vm2, %v7715_v47, -inf }
 0xd99   :  { %v7695_v25 = vadd.f32 1e-07, %v3025_v29  ;;  %v3026_v48 = vmax.f32 %v5406_v44, 0.0  ;;  %v2911_v38 = vpop.f32.mrb[95].mxu0 }
 0xd9a   :  { %v7701_v46 = vadd.f32 1e-07, %v3023_v10  ;;  %v3024_v42 = vmax.f32 %v2911_v38, 0.0 }
 0xd9b   :  { %v7709_v41 = vmul.f32 %v7683_v15, %v7695_v25  ;;  %v7711_v50 = vadd.f32 1e-07, %v3026_v48 }
 0xd9c   :  { %v7719_v0 = vmul.f32 %v7683_v15, %v7701_v46  ;;  %v7721_v56 = vadd.f32 1e-07, %v3024_v42 }
 0xd9d   :  { %v3125_v32 = vsel %vm819_vm2, %v7709_v41, -inf  ;;  %v7729_v49 = vmul.f32 %v7683_v15, %v7711_v50 }
 0xd9e   :  { %v3126_v43 = vmax.f32 %v3119_v31, %v3125_v32  ;;  %v3121_v9 = vsel %vm819_vm2, %v7719_v0, -inf  ;;  %v7737_v30 = vmul.f32 %v7683_v15, %v7721_v56  ;;  %v5409_v4 = vpop.f32.mrb[96].mxu0 }
 0xd9f   :  { %v3122_v52 = vmax.f32 %v3117_v12, %v3121_v9  ;;  %v3127_v6 = vsel %vm819_vm2, %v7729_v49, -inf  ;;  %v2924_v8 = vpop.f32.mrb[97].mxu0  ;;  %v3029_v18 = vmax.f32 %v5409_v4, 0.0 }
 0xda0   :  { %v3128_v63 = vmax.f32 %v3120_v3, %v3127_v6  ;;  %v3123_v59 = vsel %vm819_vm2, %v7737_v30, -inf  ;;  %v3027_v34 = vmax.f32 %v2924_v8, 0.0  ;;  %v5410_v36 = vpop.f32.mrb[98].mxu0 }
 0xda1   :  { %v3124_v11 = vmax.f32 %v3118_v2, %v3123_v59  ;;  %v2927_v26 = vpop.f32.mrb[99].mxu0  ;;  %v3030_v45 = vmax.f32 %v5410_v36, 0.0  ;;  %v7761_v44 = vadd.f32 1e-07, %v3029_v18 }
 0xda2   :  { %v7747_v58 = vadd.f32 1e-07, %v3027_v34  ;;  %v3028_v19 = vmax.f32 %v2927_v26, 0.0 }
 0xda3   :  { %8773 = vst [vmem:[#allocation30_spill] sm:$0xff] %v7761_v44  ;;  %v7763_v31 = vadd.f32 1e-07, %v3030_v45 }
 0xda4   :  { %v7751_v51 = vmul.f32 %v7683_v15, %v7747_v58  ;;  %v7753_v28 = vadd.f32 1e-07, %v3028_v19 }
 0xda5   :  { %8774 = vst [vmem:[#allocation27_spill] sm:$0xff] %v7763_v31  ;;  %v7779_v36 = vmul.f32 %v7683_v15, %v7763_v31 }
 0xda6   :  { %v3129_v29 = vsel %vm819_vm2, %v7751_v51, -inf  ;;  %v7759_v7 = vmul.f32 %v7683_v15, %v7753_v28  ;;  %v5413_v10 = vpop.f32.mrb[100].mxu0 }
 0xda7   :  { %v3130_v48 = vmax.f32 %v3122_v52, %v3129_v29  ;;  %v3033_v38 = vmax.f32 %v5413_v10, 0.0  ;;  %v2940_v42 = vpop.f32.mrb[101].mxu0  ;;  %v7773_v52 = vmul.f32 %v7683_v15, %v7761_v44 }
 0xda8   :  { %v3131_v32 = vsel %vm819_vm2, %v7759_v7, -inf  ;;  %v3031_v12 = vmax.f32 %v2940_v42, 0.0  ;;  %v5414_v9 = vpop.f32.mrb[102].mxu0  ;;  %v3135_v42 = vsel %vm819_vm2, %v7779_v36, -inf }
 0xda9   :  { %v3132_v4 = vmax.f32 %v3124_v11, %v3131_v32  ;;  %v7767_v3 = vadd.f32 1e-07, %v3033_v38  ;;  %v3034_v6 = vmax.f32 %v5414_v9, 0.0  ;;  %v2943_v8 = vpop.f32.mrb[103].mxu0  ;;  %v3133_v45 = vsel %vm819_vm2, %v7773_v52, -inf }
 0xdaa   :  { %v7769_v2 = vadd.f32 1e-07, %v3031_v12  ;;  %v3032_v59 = vmax.f32 %v2943_v8, 0.0  ;;  %v3134_v37 = vmax.f32 %v3126_v43, %v3133_v45  ;;  %v3136_v61 = vmax.f32 %v3128_v63, %v3135_v42 }
 0xdab   :  { %8775 = vst [vmem:[#allocation29_spill] sm:$0xff] %v7767_v3  ;;  %v7775_v34 = vadd.f32 1e-07, %v3034_v6  ;;  %v7785_v11 = vmul.f32 %v7683_v15, %v7767_v3 }
 0xdac   :  { %8776 = vst [vmem:[#allocation32_spill] sm:$0xff] %v7769_v2  ;;  %v7781_v26 = vadd.f32 1e-07, %v3032_v59  ;;  %v7789_v19 = vmul.f32 %v7683_v15, %v7769_v2 }
 0xdad   :  { %8777 = vst [vmem:[#allocation31_spill] sm:$0xff] %v7775_v34  ;;  %8779 = vst [vmem:[#allocation19_spill] sm:$0xff] %v7785_v11  ;;  %v7795_v29 = vmul.f32 %v7683_v15, %v7775_v34  ;;  %v3141_v6 = vsel %vm819_vm2, %v7785_v11, -inf }
 0xdae   :  { %8778 = vst [vmem:[#allocation33_spill] sm:$0xff] %v7781_v26  ;;  %v5417_v18 = vpop.f32.mrb[104].mxu0  ;;  %v7801_v32 = vmul.f32 %v7683_v15, %v7781_v26 }
 0xdaf   :  { %8780 = vst [vmem:[#allocation21_spill] sm:$0xff] %v7795_v29  ;;  %v3037_v10 = vmax.f32 %v5417_v18, 0.0  ;;  %v2956_v38 = vpop.f32.mrb[105].mxu0  ;;  %v3137_v18 = vsel %vm819_vm2, %v7789_v19, -inf  ;;  %v3143_v22 = vsel %vm819_vm2, %v7795_v29, -inf }
 0xdb0   :  { %v3035_v12 = vmax.f32 %v2956_v38, 0.0  ;;  %v5418_v9 = vpop.f32.mrb[106].mxu0  ;;  %v3139_v43 = vsel %vm819_vm2, %v7801_v32, -inf }
 0xdb1   :  { %v7805_v8 = vadd.f32 1e-07, %v3037_v10  ;;  %v3038_v59 = vmax.f32 %v5418_v9, 0.0  ;;  %v2959_v14 = vpop.f32.mrb[107].mxu0  ;;  %v3142_v10 = vmax.f32 %v3134_v37, %v3141_v6  ;;  %v3144_v9 = vmax.f32 %v3136_v61, %v3143_v22 }
 0xdb2   :  { %v7809_v62 = vadd.f32 1e-07, %v3035_v12  ;;  %v3036_v55 = vmax.f32 %v2959_v14, 0.0  ;;  %v3138_v14 = vmax.f32 %v3130_v48, %v3137_v18 }
 0xdb3   :  { %v7815_v38 = vmul.f32 %v7683_v15, %v7805_v8  ;;  %v7817_v27 = vadd.f32 1e-07, %v3038_v59 }
 0xdb4   :  { %v7823_v45 = vmul.f32 %v7683_v15, %v7809_v62  ;;  %v7825_v12 = vadd.f32 1e-07, %v3036_v55  ;;  %v3140_v55 = vmax.f32 %v3132_v4, %v3139_v43 }
 0xdb5   :  { %8781 = vst [vmem:[#allocation23_spill] sm:$0xff] %v7817_v27  ;;  %v3149_v63 = vsel %vm819_vm2, %v7815_v38, -inf  ;;  %v7831_v42 = vmul.f32 %v7683_v15, %v7817_v27 }
 0xdb6   :  { %v3150_v59 = vmax.f32 %v3142_v10, %v3149_v63  ;;  %v3145_v37 = vsel %vm819_vm2, %v7823_v45, -inf  ;;  %v7837_v6 = vmul.f32 %v7683_v15, %v7825_v12  ;;  %v5421_v57 = vpop.f32.mrb[108].mxu0 }
 0xdb7   :  { %v3146_v24 = vmax.f32 %v3138_v14, %v3145_v37  ;;  %v3151_v48 = vsel %vm819_vm2, %v7831_v42, -inf  ;;  %v3041_v18 = vmax.f32 %v5421_v57, 0.0  ;;  %v2972_v40 = vpop.f32.mrb[109].mxu0 }
 0xdb8   :  { %v3152_v13 = vmax.f32 %v3144_v9, %v3151_v48  ;;  %v3147_v22 = vsel %vm819_vm2, %v7837_v6, -inf  ;;  %v3039_v61 = vmax.f32 %v2972_v40, 0.0  ;;  %v5422_v10 = vpop.f32.mrb[110].mxu0 }
 0xdb9   :  { %v3148_v63 = vmax.f32 %v3140_v55, %v3147_v22  ;;  %v7843_v16 = vadd.f32 1e-07, %v3041_v18  ;;  %v3042_v35 = vmax.f32 %v5422_v10, 0.0  ;;  %v2975_v23 = vpop.f32.mrb[111].mxu0 }
 0xdba   :  { %v7845_v5 = vadd.f32 1e-07, %v3039_v61  ;;  %v3040_v4 = vmax.f32 %v2975_v23, 0.0 }
 0xdbb   :  { %8782 = vst [vmem:[#allocation5_spill] sm:$0xff] %v7843_v16  ;;  %v7849_v43 = vmul.f32 %v7683_v15, %v7843_v16  ;;  %v7851_v57 = vadd.f32 1e-07, %v3042_v35 }
 0xdbc   :  { %8783 = vst [vmem:[#allocation24_spill] sm:$0xff] %v7845_v5  ;;  %v7855_v14 = vmul.f32 %v7683_v15, %v7845_v5  ;;  %v7857_v40 = vadd.f32 1e-07, %v3040_v4 }
 0xdbd   :  { %8784 = vst [vmem:[#allocation25_spill] sm:$0xff] %v7851_v57  ;;  %v3157_v9 = vsel %vm819_vm2, %v7849_v43, -inf  ;;  %v7863_v37 = vmul.f32 %v7683_v15, %v7851_v57 }
 0xdbe   :  { %8785 = vst [vmem:[#allocation11_spill] sm:$0xff] %v7857_v40  ;;  %v3158_v23 = vmax.f32 %v3150_v59, %v3157_v9  ;;  %v3153_v55 = vsel %vm819_vm2, %v7855_v14, -inf  ;;  %v7869_v35 = vmul.f32 %v7683_v15, %v7857_v40  ;;  %v5425_v48 = vpop.f32.mrb[112].mxu0 }
 0xdbf   :  { %v3154_v18 = vmax.f32 %v3146_v24, %v3153_v55  ;;  %v3159_v22 = vsel %vm819_vm2, %v7863_v37, -inf  ;;  %v3045_v61 = vmax.f32 %v5425_v48, 0.0  ;;  %v2988_v10 = vpop.f32.mrb[113].mxu0 }
 0xdc0   :  { %v3160_v4 = vmax.f32 %v3152_v13, %v3159_v22  ;;  %v3155_v53 = vsel %vm819_vm2, %v7869_v35, -inf  ;;  %v3043_v39 = vmax.f32 %v2988_v10, 0.0  ;;  %v5426_v59 = vpop.f32.mrb[114].mxu0 }
 0xdc1   :  { %v3156_v9 = vmax.f32 %v3148_v63, %v3155_v53  ;;  %v7875_v34 = vadd.f32 1e-07, %v3045_v61  ;;  %v3046_v3 = vmax.f32 %v5426_v59, 0.0  ;;  %v2991_v26 = vpop.f32.mrb[115].mxu0 }
 0xdc2   :  { %v7877_v2 = vadd.f32 1e-07, %v3043_v39  ;;  %v3044_v31 = vmax.f32 %v2991_v26, 0.0 }
 0xdc3   :  { %8786 = vst [vmem:[#allocation16_spill] sm:$0xff] %v7875_v34  ;;  %v7881_v24 = vmul.f32 %v7683_v15, %v7875_v34  ;;  %v7883_v55 = vadd.f32 1e-07, %v3046_v3 }
 0xdc4   :  { %8787 = vst [vmem:[#allocation12_spill] sm:$0xff] %v7877_v2  ;;  %v7887_v13 = vmul.f32 %v7683_v15, %v7877_v2  ;;  %v7889_v48 = vadd.f32 1e-07, %v3044_v31 }
 0xdc5   :  { %8788 = vst [vmem:[#allocation18_spill] sm:$0xff] %v7883_v55  ;;  %v3165_v53 = vsel %vm819_vm2, %v7881_v24, -inf  ;;  %v7895_v39 = vmul.f32 %v7683_v15, %v7883_v55 }
 0xdc6   :  { %8789 = vst [vmem:[#allocation17_spill] sm:$0xff] %v7889_v48  ;;  %v3166_v26 = vmax.f32 %v3158_v23, %v3165_v53  ;;  %v3161_v63 = vsel %vm819_vm2, %v7887_v13, -inf  ;;  %v7901_v3 = vmul.f32 %v7683_v15, %v7889_v48  ;;  %v5429_v22 = vpop.f32.mrb[116].mxu0 }
 0xdc7   :  { %v3162_v61 = vmax.f32 %v3154_v18, %v3161_v63  ;;  %v3167_v31 = vsel %vm819_vm2, %v7895_v39, -inf  ;;  %v3049_v10 = vmax.f32 %v5429_v22, 0.0  ;;  %v3004_v59 = vpop.f32.mrb[117].mxu0 }
 0xdc8   :  { %v3168_v44 = vmax.f32 %v3160_v4, %v3167_v31  ;;  %v3163_v55 = vsel %vm819_vm2, %v7901_v3, -inf  ;;  %v3047_v34 = vmax.f32 %v3004_v59, 0.0  ;;  %v5430_v23 = vpop.f32.mrb[118].mxu0 }
 0xdc9   :  { %v3164_v53 = vmax.f32 %v3156_v9, %v3163_v55  ;;  %v7907_v2 = vadd.f32 1e-07, %v3049_v10  ;;  %v3050_v57 = vmax.f32 %v5430_v23, 0.0  ;;  %v3007_v16 = vpop.f32.mrb[119].mxu0 }
 0xdca   :  { %v7909_v48 = vadd.f32 1e-07, %v3047_v34  ;;  %v3048_v40 = vmax.f32 %v3007_v16, 0.0 }
 0xdcb   :  { %8790 = vst [vmem:[#allocation15_spill] sm:$0xff] %v7907_v2  ;;  %v7913_v18 = vmul.f32 %v7683_v15, %v7907_v2  ;;  %v7915_v63 = vadd.f32 1e-07, %v3050_v57 }
 0xdcc   :  { %8791 = vst [vmem:[#allocation20_spill] sm:$0xff] %v7909_v48  ;;  %v7919_v4 = vmul.f32 %v7683_v15, %v7909_v48  ;;  %v7921_v22 = vadd.f32 1e-07, %v3048_v40 }
 0xdcd   :  { %8792 = vst [vmem:[#allocation22_spill] sm:$0xff] %v7915_v63  ;;  %v3173_v9 = vsel %vm819_vm2, %v7913_v18, -inf  ;;  %v7927_v34 = vmul.f32 %v7683_v15, %v7915_v63 }
 0xdce   :  { %v3174_v16 = vmax.f32 %v3166_v26, %v3173_v9  ;;  %v3169_v55 = vsel %vm819_vm2, %v7919_v4, -inf  ;;  %v3114_v57 = vmul.f32 %v7683_v15, %v7921_v22 }
 0xdcf   :  { %v3170_v31 = vmax.f32 %v3162_v61, %v3169_v55  ;;  %v3175_v10 = vsel %vm819_vm2, %v7927_v34, -inf }
 0xdd0   :  { %v3176_v40 = vmax.f32 %v3168_v44, %v3175_v10  ;;  %v3171_v59 = vsel %vm819_vm2, %v3114_v57, -inf }
 0xdd1   :  { %v3172_v23 = vmax.f32 %v3164_v53, %v3171_v59 }
 0xdd2   :  { %v3178_v2 = vmax.f32 %v3174_v16, %v3176_v40 }
 0xdd3   :  { %v3177_v48 = vmax.f32 %v3170_v31, %v3172_v23 }
 0xdd5   :  { %v3179_v29 = vmax.f32 %v3177_v48, %v3178_v2 }
 0xdd7   :  { %v3180_v63 = vrot.slane %v3179_v29, 4 }
 0xdd9   :  { %v3181_v5 = vmax.f32 %v3179_v29, %v3180_v63 }
 0xddb   :  { %v3182_v26 = vrot.slane %v3181_v5, 2 }
 0xddd   :  { %v3183_v9 = vmax.f32 %v3181_v5, %v3182_v26 }
 0xddf   :  { %v3184_v11 = vrot.slane %v3183_v9, 1 }
 0xde1   :  { %v7936_v27 = vmax.f32 %v3183_v9, %v3184_v11 }
 0xde3   :  { %v3215_v15 = vsub.f32 %v3114_v57, %v7936_v27  ;;  %v3186_v61 = vsub.f32 %v7699_v1, %v7936_v27  ;;  %v3187_v44 = vsub.f32 %v7715_v47, %v7936_v27  ;;  %v3188_v53 = vsub.f32 %v7693_v20, %v7936_v27 }
 0xde4   :  { %v3189_v2 = vsub.f32 %v7705_v21, %v7936_v27  ;;  %v3190_v5 = vsub.f32 %v7719_v0, %v7936_v27  ;;  %v3191_v11 = vsub.f32 %v7737_v30, %v7936_v27  ;;  %v3192_v29 = vsub.f32 %v7709_v41, %v7936_v27 }
 0xde5   :  { %v3276_v48 = vmul.f32 1.442695, %v3215_v15  ;;  %v3193_v1 = vsub.f32 %v7729_v49, %v7936_v27  ;;  %v3194_v47 = vsub.f32 %v7751_v51, %v7936_v27  ;;  %v3195_v20 = vsub.f32 %v7759_v7, %v7936_v27 }
 0xde6   :  { %v3202_v21 = vsub.f32 %v7823_v45, %v7936_v27  ;;  %v3203_v0 = vsub.f32 %v7837_v6, %v7936_v27  ;;  %v3204_v41 = vsub.f32 %v7815_v38, %v7936_v27  ;;  %v3205_v30 = vsub.f32 %v7831_v42, %v7936_v27 }
 0xde7   :  { %5796 = vpow2.f32 %v3276_v48  ;;  %v3206_v49 = vsub.f32 %v7855_v14, %v7936_v27  ;;  %v3207_v51 = vsub.f32 %v7869_v35, %v7936_v27  ;;  %v3208_v7 = vsub.f32 %v7849_v43, %v7936_v27 }
 0xde8   :  { %v3209_v45 = vsub.f32 %v7863_v37, %v7936_v27  ;;  %v3210_v6 = vsub.f32 %v7887_v13, %v7936_v27  ;;  %v3211_v38 = vsub.f32 %v7901_v3, %v7936_v27  ;;  %v3212_v42 = vsub.f32 %v7881_v24, %v7936_v27 }
 0xde9   :  { %v3213_v14 = vsub.f32 %v7895_v39, %v7936_v27  ;;  %v3214_v35 = vsub.f32 %v7919_v4, %v7936_v27  ;;  %v3216_v43 = vsub.f32 %v7913_v18, %v7936_v27  ;;  %v3217_v63 = vsub.f32 %v7927_v34, %v7936_v27 }
 0xdea   :  { %v3218_v16 = vmul.f32 1.442695, %v3186_v61  ;;  %v3220_v55 = vmul.f32 1.442695, %v3187_v44  ;;  %v3222_v57 = vmul.f32 1.442695, %v3188_v53  ;;  %v3196_v3 = vsub.f32 %v7773_v52, %v7936_v27 }
 0xdeb   :  { %v3224_v31 = vmul.f32 1.442695, %v3189_v2  ;;  %v3226_v10 = vmul.f32 1.442695, %v3190_v5  ;;  %v3228_v40 = vmul.f32 1.442695, %v3191_v11  ;;  %v3197_v24 = vsub.f32 %v7779_v36, %v7936_v27 }
 0xdec   :  { %5798 = vpow2.f32 %v3218_v16  ;;  %v3230_v59 = vmul.f32 1.442695, %v3192_v29  ;;  %v3232_v23 = vmul.f32 1.442695, %v3193_v1  ;;  %v3234_v9 = vmul.f32 1.442695, %v3194_v47 }
 0xded   :  { %5800 = vpow2.f32 %v3220_v55  ;;  %v3236_v61 = vmul.f32 1.442695, %v3195_v20  ;;  %v3250_v11 = vmul.f32 1.442695, %v3202_v21  ;;  %v3252_v1 = vmul.f32 1.442695, %v3203_v0 }
 0xdee   :  { %5802 = vpow2.f32 %v3222_v57  ;;  %v3256_v0 = vmul.f32 1.442695, %v3205_v30  ;;  %v3258_v57 = vmul.f32 1.442695, %v3206_v49  ;;  %v3260_v30 = vmul.f32 1.442695, %v3207_v51 }
 0xdef   :  { %5804 = vpow2.f32 %v3224_v31  ;;  %v3262_v49 = vmul.f32 1.442695, %v3208_v7  ;;  %v3266_v51 = vmul.f32 1.442695, %v3210_v6  ;;  %v3268_v13 = vmul.f32 1.442695, %v3211_v38 }
 0xdf0   :  { %5806 = vpow2.f32 %v3226_v10  ;;  %v3274_v6 = vmul.f32 1.442695, %v3214_v35  ;;  %v3278_v38 = vmul.f32 1.442695, %v3216_v43  ;;  %v3280_v39 = vmul.f32 1.442695, %v3217_v63 }
 0xdf1   :  { %v7989_v26 = vpop.eup %5796  ;;  %5808 = vpow2.f32 %v3228_v40  ;;  %v3198_v52 = vsub.f32 %v7789_v19, %v7936_v27  ;;  %v3199_v18 = vsub.f32 %v7801_v32, %v7936_v27  ;;  %v3238_v63 = vmul.f32 1.442695, %v3196_v3 }
 0xdf2   :  { %v7993_v15 = vmul.f32 %v7989_v26, %v7921_v22  ;;  %5810 = vpow2.f32 %v3230_v59  ;;  %v3240_v19 = vmul.f32 1.442695, %v3197_v24 }
 0xdf3   :  { %5812 = vpow2.f32 %v3232_v23 }
 0xdf4   :  { %5814 = vpow2.f32 %v3234_v9 }
 0xdf5   :  { %5816 = vpow2.f32 %v3236_v61 }
 0xdf6   :  { %v7995_v44 = vpop.eup %5798  ;;  %5818 = vpow2.f32 %v3250_v11 }
 0xdf7   :  { %v7997_v53 = vpop.eup %5800  ;;  %v8001_v2 = vmul.f32 %v7995_v44, %v7685_v17  ;;  %v3254_v17 = vmul.f32 1.442695, %v3204_v41  ;;  %5820 = vpow2.f32 %v3252_v1 }
 0xdf8   :  { %v8003_v5 = vpop.eup %5802  ;;  %v8007_v22 = vmul.f32 %v7997_v53, %v7689_v54  ;;  %v3395_v29 = vpack.c.bf16 %v7997_v53, %v7995_v44  ;;  %v5970_v44 = vld [vmem:[%s6210_s29 + $0x24] ss:$8 sps:$4 sm:$0xff]   ;;  %v5971_v53 = vld [vmem:[%s6210_s29 + $0x20] ss:$8 sps:$4 sm:$0xff]  }
 0xdf9   :  { %v8011_v48 = vpop.eup %5804  ;;  %v8015_v47 = vmul.f32 %v8003_v5, %v7681_v33  ;;  %5822 = vpow2.f32 %v3254_v17  ;;  %v8793_v17 = vld [vmem:[#allocation23_spill] sm:$0xff] }
 0xdfa   :  { %v8017_v20 = vpop.eup %5806  ;;  %v8021_v21 = vmul.f32 %v8011_v48, %v7687_v60  ;;  %v3314_v54 = vpack.c.bf16 %v8007_v22, %v8001_v2  ;;  %v3396_v16 = vpack.c.bf16 %v8011_v48, %v8003_v5  ;;  %5824 = vpow2.f32 %v3256_v0  ;;  %v8801_v2 = vld [vmem:[#allocation17_spill] sm:$0xff]  ;;  %v5972_v5 = vld [vmem:[%s6210_s29 + $0x34] ss:$8 sps:$4 sm:$0xff]  }
 0xdfb   :  { %v8027_v55 = vpop.eup %5808  ;;  %v8031_v33 = vmul.f32 %v8017_v20, %v7701_v46  ;;  %5826 = vpow2.f32 %v3258_v57 }
 0xdfc   :  { %v8033_v31 = vpop.eup %5810  ;;  %v8037_v60 = vmul.f32 %v8027_v55, %v7721_v56  ;;  %v3315_v41 = vpack.c.bf16 %v8021_v21, %v8015_v47  ;;  %v3397_v10 = vpack.c.bf16 %v8027_v55, %v8017_v20  ;;  %5828 = vpow2.f32 %v3260_v30  ;;  %v8794_v30 = vld [vmem:[#allocation19_spill] sm:$0xff] }
 0xdfd   :  { %v8043_v40 = vpop.eup %5812  ;;  %v8047_v46 = vmul.f32 %v8033_v31, %v7695_v25  ;;  %v3264_v25 = vmul.f32 1.442695, %v3209_v45  ;;  %5830 = vpow2.f32 %v3262_v49  ;;  %v3272_v45 = vmul.f32 1.442695, %v3213_v14  ;;  %v5973_v20 = vld [vmem:[%s6210_s29 + $0x30] ss:$8 sps:$4 sm:$0xff]  }
 0xdfe   :  { %v8049_v59 = vpop.eup %5814  ;;  %v8053_v56 = vmul.f32 %v8043_v40, %v7711_v50  ;;  %v3316_v23 = vpack.c.bf16 %v8037_v60, %v8031_v33  ;;  %v3398_v9 = vpack.c.bf16 %v8043_v40, %v8033_v31  ;;  %v3200_v49 = vsub.f32 %v8794_v30, %v7936_v27  ;;  %v8808_v33 = vld [vmem:[#allocation27_spill] sm:$0xff]  ;;  %v5588_v31 = vld [vmem:[%s4682_s2] sm:$0xff]  }
 0xdff   :  { %v8059_v61 = vpop.eup %5816  ;;  %v8069_v50 = vmul.f32 %v8049_v59, %v7747_v58  ;;  %v3270_v58 = vmul.f32 1.442695, %v3212_v42  ;;  %5832 = vpow2.f32 %v3264_v25  ;;  %v8795_v25 = vld [vmem:[#allocation24_spill] sm:$0xff]  ;;  %5431 = vmatprep.subr.bf16.mxu0 %v5588_v31 }
 0xe00   :  { %v8073_v7 = vmul.f32 %v8059_v61, %v7753_v28  ;;  %v3317_v11 = vpack.c.bf16 %v8053_v56, %v8047_v46  ;;  %v3399_v37 = vpack.c.bf16 %v8059_v61, %v8049_v59  ;;  %5834 = vpow2.f32 %v3266_v51  ;;  %v8100_v42 = vpop.eup %5818  ;;  %5432 = vmatpush3.bf16.msra.mxu0 %v5588_v31 }
 0xe01   :  { %5836 = vpow2.f32 %v3268_v13  ;;  %v8105_v4 = vpop.eup %5820  ;;  %v3298_v36 = vmul.f32 %v8100_v42, %v7809_v62 }
 0xe02   :  { %v3318_v28 = vpack.c.bf16 %v8073_v7, %v8069_v50  ;;  %5838 = vpow2.f32 %v3270_v58  ;;  %v3299_v35 = vmul.f32 %v8105_v4, %v7825_v12  ;;  %v3403_v34 = vpack.c.bf16 %v8105_v4, %v8100_v42  ;;  %v5967_v7 = vld [vmem:[%s6210_s29] ss:$8 sps:$4 sm:$0xff]   ;;  %v5969_v42 = vld [vmem:[%s6210_s29 + $0x10] ss:$8 sps:$4 sm:$0xff]  }
 0xe03   :  { %5840 = vpow2.f32 %v3272_v45  ;;  %v8111_v14 = vpop.eup %5822  ;;  %v8797_v45 = vld [vmem:[#allocation11_spill] sm:$0xff] }
 0xe04   :  { %5842 = vpow2.f32 %v3274_v6  ;;  %v8119_v43 = vpop.eup %5824  ;;  %v3300_v62 = vmul.f32 %v8111_v14, %v7805_v8  ;;  %v3322_v0 = vpack.c.bf16 %v3299_v35, %v3298_v36  ;;  %v8796_v8 = vld [vmem:[#allocation21_spill] sm:$0xff]  ;;  %v3244_v36 = vmul.f32 1.442695, %v3199_v18  ;;  %v8800_v18 = vld [vmem:[#allocation12_spill] sm:$0xff] }
 0xe05   :  { %5844 = vpow2.f32 %v3278_v38  ;;  %v8123_v1 = vpop.eup %5826  ;;  %v3301_v32 = vmul.f32 %v8119_v43, %v8793_v17  ;;  %v3404_v12 = vpack.c.bf16 %v8119_v43, %v8111_v14  ;;  %v3201_v58 = vsub.f32 %v8796_v8, %v7936_v27  ;;  %v8798_v35 = vld [vmem:[#allocation5_spill] sm:$0xff] }
 0xe06   :  { %5846 = vpow2.f32 %v3280_v39  ;;  %v8129_v57 = vpop.eup %5828  ;;  %v3302_v51 = vmul.f32 %v8123_v1, %v8795_v25  ;;  %5123 = vmatprep.subr.bf16.mxu1 %v3322_v0  ;;  %v3242_v39 = vmul.f32 1.442695, %v3198_v52  ;;  %v8799_v0 = vld [vmem:[#allocation25_spill] sm:$0xff] }
 0xe07   :  { %v8135_v13 = vpop.eup %5830  ;;  %v3303_v6 = vmul.f32 %v8129_v57, %v8797_v45  ;;  %v3323_v3 = vpack.c.bf16 %v3301_v32, %v3300_v62  ;;  %v3405_v24 = vpack.c.bf16 %v8129_v57, %v8123_v1  ;;  %5848 = vpow2.f32 %v3238_v63  ;;  %5124 = vmatpush3.bf16.msra.mxu1 %v3314_v54 }
 0xe08   :  { %v3304_v17 = vmul.f32 %v8135_v13, %v8798_v35  ;;  %5850 = vpow2.f32 %v3240_v19  ;;  %v3248_v45 = vmul.f32 1.442695, %v3201_v58  ;;  %v8804_v58 = vld [vmem:[#allocation20_spill] sm:$0xff] }
 0xe09   :  { %v8143_v38 = vpop.eup %5832  ;;  %5125 = vmatprep.subr.bf16.mxu1 %v3323_v3  ;;  %v3324_v32 = vpack.c.bf16 %v3303_v6, %v3302_v51  ;;  %5852 = vpow2.f32 %v3242_v39  ;;  %v3246_v51 = vmul.f32 1.442695, %v3200_v49  ;;  %v8802_v6 = vld [vmem:[#allocation16_spill] sm:$0xff] }
 0xe0a   :  { %v8150_v27 = vpop.eup %5834  ;;  %v3305_v62 = vmul.f32 %v8143_v38, %v8799_v0  ;;  %v3406_v63 = vpack.c.bf16 %v8143_v38, %v8135_v13  ;;  %5854 = vpow2.f32 %v3244_v36  ;;  %v8803_v0 = vld [vmem:[#allocation18_spill] sm:$0xff] }
 0xe0b   :  { %v8156_v52 = vpop.eup %5836  ;;  %v3306_v30 = vmul.f32 %v8150_v27, %v8800_v18  ;;  %5126 = vmatpush3.bf16.msra.mxu1 %v3315_v41  ;;  %v8805_v41 = vld [vmem:[#allocation15_spill] sm:$0xff]  ;;  %5856 = vpow2.f32 %v3246_v51 }
 0xe0c   :  { %v8160_v25 = vpop.eup %5838  ;;  %v3307_v22 = vmul.f32 %v8156_v52, %v8801_v2  ;;  %v3325_v54 = vpack.c.bf16 %v3305_v62, %v3304_v17  ;;  %v3407_v19 = vpack.c.bf16 %v8156_v52, %v8150_v27  ;;  %5127 = vmatprep.subr.bf16.mxu1 %v3324_v32  ;;  %v8806_v32 = vld [vmem:[#allocation22_spill] sm:$0xff]  ;;  %5858 = vpow2.f32 %v3248_v45 }
 0xe0d   :  { %v8166_v8 = vpop.eup %5840  ;;  %v3308_v3 = vmul.f32 %v8160_v25, %v8802_v6 }
 0xe0e   :  { %v8173_v35 = vpop.eup %5842  ;;  %v3309_v17 = vmul.f32 %v8166_v8, %v8803_v0  ;;  %v3326_v62 = vpack.c.bf16 %v3307_v22, %v3306_v30  ;;  %v3408_v39 = vpack.c.bf16 %v8166_v8, %v8160_v25  ;;  %v8810_v0 = vld [vmem:[#allocation33_spill] sm:$0xff] }
 0xe0f   :  { %v8179_v49 = vpop.eup %5844  ;;  %v3310_v18 = vmul.f32 %v8173_v35, %v8804_v58  ;;  %v3409_v47 = vpack.c.bf16 %v7989_v26, %v8173_v35  ;;  %5128 = vmatpush3.bf16.msra.mxu1 %v3316_v23 }
 0xe10   :  { %v8185_v21 = vpop.eup %5846  ;;  %v3312_v36 = vmul.f32 %v8179_v49, %v8805_v41  ;;  %v3327_v2 = vpack.c.bf16 %v3309_v17, %v3308_v3  ;;  %5129 = vmatprep.subr.bf16.mxu1 %v3325_v54  ;;  %v8807_v3 = vld [vmem:[#allocation30_spill] sm:$0xff]  ;;  %v8809_v54 = vld [vmem:[#allocation32_spill] sm:$0xff] }
 0xe11   :  { %v3313_v30 = vmul.f32 %v8185_v21, %v8806_v32  ;;  %v3328_v25 = vpack.c.bf16 %v7993_v15, %v3310_v18  ;;  %v3410_v22 = vpack.c.bf16 %v8185_v21, %v8179_v49  ;;  %v5849_v26 = vpop.eup %5848  ;;  %v8812_v49 = vld [vmem:[#allocation31_spill] sm:$0xff] }
 0xe12   :  { %v5851_v6 = vpop.eup %5850  ;;  %v3292_v35 = vmul.f32 %v5849_v26, %v8807_v3 }
 0xe13   :  { %v3329_v8 = vpack.c.bf16 %v3313_v30, %v3312_v36  ;;  %5130 = vmatpush3.bf16.msra.mxu1 %v3317_v11  ;;  %v5853_v51 = vpop.eup %5852  ;;  %v3293_v60 = vmul.f32 %v5851_v6, %v8808_v33  ;;  %v8811_v11 = vld [vmem:[#allocation29_spill] sm:$0xff] }
 0xe14   :  { %5131 = vmatprep.subr.bf16.mxu1 %v3326_v62  ;;  %v5855_v23 = vpop.eup %5854  ;;  %v3294_v45 = vmul.f32 %v5853_v51, %v8809_v54 }
 0xe15   :  { %v5857_v15 = vpop.eup %5856  ;;  %v3295_v17 = vmul.f32 %v5855_v23, %v8810_v0  ;;  %v3319_v46 = vpack.c.bf16 %v3293_v60, %v3292_v35  ;;  %v3401_v48 = vpack.c.bf16 %v5855_v23, %v5853_v51 }
 0xe16   :  { %v5859_v56 = vpop.eup %5858  ;;  %v3296_v62 = vmul.f32 %v5857_v15, %v8811_v11 }
 0xe17   :  { %5132 = vmatpush3.bf16.msra.mxu1 %v3318_v28  ;;  %v3297_v58 = vmul.f32 %v5859_v56, %v8812_v49  ;;  %v3320_v18 = vpack.c.bf16 %v3295_v17, %v3294_v45  ;;  %v5968_v28 = vld [vmem:[%s6210_s29 + $0x14] ss:$8 sps:$4 sm:$0xff]   ;;  %v3402_v55 = vpack.c.bf16 %v5859_v56, %v5857_v15 }
 0xe18   :  { %5133 = vmatprep.subr.bf16.mxu1 %v3327_v2 }
 0xe19   :  { %v3321_v50 = vpack.c.bf16 %v3297_v58, %v3296_v62 }
 0xe1b   :  { %5134 = vmatpush3.bf16.msra.mxu1 %v3319_v46 }
 0xe1c   :  { %5135 = vmatprep.subr.bf16.mxu1 %v3328_v25 }
 0xe1f   :  { %5136 = vmatpush3.bf16.msra.mxu1 %v3320_v18 }
 0xe20   :  { %5137 = vmatprep.subr.bf16.mxu1 %v3329_v8 }
 0xe23   :  { %5138 = vmatpush3.bf16.msra.mxu1 %v3321_v50 }
 0xe24   :  { %5163 = vmatprep.subr.bf16.mxu1 %v3403_v34 }
 0xe26   :  { %3363 = vmatmul.mubr.bf16.vlgmr.msra.gmra.mrb[88].mxu1 %v5967_v7 }
 0xe27   :  { %5164 = vmatpush3.bf16.msra.mxu1 %v3395_v29  ;;  %3370 = vmatprep.mubr.bf16.mxu1 %v5968_v28  ;;  %v3400_v29 = vpack.c.bf16 %v5851_v6, %v5849_v26 }
 0xe28   :  { %5165 = vmatprep.subr.bf16.mxu1 %v3404_v12 }
 0xe2b   :  { %5166 = vmatpush3.bf16.msra.mxu1 %v3396_v16  ;;  %v5974_v16 = vld [vmem:[%s6210_s29 + $0x4] ss:$8 sps:$4 sm:$0xff]   ;;  %s6003_s29 = smov 31  }
 0xe2c   :  { %5167 = vmatprep.subr.bf16.mxu1 %v3405_v24  ;;  %s4678_s5 = sld [smem:[%s8561_s0 + %s6003_s29]]   ;;  %s6019_s29 = smov 3  }
 0xe2e   :  { %3371 = vmatmul.mubr.bf16.gmra.mrb[92].mxu1 %v5969_v42 }
 0xe2f   :  { %5168 = vmatpush3.bf16.msra.mxu1 %v3397_v10  ;;  %3378 = vmatprep.mubr.bf16.mxu1 %v5970_v44  ;;  %v5589_v10 = vld [vmem:[%s4682_s2 + $0x8] sm:$0xff]   ;;  %s4694_s2 = sld [smem:[%s8561_s0 + %s6017_s13]]  }
 0xe30   :  { %5169 = vmatprep.subr.bf16.mxu1 %v3406_v63  ;;  %5433 = vmatprep.subr.bf16.mxu0 %v5589_v10 }
 0xe31   :  { %5434 = vmatpush3.bf16.msra.mxu0 %v5589_v10 }
 0xe33   :  { %5170 = vmatpush3.bf16.msra.mxu1 %v3398_v9 }
 0xe34   :  { %5171 = vmatprep.subr.bf16.mxu1 %v3407_v19 }
 0xe36   :  { %3379 = vmatmul.mubr.bf16.gmra.mrb[96].mxu1 %v5971_v53 }
 0xe37   :  { %5172 = vmatpush3.bf16.msra.mxu1 %v3399_v37  ;;  %3386 = vmatprep.mubr.bf16.mxu1 %v5972_v5 }
 0xe38   :  { %5173 = vmatprep.subr.bf16.mxu1 %v3408_v39 }
 0xe3b   :  { %5174 = vmatpush3.bf16.msra.mxu1 %v3400_v29 }
 0xe3c   :  { %5175 = vmatprep.subr.bf16.mxu1 %v3409_v47 }
 0xe3e   :  { %3387 = vmatmul.mubr.bf16.gmra.mrb[100].mxu1 %v5973_v20 }
 0xe3f   :  { %5176 = vmatpush3.bf16.msra.mxu1 %v3401_v48  ;;  %3443 = vmatprep.mubr.bf16.mxu1 %v5974_v16 }
 0xe40   :  { %5177 = vmatprep.subr.bf16.mxu1 %v3410_v22 }
 0xe43   :  { %5178 = vmatpush3.bf16.msra.mxu1 %v3402_v55 }
 0xe46   :  { %3444 = vmatmul.mubr.bf16.vlgmr.msra.gmra.mrb[104].mxu1 %v5967_v7  ;;  %v8813_v7 = vld [vmem:[#allocation10_spill] sm:$0xff] }
 0xe47   :  { %3451 = vmatprep.mubr.bf16.mxu1 %v5968_v28  ;;  %v8814_v28 = vmax.f32 %v8813_v7, 0.0 }
 0xe4e   :  { %3452 = vmatmul.mubr.bf16.gmra.mrb[108].mxu1 %v5969_v42 }
 0xe4f   :  { %3459 = vmatprep.mubr.bf16.mxu1 %v5970_v44  ;;  %v8815_v44 = vld [vmem:[#allocation6_spill] sm:$0xff] }
 0xe56   :  { %3460 = vmatmul.mubr.bf16.gmra.mrb[112].mxu1 %v5971_v53  ;;  %v8816_v53 = vmax.f32 %v8815_v44, 0.0 }
 0xe57   :  { %3467 = vmatprep.mubr.bf16.mxu1 %v5972_v5 }
 0xe5e   :  { %3468 = vmatmul.mubr.bf16.gmra.mrb[116].mxu1 %v5973_v20 }
 0xef9   :  { %v5139_v40 = vpop.f32.mrb[88].mxu1 }
 0xefa   :  { %v5140_v59 = vpop.f32.mrb[89].mxu1 }
 0xefb   :  { %v5141_v9 = vadd.f32 %v5140_v59, %v5139_v40  ;;  %v5142_v61 = vpop.f32.mrb[90].mxu1 }
 0xefc   :  { %v5143_v37 = vpop.f32.mrb[91].mxu1 }
 0xefd   :  { %v5144_v4 = vadd.f32 %v5143_v37, %v5142_v61 }
 0xf01   :  { %v5145_v14 = vpop.f32.mrb[92].mxu1 }
 0xf02   :  { %v5146_v34 = vpop.f32.mrb[93].mxu1 }
 0xf03   :  { %v5147_v43 = vadd.f32 %v5146_v34, %v5145_v14  ;;  %v5148_v1 = vpop.f32.mrb[94].mxu1  ;;  %v8817_v14 = vld [vmem:[#allocation9_spill] sm:$0xff] }
 0xf04   :  { %v5149_v12 = vpop.f32.mrb[95].mxu1  ;;  %v8818_v34 = vmax.f32 %v8817_v14, 0.0 }
 0xf05   :  { %v5150_v57 = vadd.f32 %v5149_v12, %v5148_v1  ;;  %v8819_v12 = vld [vmem:[#allocation8_spill] sm:$0xff] }
 0xf09   :  { %v5151_v13 = vpop.f32.mrb[96].mxu1 }
 0xf0a   :  { %v5152_v24 = vpop.f32.mrb[97].mxu1 }
 0xf0b   :  { %v8250_v38 = vadd.f32 %v5152_v24, %v5151_v13  ;;  %v5154_v27 = vpop.f32.mrb[98].mxu1  ;;  %v8820_v13 = vmax.f32 %v8819_v12, 0.0 }
 0xf0c   :  { %v5155_v63 = vpop.f32.mrb[99].mxu1 }
 0xf0d   :  { %v8252_v52 = vadd.f32 %v5155_v63, %v5154_v27 }
 0xf11   :  { %v5157_v19 = vpop.f32.mrb[100].mxu1 }
 0xf12   :  { %v5158_v39 = vpop.f32.mrb[101].mxu1 }
 0xf13   :  { %v8254_v47 = vadd.f32 %v5158_v39, %v5157_v19  ;;  %v5160_v21 = vpop.f32.mrb[102].mxu1 }
 0xf14   :  { %v5161_v41 = vpop.f32.mrb[103].mxu1 }
 0xf15   :  { %v8256_v36 = vadd.f32 %v5161_v41, %v5160_v21  ;;  %v8821_v21 = vld [vmem:[#allocation7_spill] sm:$0xff] }
 0xf16   :  { %v8822_v41 = vmax.f32 %v8821_v21, 0.0 }
 0xf19   :  { %v5179_v2 = vpop.f32.mrb[104].mxu1 }
 0xf1a   :  { %v5180_v32 = vpop.f32.mrb[105].mxu1 }
 0xf1b   :  { %v5181_v30 = vadd.f32 %v5180_v32, %v5179_v2  ;;  %v5182_v25 = vpop.f32.mrb[106].mxu1  ;;  %v8823_v32 = vld [vmem:[#allocation26_spill] sm:$0xff] }
 0xf1c   :  { %v5183_v22 = vpop.f32.mrb[107].mxu1 }
 0xf1d   :  { %v3446_v26 = vadd.f32 1e-16, %v5181_v30  ;;  %v5184_v8 = vadd.f32 %v5183_v22, %v5182_v25  ;;  %v8824_v30 = vmax.f32 %v8823_v32, 0.0 }
 0xf1f   :  { %5860 = vrcp.f32 %v3446_v26  ;;  %v3449_v6 = vadd.f32 1e-16, %v5184_v8 }
 0xf21   :  { %5862 = vrcp.f32 %v3449_v6  ;;  %v5185_v51 = vpop.f32.mrb[108].mxu1 }
 0xf22   :  { %v5186_v3 = vpop.f32.mrb[109].mxu1 }
 0xf23   :  { %v5187_v35 = vadd.f32 %v5186_v3, %v5185_v51  ;;  %v5188_v33 = vpop.f32.mrb[110].mxu1  ;;  %v8825_v3 = vld [vmem:[#allocation14_spill] sm:$0xff] }
 0xf24   :  { %v5189_v60 = vpop.f32.mrb[111].mxu1 }
 0xf25   :  { %v3454_v23 = vadd.f32 1e-16, %v5187_v35  ;;  %v5190_v15 = vadd.f32 %v5189_v60, %v5188_v33  ;;  %v8827_v33 = vld [vmem:[#allocation28_spill] sm:$0xff] }
 0xf27   :  { %5864 = vrcp.f32 %v3454_v23  ;;  %v3457_v54 = vadd.f32 1e-16, %v5190_v15  ;;  %v4820_v15 = vld [vmem:[%s4678_s5] ss:$0 sm:$0xff]  ;;  %s4650_s5 = sld [smem:[%s8561_s0 + %s6019_s29]]  }
 0xf29   :  { %v5861_v45 = vpop.eup %5860  ;;  %5866 = vrcp.f32 %v3457_v54  ;;  %v5191_v0 = vpop.f32.mrb[112].mxu1 }
 0xf2a   :  { %v5192_v17 = vpop.f32.mrb[113].mxu1  ;;  %v3484_v46 = vmul.f32 %v5861_v45, %v5141_v9 }
 0xf2b   :  { %v5863_v56 = vpop.eup %5862  ;;  %v5193_v11 = vadd.f32 %v5192_v17, %v5191_v0  ;;  %v5194_v62 = vpop.f32.mrb[114].mxu1 }
 0xf2c   :  { %v5195_v49 = vpop.f32.mrb[115].mxu1  ;;  %v3485_v58 = vmul.f32 %v5863_v56, %v5144_v4  ;;  %v3492_v42 = vadd.f32 %v3484_v46, %v8814_v28 }
 0xf2d   :  { %v3462_v18 = vadd.f32 1e-16, %v5193_v11  ;;  %v5196_v50 = vadd.f32 %v5195_v49, %v5194_v62 }
 0xf2e   :  { %v3493_v5 = vadd.f32 %v3485_v58, %v8816_v53 }
 0xf2f   :  { %5868 = vrcp.f32 %v3462_v18  ;;  %v3465_v29 = vadd.f32 1e-16, %v5196_v50 }
 0xf30   :  { %v3504_v48 = vpack.c.bf16 %v3493_v5, %v3492_v42 }
 0xf31   :  { %v5865_v20 = vpop.eup %5864  ;;  %5870 = vrcp.f32 %v3465_v29  ;;  %v5197_v16 = vpop.f32.mrb[116].mxu1 }
 0xf32   :  { %v3486_v55 = vmul.f32 %v5865_v20, %v5147_v43  ;;  %v5198_v31 = vpop.f32.mrb[117].mxu1  ;;  %5435 = vmatprep.mubr.msk.bf16.mxu0 %vm819_vm2, %v3504_v48 }
 0xf33   :  { %v5867_v10 = vpop.eup %5866  ;;  %v5199_v40 = vadd.f32 %v5198_v31, %v5197_v16  ;;  %v5200_v59 = vpop.f32.mrb[118].mxu1 }
 0xf34   :  { %v3487_v9 = vmul.f32 %v5867_v10, %v5150_v57  ;;  %v5201_v61 = vpop.f32.mrb[119].mxu1  ;;  %v3494_v1 = vadd.f32 %v3486_v55, %v8818_v34 }
 0xf35   :  { %v3470_v37 = vadd.f32 1e-16, %v5199_v40  ;;  %v5202_v4 = vadd.f32 %v5201_v61, %v5200_v59 }
 0xf36   :  { %v3495_v24 = vadd.f32 %v3487_v9, %v8820_v13 }
 0xf37   :  { %5872 = vrcp.f32 %v3470_v37  ;;  %v3473_v27 = vadd.f32 1e-16, %v5202_v4 }
 0xf38   :  { %v3505_v63 = vpack.c.bf16 %v3495_v24, %v3494_v1 }
 0xf39   :  { %v5869_v43 = vpop.eup %5868  ;;  %5874 = vrcp.f32 %v3473_v27 }
 0xf3a   :  { %5436 = vmatmul.mubr.msk.bf16.vlgmr.msra.gmra.mrb[120].mxu0 %vm819_vm2, %v3505_v63  ;;  %v3488_v19 = vmul.f32 %v5869_v43, %v8250_v38  ;;  %v8826_v38 = vmax.f32 %v8825_v3, 0.0 }
 0xf3b   :  { %v5871_v39 = vpop.eup %5870 }
 0xf3c   :  { %v3489_v57 = vmul.f32 %v5871_v39, %v8252_v52  ;;  %v3496_v2 = vadd.f32 %v3488_v19, %v8822_v41  ;;  %v8828_v52 = vmax.f32 %v8827_v33, 0.0 }
 0xf3e   :  { %v3497_v25 = vadd.f32 %v3489_v57, %v8824_v30 }
 0xf40   :  { %v3506_v22 = vpack.c.bf16 %v3497_v25, %v3496_v2 }
 0xf41   :  { %v5873_v26 = vpop.eup %5872 }
 0xf42   :  { %5439 = vmatprep.mubr.msk.bf16.mxu0 %vm819_vm2, %v3506_v22  ;;  %v3490_v8 = vmul.f32 %v5873_v26, %v8254_v47 }
 0xf43   :  { %v5875_v6 = vpop.eup %5874 }
 0xf44   :  { %v3491_v51 = vmul.f32 %v5875_v6, %v8256_v36  ;;  %v3498_v35 = vadd.f32 %v3490_v8, %v8826_v38 }
 0xf46   :  { %v3499_v60 = vadd.f32 %v3491_v51, %v8828_v52 }
 0xf48   :  { %v3507_v23 = vpack.c.bf16 %v3499_v60, %v3498_v35 }
 0xf4a   :  { %5440 = vmatmul.mubr.msk.bf16.gmra.mrb[124].mxu0 %vm819_vm2, %v3507_v23 }
0x100d   :  { %v5437_v54 = vpop.f32.mrb[120].mxu0 }
0x100e   :  { %v3573_v47 = vpop.f32.mrb[121].mxu0  ;;  %v3582_v17 = vadd.f32 %v5437_v54, %v4820_v15  ;;  %v5590_v54 = vld [vmem:[%s4683_s9] sm:$0xff]  }
0x100f   :  { %v3574_v45 = vadd.f32 %v4820_v15, %v3573_v47  ;;  %v5438_v0 = vpop.f32.mrb[122].mxu0  ;;  %5443 = vmatprep.subr.bf16.mxu0 %v5590_v54  ;;  %v5591_v47 = vld [vmem:[%s4683_s9 + $0x8] sm:$0xff]  }
0x1010   :  { %v3576_v36 = vpop.f32.mrb[123].mxu0  ;;  %v3585_v11 = vadd.f32 %v5438_v0, %v4820_v15  ;;  %v3612_v49 = vsel %vm511_vm1, %v3582_v17, 0.0  ;;  %5444 = vmatpush3.bf16.msra.mxu0 %v5590_v54  ;;  %v5593_v0 = vld [vmem:[%s4683_s9 + $0x18] sm:$0xff]  }
0x1011   :  { %v3577_v46 = vadd.f32 %v4820_v15, %v3576_v36  ;;  %v3606_v56 = vsel %vm511_vm1, %v3574_v45, 0.0  ;;  %5445 = vmatprep.subr.bf16.mxu0 %v5591_v47 }
0x1012   :  { %3607 = vadd.xlane.f32.xlu0 %v3606_v56  ;;  %v3615_v58 = vsel %vm511_vm1, %v3585_v11, 0.0 }
0x1013   :  { %v3609_v62 = vsel %vm511_vm1, %v3577_v46, 0.0 }
0x1014   :  { %3610 = vadd.xlane.f32.xlu1 %v3609_v62  ;;  %5446 = vmatpush3.bf16.msra.mxu0 %v5591_v47 }
0x1016   :  { %3613 = vadd.xlane.f32.xlu0 %v3612_v49 }
0x1018   :  { %3616 = vadd.xlane.f32.xlu1 %v3615_v58 }
0x101d   :  { %v5441_v18 = vpop.f32.mrb[124].mxu0 }
0x101e   :  { %v3589_v50 = vpop.f32.mrb[125].mxu0  ;;  %v3598_v44 = vadd.f32 %v5441_v18, %v4820_v15 }
0x101f   :  { %v3590_v7 = vadd.f32 %v4820_v15, %v3589_v50  ;;  %v5442_v28 = vpop.f32.mrb[126].mxu0 }
0x1020   :  { %v3592_v42 = vpop.f32.mrb[127].mxu0  ;;  %v3601_v29 = vadd.f32 %v5442_v28, %v4820_v15  ;;  %v3624_v20 = vsel %vm511_vm1, %v3598_v44, 0.0 }
0x1021   :  { %v3593_v53 = vadd.f32 %v4820_v15, %v3592_v42  ;;  %v3618_v5 = vsel %vm511_vm1, %v3590_v7, 0.0 }
0x1022   :  { %3619 = vadd.xlane.f32.xlu0 %v3618_v5  ;;  %v3627_v16 = vsel %vm511_vm1, %v3601_v29, 0.0 }
0x1023   :  { %v3621_v48 = vsel %vm511_vm1, %v3593_v53, 0.0 }
0x1024   :  { %3622 = vadd.xlane.f32.xlu1 %v3621_v48  ;;  %v4828_v48 = vld [vmem:[%s4680_s18] ss:$0 sm:$0xff]  ;;  %s4685_s18 = sld [smem:[%s8561_s0 + %s6022_s15]]  }
0x1026   :  { %3625 = vadd.xlane.f32.xlu0 %v3624_v20 }
0x1028   :  { %3628 = vadd.xlane.f32.xlu1 %v3627_v16 }
0x109f   :  { %v3608_v55 = vpop.xlane.xlu0 %3607 }
0x10a0   :  { %v3630_v31 = vmul.f32 0.015625, %v3608_v55 }
0x10a1   :  { %v3611_v10 = vpop.xlane.xlu1 %3610 }
0x10a2   :  { %v8293_v40 = vsub.f32 %v3574_v45, %v3630_v31  ;;  %v3631_v59 = vmul.f32 0.015625, %v3611_v10  ;;  %v5592_v45 = vld [vmem:[%s4683_s9 + $0x10] sm:$0xff]   ;;  %s4692_s9 = sld [smem:[%s8561_s0 + %s6020_s6]]  }
0x10a3   :  { %v3614_v9 = vpop.xlane.xlu0 %3613  ;;  %5447 = vmatprep.subr.bf16.mxu0 %v5592_v45 }
0x10a4   :  { %v8295_v61 = vsub.f32 %v3577_v46, %v3631_v59  ;;  %v3632_v37 = vmul.f32 0.015625, %v3614_v9  ;;  %v3646_v4 = vmul.f32 %v8293_v40, %v8293_v40  ;;  %5448 = vmatpush3.bf16.msra.mxu0 %v5592_v45 }
0x10a5   :  { %v3617_v14 = vpop.xlane.xlu1 %3616  ;;  %5449 = vmatprep.subr.bf16.mxu0 %v5593_v0 }
0x10a6   :  { %v8299_v34 = vsub.f32 %v3582_v17, %v3632_v37  ;;  %v3633_v1 = vmul.f32 0.015625, %v3617_v14  ;;  %v3654_v12 = vsel %vm511_vm1, %v3646_v4, 0.0  ;;  %v3647_v13 = vmul.f32 %v8295_v61, %v8295_v61 }
0x10a7   :  { %3655 = vadd.xlane.f32.xlu0 %v3654_v12 }
0x10a8   :  { %v8304_v24 = vsub.f32 %v3585_v11, %v3633_v1  ;;  %v3657_v27 = vsel %vm511_vm1, %v3647_v13, 0.0  ;;  %v3648_v63 = vmul.f32 %v8299_v34, %v8299_v34  ;;  %5450 = vmatpush3.bf16.msra.mxu0 %v5593_v0 }
0x10a9   :  { %3658 = vadd.xlane.f32.xlu1 %v3657_v27 }
0x10aa   :  { %v3660_v43 = vsel %vm511_vm1, %v3648_v63, 0.0  ;;  %v3649_v19 = vmul.f32 %v8304_v24, %v8304_v24 }
0x10ab   :  { %3661 = vadd.xlane.f32.xlu0 %v3660_v43 }
0x10ac   :  { %v3663_v39 = vsel %vm511_vm1, %v3649_v19, 0.0 }
0x10ad   :  { %3664 = vadd.xlane.f32.xlu1 %v3663_v39 }
0x10af   :  { %v3620_v57 = vpop.xlane.xlu0 %3619 }
0x10b0   :  { %v3634_v21 = vmul.f32 0.015625, %v3620_v57 }
0x10b1   :  { %v3623_v41 = vpop.xlane.xlu1 %3622 }
0x10b2   :  { %v8313_v2 = vsub.f32 %v3590_v7, %v3634_v21  ;;  %v3635_v32 = vmul.f32 0.015625, %v3623_v41 }
0x10b3   :  { %v3626_v30 = vpop.xlane.xlu0 %3625 }
0x10b4   :  { %v8315_v25 = vsub.f32 %v3593_v53, %v3635_v32  ;;  %v3636_v22 = vmul.f32 0.015625, %v3626_v30  ;;  %v3650_v26 = vmul.f32 %v8313_v2, %v8313_v2 }
0x10b5   :  { %v3629_v8 = vpop.xlane.xlu1 %3628 }
0x10b6   :  { %v8319_v6 = vsub.f32 %v3598_v44, %v3636_v22  ;;  %v3637_v51 = vmul.f32 0.015625, %v3629_v8  ;;  %v3666_v3 = vsel %vm511_vm1, %v3650_v26, 0.0  ;;  %v3651_v38 = vmul.f32 %v8315_v25, %v8315_v25  ;;  %v4827_v44 = vld [vmem:[%s4681_s14] ss:$0 sm:$0xff]  ;;  %s4691_s14 = sld [smem:[%s8561_s0 + %s6021_s10]]  }
0x10b7   :  { %3667 = vadd.xlane.f32.xlu0 %v3666_v3 }
0x10b8   :  { %v8324_v35 = vsub.f32 %v3601_v29, %v3637_v51  ;;  %v3669_v33 = vsel %vm511_vm1, %v3651_v38, 0.0  ;;  %v3652_v52 = vmul.f32 %v8319_v6, %v8319_v6 }
0x10b9   :  { %3670 = vadd.xlane.f32.xlu1 %v3669_v33 }
0x10ba   :  { %v3672_v60 = vsel %vm511_vm1, %v3652_v52, 0.0  ;;  %v3653_v23 = vmul.f32 %v8324_v35, %v8324_v35 }
0x10bb   :  { %3673 = vadd.xlane.f32.xlu0 %v3672_v60 }
0x10bc   :  { %v3675_v15 = vsel %vm511_vm1, %v3653_v23, 0.0 }
0x10bd   :  { %3676 = vadd.xlane.f32.xlu1 %v3675_v15 }
0x1134   :  { %v3656_v36 = vpop.xlane.xlu0 %3655 }
0x1135   :  { %v3678_v17 = vmul.f32 0.015625, %v3656_v36 }
0x1136   :  { %v3659_v46 = vpop.xlane.xlu1 %3658 }
0x1137   :  { %v3686_v56 = vadd.f32 1e-05, %v3678_v17  ;;  %v3679_v11 = vmul.f32 0.015625, %v3659_v46 }
0x1138   :  { %v3662_v62 = vpop.xlane.xlu0 %3661 }
0x1139   :  { %5876 = vrsqrt.f32 %v3686_v56  ;;  %v3687_v49 = vadd.f32 1e-05, %v3679_v11  ;;  %v3680_v58 = vmul.f32 0.015625, %v3662_v62 }
0x113a   :  { %v3665_v18 = vpop.xlane.xlu1 %3664 }
0x113b   :  { %5878 = vrsqrt.f32 %v3687_v49  ;;  %v3688_v50 = vadd.f32 1e-05, %v3680_v58  ;;  %v3681_v7 = vmul.f32 0.015625, %v3665_v18  ;;  %v4829_v18 = vld [vmem:[%s4679_s26] ss:$0 sm:$0xff] }
0x113d   :  { %5880 = vrsqrt.f32 %v3688_v50  ;;  %v3689_v28 = vadd.f32 1e-05, %v3681_v7 }
0x113f   :  { %5882 = vrsqrt.f32 %v3689_v28 }
0x1143   :  { %v5877_v42 = vpop.eup %5876 }
0x1144   :  { %v3702_v53 = vmul.f32 %v5877_v42, %v8293_v40  ;;  %v3668_v5 = vpop.xlane.xlu0 %3667 }
0x1145   :  { %v5879_v29 = vpop.eup %5878  ;;  %v3682_v20 = vmul.f32 0.015625, %v3668_v5 }
0x1146   :  { %v3703_v16 = vmul.f32 %v5879_v29, %v8295_v61  ;;  %v3671_v55 = vpop.xlane.xlu1 %3670  ;;  %v3716_v31 = vmul.f32 %v4827_v44, %v3702_v53 }
0x1147   :  { %v5881_v10 = vpop.eup %5880  ;;  %v3690_v59 = vadd.f32 1e-05, %v3682_v20  ;;  %v3683_v9 = vmul.f32 0.015625, %v3671_v55 }
0x1148   :  { %v3704_v37 = vmul.f32 %v5881_v10, %v8299_v34  ;;  %v3674_v4 = vpop.xlane.xlu0 %3673  ;;  %v3717_v14 = vmul.f32 %v4827_v44, %v3703_v16  ;;  %v3730_v1 = vadd.f32 %v4828_v48, %v3716_v31 }
0x1149   :  { %v5883_v12 = vpop.eup %5882  ;;  %5884 = vrsqrt.f32 %v3690_v59  ;;  %v3691_v13 = vadd.f32 1e-05, %v3683_v9  ;;  %v3684_v40 = vmul.f32 0.015625, %v3674_v4 }
0x114a   :  { %v3718_v27 = vmul.f32 %v4827_v44, %v3704_v37  ;;  %v3705_v63 = vmul.f32 %v5883_v12, %v8304_v24  ;;  %v3677_v43 = vpop.xlane.xlu1 %3676  ;;  %v3731_v19 = vadd.f32 %v4828_v48, %v3717_v14  ;;  %v3738_v41 = vmax.f32 %v3730_v1, 0.0 }
0x114b   :  { %5886 = vrsqrt.f32 %v3691_v13  ;;  %v3692_v61 = vadd.f32 1e-05, %v3684_v40  ;;  %v3685_v39 = vmul.f32 0.015625, %v3677_v43 }
0x114c   :  { %v3732_v57 = vadd.f32 %v4828_v48, %v3718_v27  ;;  %v3719_v21 = vmul.f32 %v4827_v44, %v3705_v63  ;;  %v3739_v32 = vmax.f32 %v3731_v19, 0.0 }
0x114d   :  { %5888 = vrsqrt.f32 %v3692_v61  ;;  %v3693_v34 = vadd.f32 1e-05, %v3685_v39 }
0x114e   :  { %v3733_v30 = vadd.f32 %v4828_v48, %v3719_v21  ;;  %v3754_v22 = vpack.c.bf16 %v3739_v32, %v3738_v41  ;;  %v3740_v26 = vmax.f32 %v3732_v57, 0.0 }
0x114f   :  { %5890 = vrsqrt.f32 %v3693_v34 }
0x1150   :  { %v3741_v8 = vmax.f32 %v3733_v30, 0.0  ;;  %5451 = vmatprep.mubr.msk.bf16.mxu0 %vm511_vm1, %v3754_v22 }
0x1152   :  { %v3755_v51 = vpack.c.bf16 %v3741_v8, %v3740_v26  ;;  %v3868_v8 = vld [vmem:[%s4675_s30] sm:$0x1] }
0x1153   :  { %v5885_v24 = vpop.eup %5884 }
0x1154   :  { %v3706_v3 = vmul.f32 %v5885_v24, %v8313_v2  ;;  %5452 = vmatmul.mubr.msk.bf16.vlgmr.msra.gmra.mrb[128].mxu0 %vm511_vm1, %v3755_v51 }
0x1155   :  { %v5887_v38 = vpop.eup %5886 }
0x1156   :  { %v3707_v33 = vmul.f32 %v5887_v38, %v8315_v25  ;;  %v3720_v52 = vmul.f32 %v4827_v44, %v3706_v3  ;;  %v8829_v3 = vld [vmem:[#allocation13_spill] sm:$0xff] }
0x1157   :  { %v5889_v60 = vpop.eup %5888 }
0x1158   :  { %v3708_v23 = vmul.f32 %v5889_v60, %v8319_v6  ;;  %v3721_v15 = vmul.f32 %v4827_v44, %v3707_v33  ;;  %v3734_v54 = vadd.f32 %v4828_v48, %v3720_v52  ;;  %v5594_v6 = vld [vmem:[%s4689_s22] sm:$0xff]  }
0x1159   :  { %v5891_v47 = vpop.eup %5890  ;;  %5459 = vmatprep.subr.bf16.mxu1 %v5594_v6 }
0x115a   :  { %v3709_v45 = vmul.f32 %v5891_v47, %v8324_v35  ;;  %v3735_v0 = vadd.f32 %v4828_v48, %v3721_v15  ;;  %v3722_v36 = vmul.f32 %v4827_v44, %v3708_v23  ;;  %v3742_v17 = vmax.f32 %v3734_v54, 0.0  ;;  %v5595_v35 = vld [vmem:[%s4689_s22 + $0x8] sm:$0xff]   ;;  %5460 = vmatpush3.bf16.msra.mxu1 %v5594_v6  ;;  %s8543_s22 = sld [smem:[%s8561_s0 + %s6023_s19]]  }
0x115b   :  { %5461 = vmatprep.subr.bf16.mxu1 %v5595_v35 }
0x115c   :  { %v3743_v46 = vmax.f32 %v3735_v0, 0.0  ;;  %v3723_v56 = vmul.f32 %v4827_v44, %v3709_v45  ;;  %v3736_v2 = vadd.f32 %v4828_v48, %v3722_v36 }
0x115e   :  { %v3756_v11 = vpack.c.bf16 %v3743_v46, %v3742_v17  ;;  %v3737_v62 = vadd.f32 %v4828_v48, %v3723_v56  ;;  %v3744_v25 = vmax.f32 %v3736_v2, 0.0  ;;  %5462 = vmatpush3.bf16.msra.mxu1 %v5595_v35 }
0x1160   :  { %5455 = vmatprep.mubr.msk.bf16.mxu0 %vm511_vm1, %v3756_v11  ;;  %v3745_v49 = vmax.f32 %v3737_v62, 0.0 }
0x1162   :  { %v3757_v58 = vpack.c.bf16 %v3745_v49, %v3744_v25 }
0x1164   :  { %5456 = vmatmul.mubr.msk.bf16.gmra.mrb[132].mxu0 %vm511_vm1, %v3757_v58 }
0x1227   :  { %v5453_v50 = vpop.f32.mrb[128].mxu0 }
0x1228   :  { %v3835_v7 = vpop.f32.mrb[129].mxu0  ;;  %v3844_v53 = vadd.f32 %v5453_v50, %v4829_v18 }
0x1229   :  { %v3836_v28 = vadd.f32 %v4829_v18, %v3835_v7  ;;  %v5454_v42 = vpop.f32.mrb[130].mxu0 }
0x122a   :  { %v3838_v44 = vpop.f32.mrb[131].mxu0  ;;  %v3847_v48 = vadd.f32 %v5454_v42, %v4829_v18  ;;  %v3872_v55 = vsel %vm819_vm2, %v3844_v53, 0.0 }
0x122b   :  { %v3839_v5 = vadd.f32 %v4829_v18, %v3838_v44  ;;  %v3869_v29 = vsel %vm819_vm2, %v3836_v28, 0.0 }
0x122c   :  { %v3874_v10 = vsel %vm819_vm2, %v3847_v48, 0.0 }
0x122d   :  { %v3870_v20 = vsel %vm819_vm2, %v3839_v5, 0.0 }
0x122e   :  { %v3871_v16 = vadd.f32 %v3870_v20, %v3869_v29 }
0x1230   :  { %v3873_v31 = vadd.f32 %v3872_v55, %v3871_v16 }
0x1232   :  { %v3875_v59 = vadd.f32 %v3874_v10, %v3873_v31 }
0x1237   :  { %v5457_v9 = vpop.f32.mrb[132].mxu0 }
0x1238   :  { %v3851_v37 = vpop.f32.mrb[133].mxu0  ;;  %v3860_v12 = vadd.f32 %v5457_v9, %v4829_v18 }
0x1239   :  { %v3852_v4 = vadd.f32 %v4829_v18, %v3851_v37  ;;  %v5458_v14 = vpop.f32.mrb[134].mxu0 }
0x123a   :  { %v3854_v1 = vpop.f32.mrb[135].mxu0  ;;  %v3863_v63 = vadd.f32 %v5458_v14, %v4829_v18  ;;  %v3880_v61 = vsel %vm819_vm2, %v3860_v12, 0.0 }
0x123b   :  { %v3876_v13 = vsel %vm819_vm2, %v3852_v4, 0.0  ;;  %v3855_v40 = vadd.f32 %v4829_v18, %v3854_v1 }
0x123c   :  { %v3877_v27 = vadd.f32 %v3876_v13, %v3875_v59  ;;  %v3882_v57 = vsel %vm819_vm2, %v3863_v63, 0.0 }
0x123d   :  { %v3878_v43 = vsel %vm819_vm2, %v3855_v40, 0.0 }
0x123e   :  { %v3879_v19 = vadd.f32 %v3878_v43, %v3877_v27  ;;  %v4839_v27 = vld [vmem:[%s4676_s7] ss:$0 sm:$0xff] }
0x1240   :  { %v3881_v39 = vadd.f32 %v3880_v61, %v3879_v19 }
0x1242   :  { %v3883_v21 = vadd.f32 %v3882_v57, %v3881_v39 }
0x1244   :  { %v3884_v41 = vrot.slane %v3883_v21, 4 }
0x1246   :  { %v3885_v32 = vadd.f32 %v3884_v41, %v3883_v21 }
0x1248   :  { %v3886_v34 = vrot.slane %v3885_v32, 2 }
0x124a   :  { %v3887_v30 = vadd.f32 %v3886_v34, %v3885_v32 }
0x124c   :  { %v3888_v22 = vrot.slane %v3887_v30, 1 }
0x124e   :  { %v3889_v26 = vadd.f32 %v3888_v22, %v3887_v30 }
0x1250   :  { %v3890_v51 = vmul.f32 0.015625, %v3889_v26 }
0x1252   :  { %v3891_v24 = vmul.f32 %v3890_v51, %v3868_v8 }
0x1254   :  { %v3896_v38 = vrot.slane %v3891_v24, %v8829_v3 }
0x1256   :  { %v3898_v33 = vsub.f32 %v3836_v28, %v3896_v38  ;;  %v3899_v52 = vsub.f32 %v3839_v5, %v3896_v38  ;;  %v3900_v60 = vsub.f32 %v3844_v53, %v3896_v38  ;;  %v3901_v23 = vsub.f32 %v3847_v48, %v3896_v38 }
0x1257   :  { %v3902_v15 = vsub.f32 %v3852_v4, %v3896_v38  ;;  %v3903_v54 = vsub.f32 %v3855_v40, %v3896_v38  ;;  %v3904_v47 = vsub.f32 %v3860_v12, %v3896_v38  ;;  %v3905_v45 = vsub.f32 %v3863_v63, %v3896_v38  ;;  %v4838_v4 = vld [vmem:[%s4677_s3] ss:$0 sm:$0xff] }
0x1258   :  { %v3906_v0 = vmul.f32 %v3898_v33, %v3898_v33  ;;  %v3907_v36 = vmul.f32 %v3899_v52, %v3899_v52  ;;  %v3908_v17 = vmul.f32 %v3900_v60, %v3900_v60  ;;  %v3909_v46 = vmul.f32 %v3901_v23, %v3901_v23 }
0x1259   :  { %v3910_v62 = vmul.f32 %v3902_v15, %v3902_v15  ;;  %v3911_v58 = vmul.f32 %v3903_v54, %v3903_v54  ;;  %v3912_v18 = vmul.f32 %v3904_v47, %v3904_v47  ;;  %v3913_v28 = vmul.f32 %v3905_v45, %v3905_v45 }
0x125a   :  { %v3914_v56 = vsel %vm819_vm2, %v3906_v0, 0.0  ;;  %v3915_v2 = vsel %vm819_vm2, %v3907_v36, 0.0  ;;  %v3917_v25 = vsel %vm819_vm2, %v3908_v17, 0.0  ;;  %v3919_v6 = vsel %vm819_vm2, %v3909_v46, 0.0 }
0x125b   :  { %v3916_v11 = vadd.f32 %v3915_v2, %v3914_v56  ;;  %v3921_v50 = vsel %vm819_vm2, %v3910_v62, 0.0  ;;  %v3923_v42 = vsel %vm819_vm2, %v3911_v58, 0.0  ;;  %v3925_v53 = vsel %vm819_vm2, %v3912_v18, 0.0 }
0x125c   :  { %v3927_v29 = vsel %vm819_vm2, %v3913_v28, 0.0  ;;  %v3945_v14 = vmul.f32 %v4838_v4, %v3901_v23  ;;  %v3947_v1 = vmul.f32 %v4838_v4, %v3903_v54  ;;  %v3942_v12 = vmul.f32 %v4838_v4, %v3898_v33 }
0x125d   :  { %v3918_v49 = vadd.f32 %v3917_v25, %v3916_v11  ;;  %v3943_v13 = vmul.f32 %v4838_v4, %v3899_v52  ;;  %v3944_v63 = vmul.f32 %v4838_v4, %v3900_v60  ;;  %v3946_v43 = vmul.f32 %v4838_v4, %v3902_v15  ;;  %v4840_v11 = vld [vmem:[%s4686_s11] ss:$0 sm:$0xff] }
0x125e   :  { %v3948_v19 = vmul.f32 %v4838_v4, %v3904_v47  ;;  %v3949_v61 = vmul.f32 %v4838_v4, %v3905_v45 }
0x125f   :  { %v3920_v35 = vadd.f32 %v3919_v6, %v3918_v49 }
0x1261   :  { %v3922_v7 = vadd.f32 %v3921_v50, %v3920_v35 }
0x1263   :  { %v3924_v44 = vadd.f32 %v3923_v42, %v3922_v7 }
0x1265   :  { %v3926_v5 = vadd.f32 %v3925_v53, %v3924_v44 }
0x1267   :  { %v3928_v48 = vadd.f32 %v3927_v29, %v3926_v5 }
0x1269   :  { %v3929_v20 = vrot.slane %v3928_v48, 4 }
0x126b   :  { %v3930_v16 = vadd.f32 %v3929_v20, %v3928_v48 }
0x126d   :  { %v3931_v55 = vrot.slane %v3930_v16, 2 }
0x126f   :  { %v3932_v31 = vadd.f32 %v3931_v55, %v3930_v16 }
0x1271   :  { %v3933_v10 = vrot.slane %v3932_v31, 1 }
0x1273   :  { %v3934_v59 = vadd.f32 %v3933_v10, %v3932_v31 }
0x1275   :  { %v3935_v9 = vmul.f32 0.015625, %v3934_v59 }
0x1277   :  { %v3950_v37 = vadd.f32 1e-05, %v3935_v9 }
0x1279   :  { %5892 = vrsqrt.f32 %v3950_v37 }
0x1283   :  { %v5893_v40 = vpop.eup %5892 }
0x1284   :  { %v3955_v39 = vmul.f32 %v5893_v40, %v3945_v14  ;;  %v3957_v57 = vmul.f32 %v5893_v40, %v3947_v1  ;;  %v3952_v21 = vmul.f32 %v5893_v40, %v3942_v12  ;;  %v3953_v41 = vmul.f32 %v5893_v40, %v3943_v13 }
0x1285   :  { %v3954_v32 = vmul.f32 %v5893_v40, %v3944_v63  ;;  %v3956_v34 = vmul.f32 %v5893_v40, %v3946_v43  ;;  %v3958_v30 = vmul.f32 %v5893_v40, %v3948_v19  ;;  %v3959_v22 = vmul.f32 %v5893_v40, %v3949_v61 }
0x1286   :  { %v3971_v26 = vadd.f32 %v4839_v27, %v3957_v57  ;;  %v3966_v8 = vadd.f32 %v4839_v27, %v3952_v21  ;;  %v3967_v51 = vadd.f32 %v4839_v27, %v3953_v41  ;;  %v3969_v24 = vadd.f32 %v4839_v27, %v3955_v39 }
0x1287   :  { %v3968_v3 = vadd.f32 %v4839_v27, %v3954_v32  ;;  %v3970_v38 = vadd.f32 %v4839_v27, %v3956_v34  ;;  %v3972_v33 = vadd.f32 %v4839_v27, %v3958_v30  ;;  %v3973_v52 = vadd.f32 %v4839_v27, %v3959_v22 }
0x1288   :  { %v3979_v60 = vmax.f32 %v3971_v26, 0.0  ;;  %v3974_v23 = vmax.f32 %v3966_v8, 0.0  ;;  %v3975_v15 = vmax.f32 %v3967_v51, 0.0  ;;  %v3977_v54 = vmax.f32 %v3969_v24, 0.0 }
0x1289   :  { %v3976_v47 = vmax.f32 %v3968_v3, 0.0  ;;  %v3978_v45 = vmax.f32 %v3970_v38, 0.0  ;;  %v3980_v0 = vmax.f32 %v3972_v33, 0.0  ;;  %v3981_v36 = vmax.f32 %v3973_v52, 0.0 }
0x128a   :  { %v3986_v17 = vpack.c.bf16 %v3975_v15, %v3974_v23 }
0x128b   :  { %v3987_v46 = vpack.c.bf16 %v3977_v54, %v3976_v47  ;;  %v3988_v56 = vpack.c.bf16 %v3979_v60, %v3978_v45  ;;  %v3989_v2 = vpack.c.bf16 %v3981_v36, %v3980_v0 }
0x128c   :  { %5463 = vmatprep.mubr.msk.bf16.mxu1 %vm819_vm2, %v3986_v17 }
0x128d   :  { %5464 = vmatmul.mubr.msk.bf16.vlgmr.msra.gmra.mrb[120].mxu1 %vm819_vm2, %v3987_v46 }
0x128e   :  { %5467 = vmatprep.mubr.msk.bf16.mxu1 %vm819_vm2, %v3988_v56 }
0x1295   :  { %5468 = vmatmul.mubr.msk.bf16.gmra.mrb[124].mxu1 %vm819_vm2, %v3989_v2 }
0x1360   :  { %v5465_v62 = vpop.f32.mrb[120].mxu1 }
0x1361   :  { %v4055_v25 = vpop.f32.mrb[121].mxu1  ;;  %v4064_v35 = vadd.f32 %v5465_v62, %v4840_v11  ;;  %v5596_v62 = vld [vmem:[%s4693_s16] sm:$0xff]  }
0x1362   :  { %v4056_v49 = vadd.f32 %v4840_v11, %v4055_v25  ;;  %v5466_v58 = vpop.f32.mrb[122].mxu1  ;;  %v5597_v25 = vld [vmem:[%s4693_s16 + $0x8] sm:$0xff]   ;;  %5471 = vmatprep.subr.bf16.mxu0 %v5596_v62 }
0x1363   :  { %v4058_v6 = vpop.f32.mrb[123].mxu1  ;;  %v4067_v7 = vadd.f32 %v5466_v58, %v4840_v11  ;;  %v4094_v44 = vsel %vm819_vm2, %v4064_v35, 0.0  ;;  %5472 = vmatpush3.bf16.msra.mxu0 %v5596_v62 }
0x1364   :  { %v4059_v18 = vadd.f32 %v4840_v11, %v4058_v6  ;;  %v4088_v50 = vsel %vm819_vm2, %v4056_v49, 0.0  ;;  %5473 = vmatprep.subr.bf16.mxu0 %v5597_v25 }
0x1365   :  { %4089 = vadd.xlane.f32.xlu0 %v4088_v50  ;;  %v4097_v48 = vsel %vm819_vm2, %v4067_v7, 0.0 }
0x1366   :  { %v4091_v28 = vsel %vm819_vm2, %v4059_v18, 0.0 }
0x1367   :  { %4092 = vadd.xlane.f32.xlu1 %v4091_v28  ;;  %5474 = vmatpush3.bf16.msra.mxu0 %v5597_v25 }
0x1368   :  { %v5469_v42 = vpop.f32.mrb[124].mxu1 }
0x1369   :  { %v4071_v53 = vpop.f32.mrb[125].mxu1  ;;  %4095 = vadd.xlane.f32.xlu0 %v4094_v44  ;;  %v4080_v16 = vadd.f32 %v5469_v42, %v4840_v11 }
0x136a   :  { %v4072_v5 = vadd.f32 %v4840_v11, %v4071_v53  ;;  %v5470_v29 = vpop.f32.mrb[126].mxu1 }
0x136b   :  { %v4074_v20 = vpop.f32.mrb[127].mxu1  ;;  %4098 = vadd.xlane.f32.xlu1 %v4097_v48  ;;  %v4083_v10 = vadd.f32 %v5470_v29, %v4840_v11  ;;  %v4106_v9 = vsel %vm819_vm2, %v4080_v16, 0.0 }
0x136c   :  { %v4075_v55 = vadd.f32 %v4840_v11, %v4074_v20  ;;  %v4100_v31 = vsel %vm819_vm2, %v4072_v5, 0.0 }
0x136d   :  { %4101 = vadd.xlane.f32.xlu0 %v4100_v31  ;;  %v4109_v37 = vsel %vm819_vm2, %v4083_v10, 0.0 }
0x136e   :  { %v4103_v59 = vsel %vm819_vm2, %v4075_v55, 0.0 }
0x136f   :  { %4104 = vadd.xlane.f32.xlu1 %v4103_v59 }
0x1371   :  { %4107 = vadd.xlane.f32.xlu0 %v4106_v9 }
0x1373   :  { %4110 = vadd.xlane.f32.xlu1 %v4109_v37 }
0x13f2   :  { %v4090_v4 = vpop.xlane.xlu0 %4089 }
0x13f3   :  { %v4113_v14 = vmul.f32 0.03125, %v4090_v4  ;;  %v4847_v4 = vld [vmem:[%s4688_s20] ss:$0 sm:$0xff] }
0x13f4   :  { %v4093_v1 = vpop.xlane.xlu1 %4092 }
0x13f5   :  { %v8401_v12 = vsub.f32 %v4056_v49, %v4113_v14  ;;  %v4114_v13 = vmul.f32 0.03125, %v4093_v1 }
0x13f6   :  { %v4096_v40 = vpop.xlane.xlu0 %4095 }
0x13f7   :  { %v8403_v27 = vsub.f32 %v4059_v18, %v4114_v13  ;;  %v4115_v63 = vmul.f32 0.03125, %v4096_v40  ;;  %v4129_v43 = vmul.f32 %v8401_v12, %v8401_v12 }
0x13f8   :  { %v4099_v19 = vpop.xlane.xlu1 %4098 }
0x13f9   :  { %v8407_v61 = vsub.f32 %v4064_v35, %v4115_v63  ;;  %v4116_v39 = vmul.f32 0.03125, %v4099_v19  ;;  %v4137_v57 = vsel %vm819_vm2, %v4129_v43, 0.0  ;;  %v4130_v21 = vmul.f32 %v8403_v27, %v8403_v27  ;;  %v4848_v63 = vld [vmem:[%s4687_s24] ss:$0 sm:$0xff] }
0x13fa   :  { %4138 = vadd.xlane.f32.xlu0 %v4137_v57  ;;  %v4102_v41 = vpop.xlane.xlu0 %4101 }
0x13fb   :  { %v8412_v32 = vsub.f32 %v4067_v7, %v4116_v39  ;;  %v4117_v34 = vmul.f32 0.03125, %v4102_v41  ;;  %v4140_v30 = vsel %vm819_vm2, %v4130_v21, 0.0  ;;  %v4131_v22 = vmul.f32 %v8407_v61, %v8407_v61 }
0x13fc   :  { %4141 = vadd.xlane.f32.xlu1 %v4140_v30  ;;  %v4105_v26 = vpop.xlane.xlu1 %4104 }
0x13fd   :  { %v8417_v8 = vsub.f32 %v4072_v5, %v4117_v34  ;;  %v4118_v51 = vmul.f32 0.03125, %v4105_v26  ;;  %v4143_v24 = vsel %vm819_vm2, %v4131_v22, 0.0  ;;  %v4132_v3 = vmul.f32 %v8412_v32, %v8412_v32 }
0x13fe   :  { %4144 = vadd.xlane.f32.xlu0 %v4143_v24  ;;  %v4108_v38 = vpop.xlane.xlu0 %4107 }
0x13ff   :  { %v8422_v33 = vsub.f32 %v4075_v55, %v4118_v51  ;;  %v4119_v52 = vmul.f32 0.03125, %v4108_v38  ;;  %v4146_v60 = vsel %vm819_vm2, %v4132_v3, 0.0  ;;  %v4133_v23 = vmul.f32 %v8417_v8, %v8417_v8 }
0x1400   :  { %4147 = vadd.xlane.f32.xlu1 %v4146_v60  ;;  %v4111_v15 = vpop.xlane.xlu1 %4110 }
0x1401   :  { %v8427_v54 = vsub.f32 %v4080_v16, %v4119_v52  ;;  %v4120_v47 = vmul.f32 0.03125, %v4111_v15  ;;  %v4149_v45 = vsel %vm819_vm2, %v4133_v23, 0.0  ;;  %v4134_v0 = vmul.f32 %v8422_v33, %v8422_v33 }
0x1402   :  { %4150 = vadd.xlane.f32.xlu0 %v4149_v45 }
0x1403   :  { %v8432_v36 = vsub.f32 %v4083_v10, %v4120_v47  ;;  %v4152_v17 = vsel %vm819_vm2, %v4134_v0, 0.0  ;;  %v4135_v46 = vmul.f32 %v8427_v54, %v8427_v54 }
0x1404   :  { %4153 = vadd.xlane.f32.xlu1 %v4152_v17 }
0x1405   :  { %v4155_v56 = vsel %vm819_vm2, %v4135_v46, 0.0  ;;  %v4136_v2 = vmul.f32 %v8432_v36, %v8432_v36 }
0x1406   :  { %4156 = vadd.xlane.f32.xlu0 %v4155_v56 }
0x1407   :  { %v4158_v11 = vsel %vm819_vm2, %v4136_v2, 0.0 }
0x1408   :  { %4159 = vadd.xlane.f32.xlu1 %v4158_v11 }
0x1487   :  { %v4139_v49 = vpop.xlane.xlu0 %4138 }
0x1488   :  { %v4161_v58 = vmul.f32 0.03125, %v4139_v49 }
0x1489   :  { %v4142_v6 = vpop.xlane.xlu1 %4141 }
0x148a   :  { %v4169_v35 = vadd.f32 1e-05, %v4161_v58  ;;  %v4162_v18 = vmul.f32 0.03125, %v4142_v6 }
0x148b   :  { %v4145_v50 = vpop.xlane.xlu0 %4144 }
0x148c   :  { %5894 = vrsqrt.f32 %v4169_v35  ;;  %v4170_v7 = vadd.f32 1e-05, %v4162_v18  ;;  %v4163_v28 = vmul.f32 0.03125, %v4145_v50 }
0x148d   :  { %v4148_v42 = vpop.xlane.xlu1 %4147 }
0x148e   :  { %5896 = vrsqrt.f32 %v4170_v7  ;;  %v4171_v44 = vadd.f32 1e-05, %v4163_v28  ;;  %v4164_v53 = vmul.f32 0.03125, %v4148_v42 }
0x148f   :  { %v4151_v5 = vpop.xlane.xlu0 %4150 }
0x1490   :  { %5898 = vrsqrt.f32 %v4171_v44  ;;  %v4172_v29 = vadd.f32 1e-05, %v4164_v53  ;;  %v4165_v48 = vmul.f32 0.03125, %v4151_v5 }
0x1491   :  { %v4154_v20 = vpop.xlane.xlu1 %4153 }
0x1492   :  { %5900 = vrsqrt.f32 %v4172_v29  ;;  %v4173_v16 = vadd.f32 1e-05, %v4165_v48  ;;  %v4166_v55 = vmul.f32 0.03125, %v4154_v20 }
0x1493   :  { %v4157_v31 = vpop.xlane.xlu0 %4156 }
0x1494   :  { %5902 = vrsqrt.f32 %v4173_v16  ;;  %v4174_v10 = vadd.f32 1e-05, %v4166_v55  ;;  %v4167_v59 = vmul.f32 0.03125, %v4157_v31 }
0x1495   :  { %v4160_v9 = vpop.xlane.xlu1 %4159 }
0x1496   :  { %v5895_v37 = vpop.eup %5894  ;;  %5904 = vrsqrt.f32 %v4174_v10  ;;  %v4175_v14 = vadd.f32 1e-05, %v4167_v59  ;;  %v4168_v1 = vmul.f32 0.03125, %v4160_v9 }
0x1497   :  { %v4185_v13 = vmul.f32 %v5895_v37, %v8401_v12 }
0x1498   :  { %v5897_v40 = vpop.eup %5896  ;;  %5906 = vrsqrt.f32 %v4175_v14  ;;  %v4176_v43 = vadd.f32 1e-05, %v4168_v1 }
0x1499   :  { %v4186_v19 = vmul.f32 %v5897_v40, %v8403_v27  ;;  %v4199_v39 = vmul.f32 %v4847_v4, %v4185_v13 }
0x149a   :  { %v5899_v57 = vpop.eup %5898  ;;  %5908 = vrsqrt.f32 %v4176_v43 }
0x149b   :  { %v4187_v21 = vmul.f32 %v5899_v57, %v8407_v61  ;;  %v4200_v41 = vmul.f32 %v4847_v4, %v4186_v19  ;;  %v4213_v34 = vadd.f32 %v4848_v63, %v4199_v39 }
0x149c   :  { %v5901_v30 = vpop.eup %5900 }
0x149d   :  { %v4201_v22 = vmul.f32 %v4847_v4, %v4187_v21  ;;  %v4188_v26 = vmul.f32 %v5901_v30, %v8412_v32  ;;  %v4214_v51 = vadd.f32 %v4848_v63, %v4200_v41  ;;  %v4221_v12 = vmax.f32 %v4213_v34, 0.0 }
0x149e   :  { %v5903_v24 = vpop.eup %5902 }
0x149f   :  { %v4215_v3 = vadd.f32 %v4848_v63, %v4201_v22  ;;  %v4202_v38 = vmul.f32 %v4847_v4, %v4188_v26  ;;  %v4189_v52 = vmul.f32 %v5903_v24, %v8417_v8  ;;  %v4222_v60 = vmax.f32 %v4214_v51, 0.0 }
0x14a0   :  { %v5905_v27 = vpop.eup %5904 }
0x14a1   :  { %v4216_v23 = vadd.f32 %v4848_v63, %v4202_v38  ;;  %v4190_v15 = vmul.f32 %v5905_v27, %v8422_v33  ;;  %v4233_v47 = vpack.c.bf16 %v4222_v60, %v4221_v12  ;;  %v4203_v45 = vmul.f32 %v4847_v4, %v4189_v52 }
0x14a2   :  { %v5907_v61 = vpop.eup %5906  ;;  %v4223_v0 = vmax.f32 %v4215_v3, 0.0 }
0x14a3   :  { %v4224_v17 = vmax.f32 %v4216_v23, 0.0  ;;  %v4191_v46 = vmul.f32 %v5907_v61, %v8427_v54  ;;  %5475 = vmatprep.mubr.msk.bf16.mxu0 %vm819_vm2, %v4233_v47  ;;  %v4204_v32 = vmul.f32 %v4847_v4, %v4190_v15  ;;  %v4217_v2 = vadd.f32 %v4848_v63, %v4203_v45 }
0x14a4   :  { %v5909_v56 = vpop.eup %5908 }
0x14a5   :  { %v4192_v11 = vmul.f32 %v5909_v56, %v8432_v36  ;;  %v4234_v8 = vpack.c.bf16 %v4224_v17, %v4223_v0  ;;  %v4218_v62 = vadd.f32 %v4848_v63, %v4204_v32  ;;  %v4205_v25 = vmul.f32 %v4847_v4, %v4191_v46  ;;  %v4849_v36 = vld [vmem:[%s4690_s28] ss:$0 sm:$0xff] }
0x14a6   :  { %v4225_v33 = vmax.f32 %v4217_v2, 0.0 }
0x14a7   :  { %5476 = vmatmul.mubr.msk.bf16.vlgmr.msra.gmra.mrb[136].mxu0 %vm819_vm2, %v4234_v8  ;;  %v4226_v49 = vmax.f32 %v4218_v62, 0.0  ;;  %v4206_v58 = vmul.f32 %v4847_v4, %v4192_v11  ;;  %v4219_v6 = vadd.f32 %v4848_v63, %v4205_v25 }
0x14a9   :  { %v4235_v35 = vpack.c.bf16 %v4226_v49, %v4225_v33  ;;  %v4220_v18 = vadd.f32 %v4848_v63, %v4206_v58  ;;  %v4227_v54 = vmax.f32 %v4219_v6, 0.0 }
0x14ab   :  { %5479 = vmatprep.mubr.msk.bf16.mxu0 %vm819_vm2, %v4235_v35  ;;  %v4228_v50 = vmax.f32 %v4220_v18, 0.0 }
0x14ad   :  { %v4236_v7 = vpack.c.bf16 %v4228_v50, %v4227_v54 }
0x14af   :  { %5480 = vmatmul.mubr.msk.bf16.gmra.mrb[140].mxu0 %vm819_vm2, %v4236_v7 }
0x157a   :  { %v5477_v28 = vpop.f32.mrb[136].mxu0 }
0x157b   :  { %v4302_v42 = vpop.f32.mrb[137].mxu0  ;;  %v4311_v29 = vadd.f32 %v5477_v28, %v4849_v36  ;;  %v5598_v28 = vld [vmem:[%s4694_s2] sm:$0xff]  }
0x157c   :  { %v4303_v44 = vadd.f32 %v4849_v36, %v4302_v42  ;;  %v5478_v53 = vpop.f32.mrb[138].mxu0  ;;  %v5599_v42 = vld [vmem:[%s4694_s2 + $0x8] sm:$0xff]   ;;  %5483 = vmatprep.subr.bf16.mxu1 %v5598_v28 }
0x157d   :  { %v4305_v5 = vpop.f32.mrb[139].mxu0  ;;  %v4314_v16 = vadd.f32 %v5478_v53, %v4849_v36  ;;  %v4341_v10 = vsel %vm819_vm2, %v4311_v29, 0.0  ;;  %5484 = vmatpush3.bf16.msra.mxu1 %v5598_v28  ;;  %v4580_v53 = vld [vmem:[%s4650_s5 + $0x8] sm:$0xff] }
0x157e   :  { %v4306_v48 = vadd.f32 %v4849_v36, %v4305_v5  ;;  %v4335_v20 = vsel %vm819_vm2, %v4303_v44, 0.0  ;;  %5485 = vmatprep.subr.bf16.mxu1 %v5599_v42  ;;  %v4581_v5 = vld [vmem:[%s4650_s5 + $0x10] sm:$0xff] }
0x157f   :  { %4336 = vadd.xlane.f32.xlu0 %v4335_v20  ;;  %v4344_v4 = vsel %vm819_vm2, %v4314_v16, 0.0  ;;  %v4583_v20 = vld [vmem:[%s4650_s5 + $0x20] sm:$0xff] }
0x1580   :  { %v4338_v55 = vsel %vm819_vm2, %v4306_v48, 0.0 }
0x1581   :  { %4339 = vadd.xlane.f32.xlu1 %v4338_v55  ;;  %5486 = vmatpush3.bf16.msra.mxu1 %v5599_v42  ;;  %v4585_v55 = vld [vmem:[%s4650_s5 + $0x30] sm:$0xff] }
0x1582   :  { %v5481_v31 = vpop.f32.mrb[140].mxu0 }
0x1583   :  { %4342 = vadd.xlane.f32.xlu0 %v4341_v10  ;;  %v4318_v59 = vpop.f32.mrb[141].mxu0  ;;  %v4327_v1 = vadd.f32 %v5481_v31, %v4849_v36  ;;  %v4586_v31 = vld [vmem:[%s4650_s5 + $0x38] sm:$0xff] }
0x1584   :  { %v4319_v9 = vadd.f32 %v4849_v36, %v4318_v59  ;;  %v5482_v37 = vpop.f32.mrb[142].mxu0 }
0x1585   :  { %4345 = vadd.xlane.f32.xlu1 %v4344_v4  ;;  %v4321_v14 = vpop.f32.mrb[143].mxu0  ;;  %v4330_v63 = vadd.f32 %v5482_v37, %v4849_v36  ;;  %v4353_v19 = vsel %vm819_vm2, %v4327_v1, 0.0 }
0x1586   :  { %v4322_v13 = vadd.f32 %v4849_v36, %v4321_v14  ;;  %v4347_v40 = vsel %vm819_vm2, %v4319_v9, 0.0 }
0x1587   :  { %4348 = vadd.xlane.f32.xlu0 %v4347_v40  ;;  %v4356_v39 = vsel %vm819_vm2, %v4330_v63, 0.0 }
0x1588   :  { %v4350_v43 = vsel %vm819_vm2, %v4322_v13, 0.0 }
0x1589   :  { %4351 = vadd.xlane.f32.xlu1 %v4350_v43 }
0x158b   :  { %4354 = vadd.xlane.f32.xlu0 %v4353_v19 }
0x158d   :  { %4357 = vadd.xlane.f32.xlu1 %v4356_v39 }
0x160c   :  { %v4337_v57 = vpop.xlane.xlu0 %4336 }
0x160d   :  { %v4359_v21 = vmul.f32 0.03125, %v4337_v57 }
0x160e   :  { %v4340_v41 = vpop.xlane.xlu1 %4339 }
0x160f   :  { %v8473_v34 = vsub.f32 %v4303_v44, %v4359_v21  ;;  %v4360_v30 = vmul.f32 0.03125, %v4340_v41  ;;  %v6018_v44 = vmov 0  }
0x1610   :  { %v4343_v22 = vpop.xlane.xlu0 %4342  ;;  %5545 = vset.pattern.permute.xlu1 %v6018_v44  ;;  %5544 = vset.pattern.permute.xlu0 %v6018_v44 }
0x1611   :  { %v8475_v26 = vsub.f32 %v4306_v48, %v4360_v30  ;;  %v4361_v51 = vmul.f32 0.03125, %v4343_v22  ;;  %v4375_v24 = vmul.f32 %v8473_v34, %v8473_v34  ;;  %v4582_v48 = vld [vmem:[%s4650_s5 + $0x18] sm:$0xff] }
0x1612   :  { %v4346_v12 = vpop.xlane.xlu1 %4345 }
0x1613   :  { %v8479_v3 = vsub.f32 %v4311_v29, %v4361_v51  ;;  %v4362_v38 = vmul.f32 0.03125, %v4346_v12  ;;  %v4383_v52 = vsel %vm819_vm2, %v4375_v24, 0.0  ;;  %v4376_v60 = vmul.f32 %v8475_v26, %v8475_v26  ;;  %v4579_v29 = vld [vmem:[%s4650_s5] sm:$0xff] }
0x1614   :  { %4384 = vadd.xlane.f32.xlu0 %v4383_v52  ;;  %v4349_v27 = vpop.xlane.xlu0 %4348  ;;  %v4856_v52 = vld [vmem:[%s4692_s9] ss:$0 sm:$0xff] }
0x1615   :  { %v8484_v23 = vsub.f32 %v4314_v16, %v4362_v38  ;;  %v4363_v15 = vmul.f32 0.03125, %v4349_v27  ;;  %v4386_v47 = vsel %vm819_vm2, %v4376_v60, 0.0  ;;  %v4377_v61 = vmul.f32 %v8479_v3, %v8479_v3  ;;  %v4584_v16 = vld [vmem:[%s4650_s5 + $0x28] sm:$0xff] }
0x1616   :  { %4387 = vadd.xlane.f32.xlu1 %v4386_v47  ;;  %v4352_v45 = vpop.xlane.xlu1 %4351 }
0x1617   :  { %v8489_v0 = vsub.f32 %v4319_v9, %v4363_v15  ;;  %v4364_v17 = vmul.f32 0.03125, %v4352_v45  ;;  %v4389_v46 = vsel %vm819_vm2, %v4377_v61, 0.0  ;;  %v4378_v32 = vmul.f32 %v8484_v23, %v8484_v23  ;;  %v4857_v61 = vld [vmem:[%s4691_s14] ss:$0 sm:$0xff] }
0x1618   :  { %4390 = vadd.xlane.f32.xlu0 %v4389_v46  ;;  %v4355_v56 = vpop.xlane.xlu0 %4354 }
0x1619   :  { %v8494_v2 = vsub.f32 %v4322_v13, %v4364_v17  ;;  %v4365_v11 = vmul.f32 0.03125, %v4355_v56  ;;  %v4392_v8 = vsel %vm819_vm2, %v4378_v32, 0.0  ;;  %v4379_v62 = vmul.f32 %v8489_v0, %v8489_v0 }
0x161a   :  { %4393 = vadd.xlane.f32.xlu1 %v4392_v8  ;;  %v4358_v25 = vpop.xlane.xlu1 %4357 }
0x161b   :  { %v8499_v33 = vsub.f32 %v4327_v1, %v4365_v11  ;;  %v4366_v49 = vmul.f32 0.03125, %v4358_v25  ;;  %v4395_v58 = vsel %vm819_vm2, %v4379_v62, 0.0  ;;  %v4380_v6 = vmul.f32 %v8494_v2, %v8494_v2 }
0x161c   :  { %4396 = vadd.xlane.f32.xlu0 %v4395_v58 }
0x161d   :  { %v8504_v35 = vsub.f32 %v4330_v63, %v4366_v49  ;;  %v4398_v18 = vsel %vm819_vm2, %v4380_v6, 0.0  ;;  %v4381_v54 = vmul.f32 %v8499_v33, %v8499_v33 }
0x161e   :  { %4399 = vadd.xlane.f32.xlu1 %v4398_v18 }
0x161f   :  { %v4401_v50 = vsel %vm819_vm2, %v4381_v54, 0.0  ;;  %v4382_v7 = vmul.f32 %v8504_v35, %v8504_v35 }
0x1620   :  { %4402 = vadd.xlane.f32.xlu0 %v4401_v50 }
0x1621   :  { %v4404_v36 = vsel %vm819_vm2, %v4382_v7, 0.0 }
0x1622   :  { %4405 = vadd.xlane.f32.xlu1 %v4404_v36 }
0x1633   :  { %4594 = vperm.xlu1 %5545, %v4580_v53  }
0x1636   :  { %4589 = vperm.xlu0 %5544, %v4579_v29  }
0x1637   :  { %4599 = vperm.xlu1 %5545, %v4581_v5  }
0x163b   :  { %4604 = vperm.xlu1 %5545, %v4582_v48  }
0x163f   :  { %4609 = vperm.xlu1 %5545, %v4583_v20  }
0x1643   :  { %4614 = vperm.xlu1 %5545, %v4584_v16  }
0x1647   :  { %4619 = vperm.xlu1 %5545, %v4585_v55  }
0x164b   :  { %4624 = vperm.xlu1 %5545, %v4586_v31  }
0x16a1   :  { %v4385_v10 = vpop.xlane.xlu0 %4384 }
0x16a2   :  { %v4407_v59 = vmul.f32 0.03125, %v4385_v10 }
0x16a3   :  { %v4388_v9 = vpop.xlane.xlu1 %4387 }
0x16a4   :  { %v4415_v37 = vadd.f32 1e-05, %v4407_v59  ;;  %v4408_v4 = vmul.f32 0.03125, %v4388_v9 }
0x16a5   :  { %v4391_v14 = vpop.xlane.xlu0 %4390 }
0x16a6   :  { %5910 = vrsqrt.f32 %v4415_v37  ;;  %v4416_v1 = vadd.f32 1e-05, %v4408_v4  ;;  %v4409_v13 = vmul.f32 0.03125, %v4391_v14 }
0x16a7   :  { %v4394_v40 = vpop.xlane.xlu1 %4393 }
0x16a8   :  { %5912 = vrsqrt.f32 %v4416_v1  ;;  %v4417_v63 = vadd.f32 1e-05, %v4409_v13  ;;  %v4410_v43 = vmul.f32 0.03125, %v4394_v40 }
0x16a9   :  { %v4397_v19 = vpop.xlane.xlu0 %4396 }
0x16aa   :  { %5914 = vrsqrt.f32 %v4417_v63  ;;  %v4418_v39 = vadd.f32 1e-05, %v4410_v43  ;;  %v4411_v57 = vmul.f32 0.03125, %v4397_v19  ;;  %v4858_v43 = vld [vmem:[%s4685_s18] ss:$0 sm:$0xff] }
0x16ab   :  { %v4400_v21 = vpop.xlane.xlu1 %4399 }
0x16ac   :  { %5916 = vrsqrt.f32 %v4418_v39  ;;  %v4419_v41 = vadd.f32 1e-05, %v4411_v57  ;;  %v4412_v30 = vmul.f32 0.03125, %v4400_v21 }
0x16ad   :  { %v4403_v22 = vpop.xlane.xlu0 %4402 }
0x16ae   :  { %5918 = vrsqrt.f32 %v4419_v41  ;;  %v4420_v51 = vadd.f32 1e-05, %v4412_v30  ;;  %v4413_v24 = vmul.f32 0.03125, %v4403_v22 }
0x16af   :  { %v4406_v12 = vpop.xlane.xlu1 %4405 }
0x16b0   :  { %v5911_v38 = vpop.eup %5910  ;;  %5920 = vrsqrt.f32 %v4420_v51  ;;  %v4421_v60 = vadd.f32 1e-05, %v4413_v24  ;;  %v4414_v27 = vmul.f32 0.03125, %v4406_v12 }
0x16b1   :  { %v4431_v15 = vmul.f32 %v5911_v38, %v8473_v34 }
0x16b2   :  { %v5913_v47 = vpop.eup %5912  ;;  %5922 = vrsqrt.f32 %v4421_v60  ;;  %v4422_v45 = vadd.f32 1e-05, %v4414_v27 }
0x16b3   :  { %v4432_v17 = vmul.f32 %v5913_v47, %v8475_v26  ;;  %v4445_v46 = vmul.f32 %v4856_v52, %v4431_v15  ;;  %v4595_v13 = vpop.permute.xlu1 %4594 }
0x16b4   :  { %v5915_v32 = vpop.eup %5914  ;;  %5924 = vrsqrt.f32 %v4422_v45 }
0x16b5   :  { %v4433_v56 = vmul.f32 %v5915_v32, %v8479_v3  ;;  %v4446_v11 = vmul.f32 %v4856_v52, %v4432_v17  ;;  %v4459_v8 = vadd.f32 %v4857_v61, %v4445_v46  ;;  %v4590_v41 = vpop.permute.xlu0 %4589 }
0x16b6   :  { %v5917_v62 = vpop.eup %5916 }
0x16b7   :  { %v4447_v25 = vmul.f32 %v4856_v52, %v4433_v56  ;;  %v4434_v49 = vmul.f32 %v5917_v62, %v8484_v23  ;;  %v4460_v58 = vadd.f32 %v4857_v61, %v4446_v11  ;;  %v4467_v34 = vmax.f32 %v4459_v8, 0.0 }
0x16b8   :  { %v5919_v6 = vpop.eup %5918 }
0x16b9   :  { %v4461_v18 = vadd.f32 %v4857_v61, %v4447_v25  ;;  %v4448_v54 = vmul.f32 %v4856_v52, %v4434_v49  ;;  %v4435_v50 = vmul.f32 %v5919_v6, %v8489_v0  ;;  %v4468_v7 = vmax.f32 %v4460_v58, 0.0 }
0x16ba   :  { %v5921_v26 = vpop.eup %5920 }
0x16bb   :  { %v4462_v36 = vadd.f32 %v4857_v61, %v4448_v54  ;;  %v4436_v28 = vmul.f32 %v5921_v26, %v8494_v2  ;;  %v4479_v42 = vpack.c.bf16 %v4468_v7, %v4467_v34  ;;  %v4449_v44 = vmul.f32 %v4856_v52, %v4435_v50 }
0x16bc   :  { %v5923_v3 = vpop.eup %5922  ;;  %v4469_v53 = vmax.f32 %v4461_v18, 0.0 }
0x16bd   :  { %v4470_v5 = vmax.f32 %v4462_v36, 0.0  ;;  %v4437_v29 = vmul.f32 %v5923_v3, %v8499_v33  ;;  %5487 = vmatprep.mubr.msk.bf16.mxu1 %vm819_vm2, %v4479_v42  ;;  %v4450_v23 = vmul.f32 %v4856_v52, %v4436_v28  ;;  %v4463_v20 = vadd.f32 %v4857_v61, %v4449_v44 }
0x16be   :  { %v5925_v48 = vpop.eup %5924 }
0x16bf   :  { %v4438_v16 = vmul.f32 %v5925_v48, %v8504_v35  ;;  %v4480_v0 = vpack.c.bf16 %v4470_v5, %v4469_v53  ;;  %v4464_v55 = vadd.f32 %v4857_v61, %v4450_v23  ;;  %v4451_v31 = vmul.f32 %v4856_v52, %v4437_v29  ;;  %v4600_v35 = vpop.permute.xlu1 %4599 }
0x16c0   :  { %v4471_v2 = vmax.f32 %v4463_v20, 0.0 }
0x16c1   :  { %5488 = vmatmul.mubr.msk.bf16.vlgmr.msra.gmra.mrb[128].mxu1 %vm819_vm2, %v4480_v0  ;;  %v4472_v10 = vmax.f32 %v4464_v55, 0.0  ;;  %v4452_v59 = vmul.f32 %v4856_v52, %v4438_v16  ;;  %v4465_v9 = vadd.f32 %v4857_v61, %v4451_v31 }
0x16c3   :  { %v4481_v37 = vpack.c.bf16 %v4472_v10, %v4471_v2  ;;  %v4466_v4 = vadd.f32 %v4857_v61, %v4452_v59  ;;  %v4473_v33 = vmax.f32 %v4465_v9, 0.0  ;;  %v4605_v40 = vpop.permute.xlu1 %4604 }
0x16c5   :  { %5491 = vmatprep.mubr.msk.bf16.mxu1 %vm819_vm2, %v4481_v37  ;;  %v4474_v14 = vmax.f32 %v4466_v4, 0.0 }
0x16c7   :  { %v4482_v1 = vpack.c.bf16 %v4474_v14, %v4473_v33  ;;  %v4610_v63 = vpop.permute.xlu1 %4609 }
0x16c9   :  { %5492 = vmatmul.mubr.msk.bf16.gmra.mrb[132].mxu1 %vm819_vm2, %v4482_v1 }
0x16cb   :  { %v4615_v19 = vpop.permute.xlu1 %4614 }
0x16cf   :  { %v4620_v27 = vpop.permute.xlu1 %4619 }
0x16d3   :  { %v4625_v8 = vpop.permute.xlu1 %4624 }
0x1794   :  { %v5489_v39 = vpop.f32.mrb[128].mxu1 }
0x1795   :  { %v4557_v57 = vadd.f32 %v5489_v39, %v4858_v43  ;;  %v4548_v21 = vpop.f32.mrb[129].mxu1 }
0x1796   :  { %v4549_v30 = vadd.f32 %v4858_v43, %v4548_v21  ;;  %v5490_v22 = vpop.f32.mrb[130].mxu1 }
0x1797   :  { %v4629_v51 = vmul.f32 %v4600_v35, %v4557_v57  ;;  %v4560_v24 = vadd.f32 %v5490_v22, %v4858_v43  ;;  %v4551_v12 = vpop.f32.mrb[131].mxu1 }
0x1798   :  { %v4552_v38 = vadd.f32 %v4858_v43, %v4551_v12  ;;  %v4627_v52 = vmul.f32 %v4590_v41, %v4549_v30 }
0x1799   :  { %4638 = vst.msk [vmem:[%s8543_s22 + $0x10] sm:$0xff] %vm4635_vm3, %v4629_v51  ;;  %v4630_v60 = vmul.f32 %v4605_v40, %v4560_v24 }
0x179a   :  { %v4628_v15 = vmul.f32 %v4595_v13, %v4552_v38  ;;  %4636 = vst.msk [vmem:[%s8543_s22] sm:$0xff] %vm4635_vm3, %v4627_v52 }
0x179b   :  { %4639 = vst.msk [vmem:[%s8543_s22 + $0x18] sm:$0xff] %vm4635_vm3, %v4630_v60 }
0x179c   :  { %4637 = vst.msk [vmem:[%s8543_s22 + $0x8] sm:$0xff] %vm4635_vm3, %v4628_v15  ;;  %v5493_v47 = vpop.f32.mrb[132].mxu1 }
0x179d   :  { %v4573_v61 = vadd.f32 %v5493_v47, %v4858_v43  ;;  %v4564_v45 = vpop.f32.mrb[133].mxu1 }
0x179e   :  { %v4565_v17 = vadd.f32 %v4858_v43, %v4564_v45  ;;  %v5494_v46 = vpop.f32.mrb[134].mxu1 }
0x179f   :  { %v4633_v32 = vmul.f32 %v4620_v27, %v4573_v61  ;;  %v4576_v56 = vadd.f32 %v5494_v46, %v4858_v43  ;;  %v4567_v11 = vpop.f32.mrb[135].mxu1 }
0x17a0   :  { %v4631_v62 = vmul.f32 %v4610_v63, %v4565_v17  ;;  %v4568_v25 = vadd.f32 %v4858_v43, %v4567_v11 }
0x17a1   :  { %4642 = vst.msk [vmem:[%s8543_s22 + $0x30] sm:$0xff] %vm4635_vm3, %v4633_v32  ;;  %v4634_v49 = vmul.f32 %v4625_v8, %v4576_v56 }
0x17a2   :  { %4640 = vst.msk [vmem:[%s8543_s22 + $0x20] sm:$0xff] %vm4635_vm3, %v4631_v62  ;;  %v4632_v58 = vmul.f32 %v4615_v19, %v4568_v25 }
0x17a3   :  { %4643 = vst.msk [vmem:[%s8543_s22 + $0x38] sm:$0xff] %vm4635_vm3, %v4634_v49 }
0x17a4   :  { %4641 = vst.msk [vmem:[%s8543_s22 + $0x28] sm:$0xff] %vm4635_vm3, %v4632_v58 }

</bundles_post_ra>
